<compile_context>
chip_gen: v5e
topology: v5e:2x2
jax: 0.10.0
libtpu: 0.0.40
codegen_flags: <defaults>
</compile_context>

<pallas_src>
import functools
import math

import jax
import jax.numpy as jnp
import numpy as np
from jax.experimental import pallas as pl
from jax.experimental.pallas import tpu as pltpu

# ----------------------------- scaled-down config -----------------------------
PATCH_NUM_HEIGHT = 4
PATCH_NUM_WIDTH = 4
MAX_PATCHES = PATCH_NUM_WIDTH * PATCH_NUM_HEIGHT            # 16   (was 576)
POSITION_EMBEDDING_LENGTH = 128                             # == hidden (was 1024)

HIDDEN = POSITION_EMBEDDING_LENGTH                          # lane-dense: 128
NUM_CHANNELS = 3
PATCH_SIZE = 8
IMAGE_SIZE = PATCH_SIZE * PATCH_NUM_WIDTH                   # 32
NUM_HEADS = 4
HEAD_DIM = HIDDEN // NUM_HEADS                              # 32
INTERMEDIATE = 4 * HIDDEN                                   # 512
NUM_LAYERS = 2
LN_EPS = 1e-5
SEQ = MAX_PATCHES + 1                                       # 17   (was 577)
SEQ_PAD = ((SEQ + 7) // 8) * 8                              # 24   sublane aligned


# ------------------------------ in-kernel helpers ------------------------------
def _ln(x, w, b, eps):
    """LayerNorm over the last (lane) axis, f32 math."""
    mean = jnp.mean(x, axis=-1, keepdims=True)
    xc = x - mean
    var = jnp.mean(xc * xc, axis=-1, keepdims=True)
    return xc * jax.lax.rsqrt(var + eps) * w + b


# -------------------------------- fused kernel ---------------------------------
def _vit_kernel(patches_ref, patch_w_ref, pos_ref, pre_g_ref, pre_b_ref,
                ln1_g_ref, ln1_b_ref, qkv_w_ref, qkv_b_ref, o_w_ref, o_b_ref,
                ln2_g_ref, ln2_b_ref, fc1_w_ref, fc1_b_ref, fc2_w_ref, fc2_b_ref,
                post_g_ref, post_b_ref, last_ref, pooled_ref,
                *, num_layers, num_heads, head_dim, seq_real, eps):
    D = num_heads * head_dim

    # ---- embeddings: patch-conv matmul + (class emb folded into pos row 0) ----
    emb = jnp.dot(patches_ref[0], patch_w_ref[...],
                  preferred_element_type=jnp.float32) + pos_ref[0]   # (SP, D)

    # ---- pre-LayerNorm ----
    x = _ln(emb, pre_g_ref[...], pre_b_ref[...], eps)                # (SP, D)
    sp = x.shape[0]

    # ---- attention mask, computed once from the pre-LN'd hidden (reference:
    # rows whose sum == -1.0 get -inf).  The row sums are produced directly in
    # lane direction via a (1,D) @ (SP,D)^T contraction, avoiding a cross-lane
    # transpose.  Alignment-pad keys (>= seq_real) are forced to -inf so the
    # real rows match the unpadded reference exactly.  attention_mask and
    # causal_attention_mask are the same {0,-inf} tensor in the reference, so
    # adding it once == adding it twice.
    key_sums = jax.lax.dot_general(
        jnp.ones((1, D), jnp.float32), x, (((1,), (1,)), ((), ())),
        preferred_element_type=jnp.float32)                          # (1, SP)
    key_ids = jax.lax.broadcasted_iota(jnp.int32, (1, sp), 1)
    mask = jnp.where((key_sums == -1.0) | (key_ids >= seq_real),
                     -jnp.inf, 0.0).astype(jnp.float32)              # (1, SP)

    # ---- encoder layers (static unroll; weights resident in VMEM) ----
    for l in range(num_layers):
        # --- attention block: LN1 -> fused QKV -> per-head attn -> o_proj -> +res
        y = _ln(x, ln1_g_ref[l], ln1_b_ref[l], eps)
        w_qkv = qkv_w_ref[l]                                         # (D, 3D)
        w_o = o_w_ref[l]                                             # (D, D)
        qkv = jnp.dot(y, w_qkv, preferred_element_type=jnp.float32) + qkv_b_ref[l]

        acc = jnp.zeros((sp, D), jnp.float32)
        for h in range(num_heads):                                   # tiny H, static
            s0 = h * head_dim
            qh = qkv[:, s0:s0 + head_dim]                            # scale folded in
            kh = qkv[:, D + s0:D + s0 + head_dim]
            vh = qkv[:, 2 * D + s0:2 * D + s0 + head_dim]
            scores = jax.lax.dot_general(
                qh, kh, (((1,), (1,)), ((), ())),
                preferred_element_type=jnp.float32) + mask           # (SP, SP)
            probs = jax.nn.softmax(scores, axis=-1)
            ctx = jnp.dot(probs, vh, preferred_element_type=jnp.float32)
            # head-merge + o_proj fused: sum_h ctx_h @ o_w[h*Dh:(h+1)*Dh, :]
            acc = acc + jnp.dot(ctx, w_o[s0:s0 + head_dim, :],
                                preferred_element_type=jnp.float32)
        x = x + acc + o_b_ref[l]

        # --- MLP block: LN2 -> fc1 + quick_gelu -> fc2 -> +res
        y = _ln(x, ln2_g_ref[l], ln2_b_ref[l], eps)
        h1 = jnp.dot(y, fc1_w_ref[l], preferred_element_type=jnp.float32) + fc1_b_ref[l]
        h1 = h1 * jax.nn.sigmoid(1.702 * h1)                         # quick_gelu
        x = x + jnp.dot(h1, fc2_w_ref[l],
                        preferred_element_type=jnp.float32) + fc2_b_ref[l]

    # ---- outputs ----
    last_ref[0] = x.astype(last_ref.dtype)
    pooled_ref[0] = _ln(x[0:1, :], post_g_ref[...], post_b_ref[...],
                        eps).astype(pooled_ref.dtype)


# ------------------------------ pallas_call wrapper ----------------------------
def vit_fused(patches_pad, patch_wT, pos_pad, pre_g, pre_b,
              ln1_g, ln1_b, qkv_w, qkv_b, o_w, o_b,
              ln2_g, ln2_b, fc1_w, fc1_b, fc2_w, fc2_b,
              post_g, post_b):
    B, SP, CPP = patches_pad.shape
    D = HIDDEN
    I = INTERMEDIATE
    L = NUM_LAYERS

    def rep2(shape):
        return pl.BlockSpec(shape, lambda i: (0, 0))

    def rep3(shape):
        return pl.BlockSpec(shape, lambda i: (0, 0, 0))

    return pl.pallas_call(
        functools.partial(_vit_kernel, num_layers=L, num_heads=NUM_HEADS,
                          head_dim=HEAD_DIM, seq_real=SEQ, eps=LN_EPS),
        grid=(B,),
        in_specs=[
            pl.BlockSpec((1, SP, CPP), lambda i: (i, 0, 0)),   # patches
            rep2((CPP, D)),                                    # patch weight
            pl.BlockSpec((1, SP, D), lambda i: (i, 0, 0)),     # pos (+class) emb
            rep2((1, D)), rep2((1, D)),                        # pre-LN
            rep3((L, 1, D)), rep3((L, 1, D)),                  # LN1
            rep3((L, D, 3 * D)), rep3((L, 1, 3 * D)),          # fused QKV
            rep3((L, D, D)), rep3((L, 1, D)),                  # o_proj
            rep3((L, 1, D)), rep3((L, 1, D)),                  # LN2
            rep3((L, D, I)), rep3((L, 1, I)),                  # fc1
            rep3((L, I, D)), rep3((L, 1, D)),                  # fc2
            rep2((1, D)), rep2((1, D)),                        # post-LN
        ],
        out_specs=(pl.BlockSpec((1, SP, D), lambda i: (i, 0, 0)),
                   pl.BlockSpec((1, 1, D), lambda i: (i, 0, 0))),
        out_shape=(jax.ShapeDtypeStruct((B, SP, D), jnp.float32),
                   jax.ShapeDtypeStruct((B, 1, D), jnp.float32)),
        compiler_params=pltpu.CompilerParams(
            dimension_semantics=("parallel",)),
    )(patches_pad, patch_wT, pos_pad, pre_g, pre_b,
      ln1_g, ln1_b, qkv_w, qkv_b, o_w, o_b,
      ln2_g, ln2_b, fc1_w, fc1_b, fc2_w, fc2_b, post_g, post_b)


# ----------------------- position-embedding interpolation ----------------------
def _bicubic_weight_matrix(in_size, out_size, A=-0.75):
    """PyTorch F.interpolate(mode='bicubic', align_corners=False) as a matrix."""
    def cc1(x):  # |x| in [0,1]
        return ((A + 2.0) * x - (A + 3.0)) * x * x + 1.0

    def cc2(x):  # |x| in [1,2]
        return ((A * x - 5.0 * A) * x + 8.0 * A) * x - 4.0 * A

    W = np.zeros((out_size, in_size), dtype=np.float64)
    scale = in_size / out_size
    for i in range(out_size):
        center = (i + 0.5) * scale - 0.5
        x0 = math.floor(center)
        t = center - x0
        coeffs = (cc2(t + 1.0), cc1(t), cc1(1.0 - t), cc2(2.0 - t))
        for k, c in enumerate(coeffs):
            idx = min(max(x0 - 1 + k, 0), in_size - 1)   # clamped borders
            W[i, idx] += c
    return jnp.asarray(W, dtype=jnp.float32)


def get_position_embedding(pos_table, class_emb, patch_width_num, patch_height_num):
    """adapt_CLIPVisionEmbeddings.get_position_embedding('bicubic'), with the
    class embedding folded into row 0 and padding up to SEQ_PAD rows."""
    w = int(patch_width_num)
    h = int(patch_height_num)
    pos_class = pos_table[0]
    grid = pos_table[1:].reshape(
        PATCH_NUM_WIDTH, PATCH_NUM_HEIGHT, POSITION_EMBEDDING_LENGTH
    ).astype(jnp.float32)
    Wr = _bicubic_weight_matrix(PATCH_NUM_WIDTH, h)      # dim0 -> h
    Wc = _bicubic_weight_matrix(PATCH_NUM_HEIGHT, w)     # dim1 -> w
    interp = jnp.einsum("ia,jb,abl->ijl", Wr, Wc, grid)  # (h, w, L) param glue
    interp = interp.reshape(h * w, POSITION_EMBEDDING_LENGTH).astype(pos_table.dtype)
    interp = jnp.pad(interp, ((0, MAX_PATCHES - h * w), (0, 0)))
    row0 = (class_emb + pos_class).reshape(1, POSITION_EMBEDDING_LENGTH)
    pos = jnp.concatenate([row0, interp], axis=0)        # (SEQ, D)
    return jnp.pad(pos, ((0, SEQ_PAD - SEQ), (0, 0)))    # (SEQ_PAD, D)


# --------------------------------- parameters ----------------------------------
def init_params(key):
    def normal(k, shape, scale=0.02):
        return scale * jax.random.normal(k, shape, jnp.float32)

    ks = jax.random.split(key, 3 + NUM_LAYERS)
    params = {
        "class_emb": normal(ks[0], (HIDDEN,)),
        "patch_w": normal(ks[1], (HIDDEN, NUM_CHANNELS, PATCH_SIZE, PATCH_SIZE)),
        "pos_table": normal(ks[2], (MAX_PATCHES + 1, HIDDEN)),
        "pre_ln_w": jnp.ones((HIDDEN,), jnp.float32),
        "pre_ln_b": jnp.zeros((HIDDEN,), jnp.float32),
        "post_ln_w": jnp.ones((HIDDEN,), jnp.float32),
        "post_ln_b": jnp.zeros((HIDDEN,), jnp.float32),
        "layers": [],
    }
    for i in range(NUM_LAYERS):
        lk = jax.random.split(ks[3 + i], 6)
        params["layers"].append({
            "ln1_w": jnp.ones((HIDDEN,), jnp.float32),
            "ln1_b": jnp.zeros((HIDDEN,), jnp.float32),
            "q_w": normal(lk[0], (HIDDEN, HIDDEN)), "q_b": jnp.zeros((HIDDEN,)),
            "k_w": normal(lk[1], (HIDDEN, HIDDEN)), "k_b": jnp.zeros((HIDDEN,)),
            "v_w": normal(lk[2], (HIDDEN, HIDDEN)), "v_b": jnp.zeros((HIDDEN,)),
            "o_w": normal(lk[3], (HIDDEN, HIDDEN)), "o_b": jnp.zeros((HIDDEN,)),
            "ln2_w": jnp.ones((HIDDEN,), jnp.float32),
            "ln2_b": jnp.zeros((HIDDEN,), jnp.float32),
            "fc1_w": normal(lk[4], (HIDDEN, INTERMEDIATE)),
            "fc1_b": jnp.zeros((INTERMEDIATE,)),
            "fc2_w": normal(lk[5], (INTERMEDIATE, HIDDEN)),
            "fc2_b": jnp.zeros((HIDDEN,)),
        })
    return params


# ----------------------------------- forward ------------------------------------
def forward(params, pixel_values, w_patch_num, h_patch_num):
    B, C, Himg, Wimg = pixel_values.shape
    p = PATCH_SIZE
    hP, wP = Himg // p, Wimg // p
    nP = hP * wP
    D = HIDDEN
    CPP = C * p * p

    # --- Conv2d(stride=kernel, bias=False) as patch extraction + in-kernel matmul ---
    patches = pixel_values.reshape(B, C, hP, p, wP, p)
    patches = patches.transpose(0, 2, 4, 1, 3, 5).reshape(B, nP, CPP)
    # row 0 = class-token slot (zero patch); trailing rows = sublane-alignment pad.
    patches_pad = jnp.pad(patches, ((0, 0), (1, SEQ_PAD - 1 - nP), (0, 0)))
    patch_wT = params["patch_w"].reshape(D, CPP).T            # (CPP, D), built once

    pos_pad = jnp.stack([
        get_position_embedding(params["pos_table"], params["class_emb"], wn, hn)
        for wn, hn in zip(w_patch_num, h_patch_num)
    ])                                                        # (B, SEQ_PAD, D)

    # --- stack per-layer weights along L; fold head scale into Q columns ---
    scale = HEAD_DIM ** -0.5
    layers = params["layers"]
    ln1_g = jnp.stack([l["ln1_w"] for l in layers])[:, None, :]
    ln1_b = jnp.stack([l["ln1_b"] for l in layers])[:, None, :]
    qkv_w = jnp.stack([jnp.concatenate([l["q_w"] * scale, l["k_w"], l["v_w"]], axis=1)
                       for l in layers])                      # (L, D, 3D)
    qkv_b = jnp.stack([jnp.concatenate([l["q_b"] * scale, l["k_b"], l["v_b"]])
                       for l in layers])[:, None, :]          # (L, 1, 3D)
    o_w = jnp.stack([l["o_w"] for l in layers])               # (L, D, D)
    o_b = jnp.stack([l["o_b"] for l in layers])[:, None, :]
    ln2_g = jnp.stack([l["ln2_w"] for l in layers])[:, None, :]
    ln2_b = jnp.stack([l["ln2_b"] for l in layers])[:, None, :]
    fc1_w = jnp.stack([l["fc1_w"] for l in layers])           # (L, D, I)
    fc1_b = jnp.stack([l["fc1_b"] for l in layers])[:, None, :]
    fc2_w = jnp.stack([l["fc2_w"] for l in layers])           # (L, I, D)
    fc2_b = jnp.stack([l["fc2_b"] for l in layers])[:, None, :]

    last_pad, pooled = vit_fused(
        patches_pad, patch_wT, pos_pad,
        params["pre_ln_w"].reshape(1, D), params["pre_ln_b"].reshape(1, D),
        ln1_g, ln1_b, qkv_w, qkv_b, o_w, o_b,
        ln2_g, ln2_b, fc1_w, fc1_b, fc2_w, fc2_b,
        params["post_ln_w"].reshape(1, D), params["post_ln_b"].reshape(1, D))

    last_hidden_state = last_pad[:, :SEQ, :]                  # drop alignment pad
    pooled_output = pooled[:, 0, :]
    return last_hidden_state, pooled_output


# ------------------------------------- main -------------------------------------
if __name__ == "__main__":
    key = jax.random.PRNGKey(0)
    params = init_params(key)

    pix_key = jax.random.fold_in(key, 999)
    pixel_values = jax.random.normal(
        pix_key, (2, NUM_CHANNELS, IMAGE_SIZE, IMAGE_SIZE), jnp.float32)
    w_patch_num = [3, 4]
    h_patch_num = [4, 2]

    last, pooled = forward(params, pixel_values, w_patch_num, h_patch_num)
    jax.block_until_ready((last, pooled))

    assert last.shape == (2, SEQ, HIDDEN)
    assert pooled.shape == (2, HIDDEN)
    assert bool(jnp.all(jnp.isfinite(last))) and bool(jnp.all(jnp.isfinite(pooled)))
    print("KERNEL_OK")
</pallas_src>

<mosaic_0001>
module attributes {stable_mosaic.version = 11 : i64} {
  func.func @_vit_kernel(%arg0: i32, %arg1: memref<1x24x192xf32, #tpu.memory_space<vmem>>, %arg2: memref<192x128xf32, #tpu.memory_space<vmem>>, %arg3: memref<1x24x128xf32, #tpu.memory_space<vmem>>, %arg4: memref<1x128xf32, #tpu.memory_space<vmem>>, %arg5: memref<1x128xf32, #tpu.memory_space<vmem>>, %arg6: memref<2x1x128xf32, #tpu.memory_space<vmem>>, %arg7: memref<2x1x128xf32, #tpu.memory_space<vmem>>, %arg8: memref<2x128x384xf32, #tpu.memory_space<vmem>>, %arg9: memref<2x1x384xf32, #tpu.memory_space<vmem>>, %arg10: memref<2x128x128xf32, #tpu.memory_space<vmem>>, %arg11: memref<2x1x128xf32, #tpu.memory_space<vmem>>, %arg12: memref<2x1x128xf32, #tpu.memory_space<vmem>>, %arg13: memref<2x1x128xf32, #tpu.memory_space<vmem>>, %arg14: memref<2x128x512xf32, #tpu.memory_space<vmem>>, %arg15: memref<2x1x512xf32, #tpu.memory_space<vmem>>, %arg16: memref<2x512x128xf32, #tpu.memory_space<vmem>>, %arg17: memref<2x1x128xf32, #tpu.memory_space<vmem>>, %arg18: memref<1x128xf32, #tpu.memory_space<vmem>>, %arg19: memref<1x128xf32, #tpu.memory_space<vmem>>, %arg20: memref<1x24x128xf32, #tpu.memory_space<vmem>>, %arg21: memref<1x1x128xf32, #tpu.memory_space<vmem>>) attributes {dimension_semantics = [#tpu.dimension_semantics<parallel>], iteration_bounds = array<i64: 2>, scalar_prefetch = 0 : i64, scratch_operands = 0 : i64, tpu.core_type = #tpu.core_type<tc>, window_params = [{transform_indices = @transform_0, window_bounds = array<i64: 1, 24, 192>}, {pipeline_mode = #tpu.pipeline_mode<synchronous>, transform_indices = @transform_1, window_bounds = array<i64: 192, 128>}, {transform_indices = @transform_2, window_bounds = array<i64: 1, 24, 128>}, {pipeline_mode = #tpu.pipeline_mode<synchronous>, transform_indices = @transform_3, window_bounds = array<i64: 1, 128>}, {pipeline_mode = #tpu.pipeline_mode<synchronous>, transform_indices = @transform_4, window_bounds = array<i64: 1, 128>}, {pipeline_mode = #tpu.pipeline_mode<synchronous>, transform_indices = @transform_5, window_bounds = array<i64: 2, 1, 128>}, {pipeline_mode = #tpu.pipeline_mode<synchronous>, transform_indices = @transform_6, window_bounds = array<i64: 2, 1, 128>}, {pipeline_mode = #tpu.pipeline_mode<synchronous>, transform_indices = @transform_7, window_bounds = array<i64: 2, 128, 384>}, {pipeline_mode = #tpu.pipeline_mode<synchronous>, transform_indices = @transform_8, window_bounds = array<i64: 2, 1, 384>}, {pipeline_mode = #tpu.pipeline_mode<synchronous>, transform_indices = @transform_9, window_bounds = array<i64: 2, 128, 128>}, {pipeline_mode = #tpu.pipeline_mode<synchronous>, transform_indices = @transform_10, window_bounds = array<i64: 2, 1, 128>}, {pipeline_mode = #tpu.pipeline_mode<synchronous>, transform_indices = @transform_11, window_bounds = array<i64: 2, 1, 128>}, {pipeline_mode = #tpu.pipeline_mode<synchronous>, transform_indices = @transform_12, window_bounds = array<i64: 2, 1, 128>}, {pipeline_mode = #tpu.pipeline_mode<synchronous>, transform_indices = @transform_13, window_bounds = array<i64: 2, 128, 512>}, {pipeline_mode = #tpu.pipeline_mode<synchronous>, transform_indices = @transform_14, window_bounds = array<i64: 2, 1, 512>}, {pipeline_mode = #tpu.pipeline_mode<synchronous>, transform_indices = @transform_15, window_bounds = array<i64: 2, 512, 128>}, {pipeline_mode = #tpu.pipeline_mode<synchronous>, transform_indices = @transform_16, window_bounds = array<i64: 2, 1, 128>}, {pipeline_mode = #tpu.pipeline_mode<synchronous>, transform_indices = @transform_17, window_bounds = array<i64: 1, 128>}, {pipeline_mode = #tpu.pipeline_mode<synchronous>, transform_indices = @transform_18, window_bounds = array<i64: 1, 128>}, {transform_indices = @transform_19, window_bounds = array<i64: 1, 24, 128>}, {transform_indices = @transform_20, window_bounds = array<i64: 1, 1, 128>}]} {
    %c0 = arith.constant 0 : index
    %c0_0 = arith.constant 0 : index
    %c0_1 = arith.constant 0 : index
    %0 = vector.load %arg1[%c0, %c0_0, %c0_1] : memref<1x24x192xf32, #tpu.memory_space<vmem>>, vector<1x24x192xf32>
    %1 = vector.shape_cast %0 : vector<1x24x192xf32> to vector<24x192xf32>
    %c0_2 = arith.constant 0 : index
    %c0_3 = arith.constant 0 : index
    %2 = vector.load %arg2[%c0_2, %c0_3] : memref<192x128xf32, #tpu.memory_space<vmem>>, vector<192x128xf32>
    %cst = arith.constant dense<0.000000e+00> : vector<24x128xf32>
    %3 = tpu.matmul %1, %2, %cst {dimension_numbers = #tpu.dot_dimension_numbers<[1], [0], [0], [1], [0, 0, 1, 1], [], []>} : vector<24x192xf32>, vector<192x128xf32>, vector<24x128xf32> -> vector<24x128xf32>
    %c0_4 = arith.constant 0 : index
    %c0_5 = arith.constant 0 : index
    %c0_6 = arith.constant 0 : index
    %4 = vector.load %arg3[%c0_4, %c0_5, %c0_6] : memref<1x24x128xf32, #tpu.memory_space<vmem>>, vector<1x24x128xf32>
    %5 = vector.shape_cast %4 : vector<1x24x128xf32> to vector<24x128xf32>
    %6 = arith.addf %3, %5 : vector<24x128xf32>
    %c0_7 = arith.constant 0 : index
    %c0_8 = arith.constant 0 : index
    %7 = vector.load %arg4[%c0_7, %c0_8] : memref<1x128xf32, #tpu.memory_space<vmem>>, vector<1x128xf32>
    %c0_9 = arith.constant 0 : index
    %c0_10 = arith.constant 0 : index
    %8 = vector.load %arg5[%c0_9, %c0_10] : memref<1x128xf32, #tpu.memory_space<vmem>>, vector<1x128xf32>
    %cst_11 = arith.constant dense<0.000000e+00> : vector<24xf32>
    %9 = vector.multi_reduction <add>, %6, %cst_11 [1] : vector<24x128xf32> to vector<24xf32>
    %10 = vector.shape_cast %9 : vector<24xf32> to vector<24x1xf32>
    %cst_12 = arith.constant 1.280000e+02 : f32
    %11 = vector.broadcast %cst_12 : f32 to vector<24x1xf32>
    %12 = arith.divf %10, %11 : vector<24x1xf32>
    %13 = vector.broadcast %12 : vector<24x1xf32> to vector<24x128xf32>
    %14 = arith.subf %6, %13 : vector<24x128xf32>
    %15 = arith.mulf %14, %14 : vector<24x128xf32>
    %cst_13 = arith.constant dense<0.000000e+00> : vector<24xf32>
    %16 = vector.multi_reduction <add>, %15, %cst_13 [1] : vector<24x128xf32> to vector<24xf32>
    %17 = vector.shape_cast %16 : vector<24xf32> to vector<24x1xf32>
    %cst_14 = arith.constant 1.280000e+02 : f32
    %18 = vector.broadcast %cst_14 : f32 to vector<24x1xf32>
    %19 = arith.divf %17, %18 : vector<24x1xf32>
    %cst_15 = arith.constant 9.99999974E-6 : f32
    %20 = vector.broadcast %cst_15 : f32 to vector<24x1xf32>
    %21 = arith.addf %19, %20 : vector<24x1xf32>
    %22 = math.rsqrt %21 : vector<24x1xf32>
    %23 = vector.broadcast %22 : vector<24x1xf32> to vector<24x128xf32>
    %24 = arith.mulf %14, %23 : vector<24x128xf32>
    %25 = vector.broadcast %7 : vector<1x128xf32> to vector<24x128xf32>
    %26 = arith.mulf %24, %25 : vector<24x128xf32>
    %27 = vector.broadcast %8 : vector<1x128xf32> to vector<24x128xf32>
    %28 = arith.addf %26, %27 : vector<24x128xf32>
    %cst_16 = arith.constant 1.000000e+00 : f32
    %29 = vector.broadcast %cst_16 : f32 to vector<1x128xf32>
    %cst_17 = arith.constant dense<0.000000e+00> : vector<1x24xf32>
    %30 = tpu.matmul %29, %28, %cst_17 {dimension_numbers = #tpu.dot_dimension_numbers<[1], [1], [0], [0], [0, 0, 1, 0], [], []>} : vector<1x128xf32>, vector<24x128xf32>, vector<1x24xf32> -> vector<1x24xf32>
    %31 = tpu.iota {dimensions = array<i32: 1>} : vector<1x24xi32>
    %cst_18 = arith.constant -1.000000e+00 : f32
    %32 = vector.broadcast %cst_18 : f32 to vector<1x24xf32>
    %33 = arith.cmpf oeq, %30, %32 : vector<1x24xf32>
    %c17_i32 = arith.constant 17 : i32
    %34 = vector.broadcast %c17_i32 : i32 to vector<1x24xi32>
    %35 = arith.cmpi sge, %31, %34 : vector<1x24xi32>
    %36 = arith.ori %33, %35 : vector<1x24xi1>
    %cst_19 = arith.constant 0xFF800000 : f32
    %cst_20 = arith.constant 0.000000e+00 : f32
    %37 = vector.broadcast %cst_19 : f32 to vector<1x24xf32>
    %38 = vector.broadcast %cst_20 : f32 to vector<1x24xf32>
    %39 = arith.select %36, %37, %38 : vector<1x24xi1>, vector<1x24xf32>
    %c0_21 = arith.constant 0 : index
    %c0_22 = arith.constant 0 : index
    %c0_23 = arith.constant 0 : index
    %40 = vector.load %arg6[%c0_21, %c0_22, %c0_23] : memref<2x1x128xf32, #tpu.memory_space<vmem>>, vector<1x1x128xf32>
    %41 = vector.shape_cast %40 : vector<1x1x128xf32> to vector<1x128xf32>
    %c0_24 = arith.constant 0 : index
    %c0_25 = arith.constant 0 : index
    %c0_26 = arith.constant 0 : index
    %42 = vector.load %arg7[%c0_24, %c0_25, %c0_26] : memref<2x1x128xf32, #tpu.memory_space<vmem>>, vector<1x1x128xf32>
    %43 = vector.shape_cast %42 : vector<1x1x128xf32> to vector<1x128xf32>
    %cst_27 = arith.constant dense<0.000000e+00> : vector<24xf32>
    %44 = vector.multi_reduction <add>, %28, %cst_27 [1] : vector<24x128xf32> to vector<24xf32>
    %45 = vector.shape_cast %44 : vector<24xf32> to vector<24x1xf32>
    %cst_28 = arith.constant 1.280000e+02 : f32
    %46 = vector.broadcast %cst_28 : f32 to vector<24x1xf32>
    %47 = arith.divf %45, %46 : vector<24x1xf32>
    %48 = vector.broadcast %47 : vector<24x1xf32> to vector<24x128xf32>
    %49 = arith.subf %28, %48 : vector<24x128xf32>
    %50 = arith.mulf %49, %49 : vector<24x128xf32>
    %cst_29 = arith.constant dense<0.000000e+00> : vector<24xf32>
    %51 = vector.multi_reduction <add>, %50, %cst_29 [1] : vector<24x128xf32> to vector<24xf32>
    %52 = vector.shape_cast %51 : vector<24xf32> to vector<24x1xf32>
    %cst_30 = arith.constant 1.280000e+02 : f32
    %53 = vector.broadcast %cst_30 : f32 to vector<24x1xf32>
    %54 = arith.divf %52, %53 : vector<24x1xf32>
    %cst_31 = arith.constant 9.99999974E-6 : f32
    %55 = vector.broadcast %cst_31 : f32 to vector<24x1xf32>
    %56 = arith.addf %54, %55 : vector<24x1xf32>
    %57 = math.rsqrt %56 : vector<24x1xf32>
    %58 = vector.broadcast %57 : vector<24x1xf32> to vector<24x128xf32>
    %59 = arith.mulf %49, %58 : vector<24x128xf32>
    %60 = vector.broadcast %41 : vector<1x128xf32> to vector<24x128xf32>
    %61 = arith.mulf %59, %60 : vector<24x128xf32>
    %62 = vector.broadcast %43 : vector<1x128xf32> to vector<24x128xf32>
    %63 = arith.addf %61, %62 : vector<24x128xf32>
    %c0_32 = arith.constant 0 : index
    %c0_33 = arith.constant 0 : index
    %c0_34 = arith.constant 0 : index
    %64 = vector.load %arg8[%c0_32, %c0_33, %c0_34] : memref<2x128x384xf32, #tpu.memory_space<vmem>>, vector<1x128x384xf32>
    %65 = vector.shape_cast %64 : vector<1x128x384xf32> to vector<128x384xf32>
    %c0_35 = arith.constant 0 : index
    %c0_36 = arith.constant 0 : index
    %c0_37 = arith.constant 0 : index
    %66 = vector.load %arg10[%c0_35, %c0_36, %c0_37] : memref<2x128x128xf32, #tpu.memory_space<vmem>>, vector<1x128x128xf32>
    %67 = vector.shape_cast %66 : vector<1x128x128xf32> to vector<128x128xf32>
    %cst_38 = arith.constant dense<0.000000e+00> : vector<24x384xf32>
    %68 = tpu.matmul %63, %65, %cst_38 {dimension_numbers = #tpu.dot_dimension_numbers<[1], [0], [0], [1], [0, 0, 1, 1], [], []>} : vector<24x128xf32>, vector<128x384xf32>, vector<24x384xf32> -> vector<24x384xf32>
    %c0_39 = arith.constant 0 : index
    %c0_40 = arith.constant 0 : index
    %c0_41 = arith.constant 0 : index
    %69 = vector.load %arg9[%c0_39, %c0_40, %c0_41] : memref<2x1x384xf32, #tpu.memory_space<vmem>>, vector<1x1x384xf32>
    %70 = vector.shape_cast %69 : vector<1x1x384xf32> to vector<1x384xf32>
    %71 = vector.broadcast %70 : vector<1x384xf32> to vector<24x384xf32>
    %72 = arith.addf %68, %71 : vector<24x384xf32>
    %cst_42 = arith.constant 0.000000e+00 : f32
    %73 = vector.broadcast %cst_42 : f32 to vector<24x128xf32>
    %74 = vector.extract_strided_slice %72 {offsets = [0, 0], sizes = [24, 32], strides = [1, 1]} : vector<24x384xf32> to vector<24x32xf32>
    %75 = vector.extract_strided_slice %72 {offsets = [0, 128], sizes = [24, 32], strides = [1, 1]} : vector<24x384xf32> to vector<24x32xf32>
    %76 = vector.extract_strided_slice %72 {offsets = [0, 256], sizes = [24, 32], strides = [1, 1]} : vector<24x384xf32> to vector<24x32xf32>
    %cst_43 = arith.constant dense<0.000000e+00> : vector<24x24xf32>
    %77 = tpu.matmul %74, %75, %cst_43 {dimension_numbers = #tpu.dot_dimension_numbers<[1], [1], [0], [0], [0, 0, 1, 0], [], []>} : vector<24x32xf32>, vector<24x32xf32>, vector<24x24xf32> -> vector<24x24xf32>
    %78 = vector.broadcast %39 : vector<1x24xf32> to vector<24x24xf32>
    %79 = arith.addf %77, %78 : vector<24x24xf32>
    %cst_44 = arith.constant dense<0xFF800000> : vector<24xf32>
    %80 = vector.multi_reduction <maximumf>, %79, %cst_44 [1] : vector<24x24xf32> to vector<24xf32>
    %cst_45 = arith.constant 0xFF800000 : f32
    %81 = vector.broadcast %cst_45 : f32 to vector<24xf32>
    %82 = arith.maximumf %81, %80 : vector<24xf32>
    %83 = vector.shape_cast %82 : vector<24xf32> to vector<24x1xf32>
    %84 = vector.broadcast %83 : vector<24x1xf32> to vector<24x24xf32>
    %85 = arith.subf %79, %84 : vector<24x24xf32>
    %86 = math.exp %85 : vector<24x24xf32>
    %cst_46 = arith.constant dense<0.000000e+00> : vector<24xf32>
    %87 = vector.multi_reduction <add>, %86, %cst_46 [1] : vector<24x24xf32> to vector<24xf32>
    %88 = vector.shape_cast %87 : vector<24xf32> to vector<24x1xf32>
    %89 = vector.broadcast %88 : vector<24x1xf32> to vector<24x24xf32>
    %90 = arith.divf %86, %89 : vector<24x24xf32>
    %cst_47 = arith.constant dense<0.000000e+00> : vector<24x32xf32>
    %91 = tpu.matmul %90, %76, %cst_47 {dimension_numbers = #tpu.dot_dimension_numbers<[1], [0], [0], [1], [0, 0, 1, 1], [], []>} : vector<24x24xf32>, vector<24x32xf32>, vector<24x32xf32> -> vector<24x32xf32>
    %92 = vector.extract_strided_slice %67 {offsets = [0, 0], sizes = [32, 128], strides = [1, 1]} : vector<128x128xf32> to vector<32x128xf32>
    %cst_48 = arith.constant dense<0.000000e+00> : vector<24x128xf32>
    %93 = tpu.matmul %91, %92, %cst_48 {dimension_numbers = #tpu.dot_dimension_numbers<[1], [0], [0], [1], [0, 0, 1, 1], [], []>} : vector<24x32xf32>, vector<32x128xf32>, vector<24x128xf32> -> vector<24x128xf32>
    %94 = arith.addf %73, %93 : vector<24x128xf32>
    %95 = vector.extract_strided_slice %72 {offsets = [0, 32], sizes = [24, 32], strides = [1, 1]} : vector<24x384xf32> to vector<24x32xf32>
    %96 = vector.extract_strided_slice %72 {offsets = [0, 160], sizes = [24, 32], strides = [1, 1]} : vector<24x384xf32> to vector<24x32xf32>
    %97 = vector.extract_strided_slice %72 {offsets = [0, 288], sizes = [24, 32], strides = [1, 1]} : vector<24x384xf32> to vector<24x32xf32>
    %cst_49 = arith.constant dense<0.000000e+00> : vector<24x24xf32>
    %98 = tpu.matmul %95, %96, %cst_49 {dimension_numbers = #tpu.dot_dimension_numbers<[1], [1], [0], [0], [0, 0, 1, 0], [], []>} : vector<24x32xf32>, vector<24x32xf32>, vector<24x24xf32> -> vector<24x24xf32>
    %99 = vector.broadcast %39 : vector<1x24xf32> to vector<24x24xf32>
    %100 = arith.addf %98, %99 : vector<24x24xf32>
    %cst_50 = arith.constant dense<0xFF800000> : vector<24xf32>
    %101 = vector.multi_reduction <maximumf>, %100, %cst_50 [1] : vector<24x24xf32> to vector<24xf32>
    %cst_51 = arith.constant 0xFF800000 : f32
    %102 = vector.broadcast %cst_51 : f32 to vector<24xf32>
    %103 = arith.maximumf %102, %101 : vector<24xf32>
    %104 = vector.shape_cast %103 : vector<24xf32> to vector<24x1xf32>
    %105 = vector.broadcast %104 : vector<24x1xf32> to vector<24x24xf32>
    %106 = arith.subf %100, %105 : vector<24x24xf32>
    %107 = math.exp %106 : vector<24x24xf32>
    %cst_52 = arith.constant dense<0.000000e+00> : vector<24xf32>
    %108 = vector.multi_reduction <add>, %107, %cst_52 [1] : vector<24x24xf32> to vector<24xf32>
    %109 = vector.shape_cast %108 : vector<24xf32> to vector<24x1xf32>
    %110 = vector.broadcast %109 : vector<24x1xf32> to vector<24x24xf32>
    %111 = arith.divf %107, %110 : vector<24x24xf32>
    %cst_53 = arith.constant dense<0.000000e+00> : vector<24x32xf32>
    %112 = tpu.matmul %111, %97, %cst_53 {dimension_numbers = #tpu.dot_dimension_numbers<[1], [0], [0], [1], [0, 0, 1, 1], [], []>} : vector<24x24xf32>, vector<24x32xf32>, vector<24x32xf32> -> vector<24x32xf32>
    %113 = vector.extract_strided_slice %67 {offsets = [32, 0], sizes = [32, 128], strides = [1, 1]} : vector<128x128xf32> to vector<32x128xf32>
    %cst_54 = arith.constant dense<0.000000e+00> : vector<24x128xf32>
    %114 = tpu.matmul %112, %113, %cst_54 {dimension_numbers = #tpu.dot_dimension_numbers<[1], [0], [0], [1], [0, 0, 1, 1], [], []>} : vector<24x32xf32>, vector<32x128xf32>, vector<24x128xf32> -> vector<24x128xf32>
    %115 = arith.addf %94, %114 : vector<24x128xf32>
    %116 = vector.extract_strided_slice %72 {offsets = [0, 64], sizes = [24, 32], strides = [1, 1]} : vector<24x384xf32> to vector<24x32xf32>
    %117 = vector.extract_strided_slice %72 {offsets = [0, 192], sizes = [24, 32], strides = [1, 1]} : vector<24x384xf32> to vector<24x32xf32>
    %118 = vector.extract_strided_slice %72 {offsets = [0, 320], sizes = [24, 32], strides = [1, 1]} : vector<24x384xf32> to vector<24x32xf32>
    %cst_55 = arith.constant dense<0.000000e+00> : vector<24x24xf32>
    %119 = tpu.matmul %116, %117, %cst_55 {dimension_numbers = #tpu.dot_dimension_numbers<[1], [1], [0], [0], [0, 0, 1, 0], [], []>} : vector<24x32xf32>, vector<24x32xf32>, vector<24x24xf32> -> vector<24x24xf32>
    %120 = vector.broadcast %39 : vector<1x24xf32> to vector<24x24xf32>
    %121 = arith.addf %119, %120 : vector<24x24xf32>
    %cst_56 = arith.constant dense<0xFF800000> : vector<24xf32>
    %122 = vector.multi_reduction <maximumf>, %121, %cst_56 [1] : vector<24x24xf32> to vector<24xf32>
    %cst_57 = arith.constant 0xFF800000 : f32
    %123 = vector.broadcast %cst_57 : f32 to vector<24xf32>
    %124 = arith.maximumf %123, %122 : vector<24xf32>
    %125 = vector.shape_cast %124 : vector<24xf32> to vector<24x1xf32>
    %126 = vector.broadcast %125 : vector<24x1xf32> to vector<24x24xf32>
    %127 = arith.subf %121, %126 : vector<24x24xf32>
    %128 = math.exp %127 : vector<24x24xf32>
    %cst_58 = arith.constant dense<0.000000e+00> : vector<24xf32>
    %129 = vector.multi_reduction <add>, %128, %cst_58 [1] : vector<24x24xf32> to vector<24xf32>
    %130 = vector.shape_cast %129 : vector<24xf32> to vector<24x1xf32>
    %131 = vector.broadcast %130 : vector<24x1xf32> to vector<24x24xf32>
    %132 = arith.divf %128, %131 : vector<24x24xf32>
    %cst_59 = arith.constant dense<0.000000e+00> : vector<24x32xf32>
    %133 = tpu.matmul %132, %118, %cst_59 {dimension_numbers = #tpu.dot_dimension_numbers<[1], [0], [0], [1], [0, 0, 1, 1], [], []>} : vector<24x24xf32>, vector<24x32xf32>, vector<24x32xf32> -> vector<24x32xf32>
    %134 = vector.extract_strided_slice %67 {offsets = [64, 0], sizes = [32, 128], strides = [1, 1]} : vector<128x128xf32> to vector<32x128xf32>
    %cst_60 = arith.constant dense<0.000000e+00> : vector<24x128xf32>
    %135 = tpu.matmul %133, %134, %cst_60 {dimension_numbers = #tpu.dot_dimension_numbers<[1], [0], [0], [1], [0, 0, 1, 1], [], []>} : vector<24x32xf32>, vector<32x128xf32>, vector<24x128xf32> -> vector<24x128xf32>
    %136 = arith.addf %115, %135 : vector<24x128xf32>
    %137 = vector.extract_strided_slice %72 {offsets = [0, 96], sizes = [24, 32], strides = [1, 1]} : vector<24x384xf32> to vector<24x32xf32>
    %138 = vector.extract_strided_slice %72 {offsets = [0, 224], sizes = [24, 32], strides = [1, 1]} : vector<24x384xf32> to vector<24x32xf32>
    %139 = vector.extract_strided_slice %72 {offsets = [0, 352], sizes = [24, 32], strides = [1, 1]} : vector<24x384xf32> to vector<24x32xf32>
    %cst_61 = arith.constant dense<0.000000e+00> : vector<24x24xf32>
    %140 = tpu.matmul %137, %138, %cst_61 {dimension_numbers = #tpu.dot_dimension_numbers<[1], [1], [0], [0], [0, 0, 1, 0], [], []>} : vector<24x32xf32>, vector<24x32xf32>, vector<24x24xf32> -> vector<24x24xf32>
    %141 = vector.broadcast %39 : vector<1x24xf32> to vector<24x24xf32>
    %142 = arith.addf %140, %141 : vector<24x24xf32>
    %cst_62 = arith.constant dense<0xFF800000> : vector<24xf32>
    %143 = vector.multi_reduction <maximumf>, %142, %cst_62 [1] : vector<24x24xf32> to vector<24xf32>
    %cst_63 = arith.constant 0xFF800000 : f32
    %144 = vector.broadcast %cst_63 : f32 to vector<24xf32>
    %145 = arith.maximumf %144, %143 : vector<24xf32>
    %146 = vector.shape_cast %145 : vector<24xf32> to vector<24x1xf32>
    %147 = vector.broadcast %146 : vector<24x1xf32> to vector<24x24xf32>
    %148 = arith.subf %142, %147 : vector<24x24xf32>
    %149 = math.exp %148 : vector<24x24xf32>
    %cst_64 = arith.constant dense<0.000000e+00> : vector<24xf32>
    %150 = vector.multi_reduction <add>, %149, %cst_64 [1] : vector<24x24xf32> to vector<24xf32>
    %151 = vector.shape_cast %150 : vector<24xf32> to vector<24x1xf32>
    %152 = vector.broadcast %151 : vector<24x1xf32> to vector<24x24xf32>
    %153 = arith.divf %149, %152 : vector<24x24xf32>
    %cst_65 = arith.constant dense<0.000000e+00> : vector<24x32xf32>
    %154 = tpu.matmul %153, %139, %cst_65 {dimension_numbers = #tpu.dot_dimension_numbers<[1], [0], [0], [1], [0, 0, 1, 1], [], []>} : vector<24x24xf32>, vector<24x32xf32>, vector<24x32xf32> -> vector<24x32xf32>
    %155 = vector.extract_strided_slice %67 {offsets = [96, 0], sizes = [32, 128], strides = [1, 1]} : vector<128x128xf32> to vector<32x128xf32>
    %cst_66 = arith.constant dense<0.000000e+00> : vector<24x128xf32>
    %156 = tpu.matmul %154, %155, %cst_66 {dimension_numbers = #tpu.dot_dimension_numbers<[1], [0], [0], [1], [0, 0, 1, 1], [], []>} : vector<24x32xf32>, vector<32x128xf32>, vector<24x128xf32> -> vector<24x128xf32>
    %157 = arith.addf %136, %156 : vector<24x128xf32>
    %158 = arith.addf %28, %157 : vector<24x128xf32>
    %c0_67 = arith.constant 0 : index
    %c0_68 = arith.constant 0 : index
    %c0_69 = arith.constant 0 : index
    %159 = vector.load %arg11[%c0_67, %c0_68, %c0_69] : memref<2x1x128xf32, #tpu.memory_space<vmem>>, vector<1x1x128xf32>
    %160 = vector.shape_cast %159 : vector<1x1x128xf32> to vector<1x128xf32>
    %161 = vector.broadcast %160 : vector<1x128xf32> to vector<24x128xf32>
    %162 = arith.addf %158, %161 : vector<24x128xf32>
    %c0_70 = arith.constant 0 : index
    %c0_71 = arith.constant 0 : index
    %c0_72 = arith.constant 0 : index
    %163 = vector.load %arg12[%c0_70, %c0_71, %c0_72] : memref<2x1x128xf32, #tpu.memory_space<vmem>>, vector<1x1x128xf32>
    %164 = vector.shape_cast %163 : vector<1x1x128xf32> to vector<1x128xf32>
    %c0_73 = arith.constant 0 : index
    %c0_74 = arith.constant 0 : index
    %c0_75 = arith.constant 0 : index
    %165 = vector.load %arg13[%c0_73, %c0_74, %c0_75] : memref<2x1x128xf32, #tpu.memory_space<vmem>>, vector<1x1x128xf32>
    %166 = vector.shape_cast %165 : vector<1x1x128xf32> to vector<1x128xf32>
    %cst_76 = arith.constant dense<0.000000e+00> : vector<24xf32>
    %167 = vector.multi_reduction <add>, %162, %cst_76 [1] : vector<24x128xf32> to vector<24xf32>
    %168 = vector.shape_cast %167 : vector<24xf32> to vector<24x1xf32>
    %cst_77 = arith.constant 1.280000e+02 : f32
    %169 = vector.broadcast %cst_77 : f32 to vector<24x1xf32>
    %170 = arith.divf %168, %169 : vector<24x1xf32>
    %171 = vector.broadcast %170 : vector<24x1xf32> to vector<24x128xf32>
    %172 = arith.subf %162, %171 : vector<24x128xf32>
    %173 = arith.mulf %172, %172 : vector<24x128xf32>
    %cst_78 = arith.constant dense<0.000000e+00> : vector<24xf32>
    %174 = vector.multi_reduction <add>, %173, %cst_78 [1] : vector<24x128xf32> to vector<24xf32>
    %175 = vector.shape_cast %174 : vector<24xf32> to vector<24x1xf32>
    %cst_79 = arith.constant 1.280000e+02 : f32
    %176 = vector.broadcast %cst_79 : f32 to vector<24x1xf32>
    %177 = arith.divf %175, %176 : vector<24x1xf32>
    %cst_80 = arith.constant 9.99999974E-6 : f32
    %178 = vector.broadcast %cst_80 : f32 to vector<24x1xf32>
    %179 = arith.addf %177, %178 : vector<24x1xf32>
    %180 = math.rsqrt %179 : vector<24x1xf32>
    %181 = vector.broadcast %180 : vector<24x1xf32> to vector<24x128xf32>
    %182 = arith.mulf %172, %181 : vector<24x128xf32>
    %183 = vector.broadcast %164 : vector<1x128xf32> to vector<24x128xf32>
    %184 = arith.mulf %182, %183 : vector<24x128xf32>
    %185 = vector.broadcast %166 : vector<1x128xf32> to vector<24x128xf32>
    %186 = arith.addf %184, %185 : vector<24x128xf32>
    %c0_81 = arith.constant 0 : index
    %c0_82 = arith.constant 0 : index
    %c0_83 = arith.constant 0 : index
    %187 = vector.load %arg14[%c0_81, %c0_82, %c0_83] : memref<2x128x512xf32, #tpu.memory_space<vmem>>, vector<1x128x512xf32>
    %188 = vector.shape_cast %187 : vector<1x128x512xf32> to vector<128x512xf32>
    %cst_84 = arith.constant dense<0.000000e+00> : vector<24x512xf32>
    %189 = tpu.matmul %186, %188, %cst_84 {dimension_numbers = #tpu.dot_dimension_numbers<[1], [0], [0], [1], [0, 0, 1, 1], [], []>} : vector<24x128xf32>, vector<128x512xf32>, vector<24x512xf32> -> vector<24x512xf32>
    %c0_85 = arith.constant 0 : index
    %c0_86 = arith.constant 0 : index
    %c0_87 = arith.constant 0 : index
    %190 = vector.load %arg15[%c0_85, %c0_86, %c0_87] : memref<2x1x512xf32, #tpu.memory_space<vmem>>, vector<1x1x512xf32>
    %191 = vector.shape_cast %190 : vector<1x1x512xf32> to vector<1x512xf32>
    %192 = vector.broadcast %191 : vector<1x512xf32> to vector<24x512xf32>
    %193 = arith.addf %189, %192 : vector<24x512xf32>
    %cst_88 = arith.constant 1.702000e+00 : f32
    %194 = vector.broadcast %cst_88 : f32 to vector<24x512xf32>
    %195 = arith.mulf %194, %193 : vector<24x512xf32>
    %196 = arith.negf %195 : vector<24x512xf32>
    %197 = math.exp %196 : vector<24x512xf32>
    %cst_89 = arith.constant 1.000000e+00 : f32
    %198 = vector.broadcast %cst_89 : f32 to vector<24x512xf32>
    %199 = arith.addf %198, %197 : vector<24x512xf32>
    %200 = arith.divf %198, %199 : vector<24x512xf32>
    %201 = arith.mulf %193, %200 : vector<24x512xf32>
    %c0_90 = arith.constant 0 : index
    %c0_91 = arith.constant 0 : index
    %c0_92 = arith.constant 0 : index
    %202 = vector.load %arg16[%c0_90, %c0_91, %c0_92] : memref<2x512x128xf32, #tpu.memory_space<vmem>>, vector<1x512x128xf32>
    %203 = vector.shape_cast %202 : vector<1x512x128xf32> to vector<512x128xf32>
    %cst_93 = arith.constant dense<0.000000e+00> : vector<24x128xf32>
    %204 = tpu.matmul %201, %203, %cst_93 {dimension_numbers = #tpu.dot_dimension_numbers<[1], [0], [0], [1], [0, 0, 1, 1], [], []>} : vector<24x512xf32>, vector<512x128xf32>, vector<24x128xf32> -> vector<24x128xf32>
    %205 = arith.addf %162, %204 : vector<24x128xf32>
    %c0_94 = arith.constant 0 : index
    %c0_95 = arith.constant 0 : index
    %c0_96 = arith.constant 0 : index
    %206 = vector.load %arg17[%c0_94, %c0_95, %c0_96] : memref<2x1x128xf32, #tpu.memory_space<vmem>>, vector<1x1x128xf32>
    %207 = vector.shape_cast %206 : vector<1x1x128xf32> to vector<1x128xf32>
    %208 = vector.broadcast %207 : vector<1x128xf32> to vector<24x128xf32>
    %209 = arith.addf %205, %208 : vector<24x128xf32>
    %c1 = arith.constant 1 : index
    %c0_97 = arith.constant 0 : index
    %c0_98 = arith.constant 0 : index
    %210 = vector.load %arg6[%c1, %c0_97, %c0_98] : memref<2x1x128xf32, #tpu.memory_space<vmem>>, vector<1x1x128xf32>
    %211 = vector.shape_cast %210 : vector<1x1x128xf32> to vector<1x128xf32>
    %c1_99 = arith.constant 1 : index
    %c0_100 = arith.constant 0 : index
    %c0_101 = arith.constant 0 : index
    %212 = vector.load %arg7[%c1_99, %c0_100, %c0_101] : memref<2x1x128xf32, #tpu.memory_space<vmem>>, vector<1x1x128xf32>
    %213 = vector.shape_cast %212 : vector<1x1x128xf32> to vector<1x128xf32>
    %cst_102 = arith.constant dense<0.000000e+00> : vector<24xf32>
    %214 = vector.multi_reduction <add>, %209, %cst_102 [1] : vector<24x128xf32> to vector<24xf32>
    %215 = vector.shape_cast %214 : vector<24xf32> to vector<24x1xf32>
    %cst_103 = arith.constant 1.280000e+02 : f32
    %216 = vector.broadcast %cst_103 : f32 to vector<24x1xf32>
    %217 = arith.divf %215, %216 : vector<24x1xf32>
    %218 = vector.broadcast %217 : vector<24x1xf32> to vector<24x128xf32>
    %219 = arith.subf %209, %218 : vector<24x128xf32>
    %220 = arith.mulf %219, %219 : vector<24x128xf32>
    %cst_104 = arith.constant dense<0.000000e+00> : vector<24xf32>
    %221 = vector.multi_reduction <add>, %220, %cst_104 [1] : vector<24x128xf32> to vector<24xf32>
    %222 = vector.shape_cast %221 : vector<24xf32> to vector<24x1xf32>
    %cst_105 = arith.constant 1.280000e+02 : f32
    %223 = vector.broadcast %cst_105 : f32 to vector<24x1xf32>
    %224 = arith.divf %222, %223 : vector<24x1xf32>
    %cst_106 = arith.constant 9.99999974E-6 : f32
    %225 = vector.broadcast %cst_106 : f32 to vector<24x1xf32>
    %226 = arith.addf %224, %225 : vector<24x1xf32>
    %227 = math.rsqrt %226 : vector<24x1xf32>
    %228 = vector.broadcast %227 : vector<24x1xf32> to vector<24x128xf32>
    %229 = arith.mulf %219, %228 : vector<24x128xf32>
    %230 = vector.broadcast %211 : vector<1x128xf32> to vector<24x128xf32>
    %231 = arith.mulf %229, %230 : vector<24x128xf32>
    %232 = vector.broadcast %213 : vector<1x128xf32> to vector<24x128xf32>
    %233 = arith.addf %231, %232 : vector<24x128xf32>
    %c1_107 = arith.constant 1 : index
    %c0_108 = arith.constant 0 : index
    %c0_109 = arith.constant 0 : index
    %234 = vector.load %arg8[%c1_107, %c0_108, %c0_109] : memref<2x128x384xf32, #tpu.memory_space<vmem>>, vector<1x128x384xf32>
    %235 = vector.shape_cast %234 : vector<1x128x384xf32> to vector<128x384xf32>
    %c1_110 = arith.constant 1 : index
    %c0_111 = arith.constant 0 : index
    %c0_112 = arith.constant 0 : index
    %236 = vector.load %arg10[%c1_110, %c0_111, %c0_112] : memref<2x128x128xf32, #tpu.memory_space<vmem>>, vector<1x128x128xf32>
    %237 = vector.shape_cast %236 : vector<1x128x128xf32> to vector<128x128xf32>
    %cst_113 = arith.constant dense<0.000000e+00> : vector<24x384xf32>
    %238 = tpu.matmul %233, %235, %cst_113 {dimension_numbers = #tpu.dot_dimension_numbers<[1], [0], [0], [1], [0, 0, 1, 1], [], []>} : vector<24x128xf32>, vector<128x384xf32>, vector<24x384xf32> -> vector<24x384xf32>
    %c1_114 = arith.constant 1 : index
    %c0_115 = arith.constant 0 : index
    %c0_116 = arith.constant 0 : index
    %239 = vector.load %arg9[%c1_114, %c0_115, %c0_116] : memref<2x1x384xf32, #tpu.memory_space<vmem>>, vector<1x1x384xf32>
    %240 = vector.shape_cast %239 : vector<1x1x384xf32> to vector<1x384xf32>
    %241 = vector.broadcast %240 : vector<1x384xf32> to vector<24x384xf32>
    %242 = arith.addf %238, %241 : vector<24x384xf32>
    %cst_117 = arith.constant 0.000000e+00 : f32
    %243 = vector.broadcast %cst_117 : f32 to vector<24x128xf32>
    %244 = vector.extract_strided_slice %242 {offsets = [0, 0], sizes = [24, 32], strides = [1, 1]} : vector<24x384xf32> to vector<24x32xf32>
    %245 = vector.extract_strided_slice %242 {offsets = [0, 128], sizes = [24, 32], strides = [1, 1]} : vector<24x384xf32> to vector<24x32xf32>
    %246 = vector.extract_strided_slice %242 {offsets = [0, 256], sizes = [24, 32], strides = [1, 1]} : vector<24x384xf32> to vector<24x32xf32>
    %cst_118 = arith.constant dense<0.000000e+00> : vector<24x24xf32>
    %247 = tpu.matmul %244, %245, %cst_118 {dimension_numbers = #tpu.dot_dimension_numbers<[1], [1], [0], [0], [0, 0, 1, 0], [], []>} : vector<24x32xf32>, vector<24x32xf32>, vector<24x24xf32> -> vector<24x24xf32>
    %248 = vector.broadcast %39 : vector<1x24xf32> to vector<24x24xf32>
    %249 = arith.addf %247, %248 : vector<24x24xf32>
    %cst_119 = arith.constant dense<0xFF800000> : vector<24xf32>
    %250 = vector.multi_reduction <maximumf>, %249, %cst_119 [1] : vector<24x24xf32> to vector<24xf32>
    %cst_120 = arith.constant 0xFF800000 : f32
    %251 = vector.broadcast %cst_120 : f32 to vector<24xf32>
    %252 = arith.maximumf %251, %250 : vector<24xf32>
    %253 = vector.shape_cast %252 : vector<24xf32> to vector<24x1xf32>
    %254 = vector.broadcast %253 : vector<24x1xf32> to vector<24x24xf32>
    %255 = arith.subf %249, %254 : vector<24x24xf32>
    %256 = math.exp %255 : vector<24x24xf32>
    %cst_121 = arith.constant dense<0.000000e+00> : vector<24xf32>
    %257 = vector.multi_reduction <add>, %256, %cst_121 [1] : vector<24x24xf32> to vector<24xf32>
    %258 = vector.shape_cast %257 : vector<24xf32> to vector<24x1xf32>
    %259 = vector.broadcast %258 : vector<24x1xf32> to vector<24x24xf32>
    %260 = arith.divf %256, %259 : vector<24x24xf32>
    %cst_122 = arith.constant dense<0.000000e+00> : vector<24x32xf32>
    %261 = tpu.matmul %260, %246, %cst_122 {dimension_numbers = #tpu.dot_dimension_numbers<[1], [0], [0], [1], [0, 0, 1, 1], [], []>} : vector<24x24xf32>, vector<24x32xf32>, vector<24x32xf32> -> vector<24x32xf32>
    %262 = vector.extract_strided_slice %237 {offsets = [0, 0], sizes = [32, 128], strides = [1, 1]} : vector<128x128xf32> to vector<32x128xf32>
    %cst_123 = arith.constant dense<0.000000e+00> : vector<24x128xf32>
    %263 = tpu.matmul %261, %262, %cst_123 {dimension_numbers = #tpu.dot_dimension_numbers<[1], [0], [0], [1], [0, 0, 1, 1], [], []>} : vector<24x32xf32>, vector<32x128xf32>, vector<24x128xf32> -> vector<24x128xf32>
    %264 = arith.addf %243, %263 : vector<24x128xf32>
    %265 = vector.extract_strided_slice %242 {offsets = [0, 32], sizes = [24, 32], strides = [1, 1]} : vector<24x384xf32> to vector<24x32xf32>
    %266 = vector.extract_strided_slice %242 {offsets = [0, 160], sizes = [24, 32], strides = [1, 1]} : vector<24x384xf32> to vector<24x32xf32>
    %267 = vector.extract_strided_slice %242 {offsets = [0, 288], sizes = [24, 32], strides = [1, 1]} : vector<24x384xf32> to vector<24x32xf32>
    %cst_124 = arith.constant dense<0.000000e+00> : vector<24x24xf32>
    %268 = tpu.matmul %265, %266, %cst_124 {dimension_numbers = #tpu.dot_dimension_numbers<[1], [1], [0], [0], [0, 0, 1, 0], [], []>} : vector<24x32xf32>, vector<24x32xf32>, vector<24x24xf32> -> vector<24x24xf32>
    %269 = vector.broadcast %39 : vector<1x24xf32> to vector<24x24xf32>
    %270 = arith.addf %268, %269 : vector<24x24xf32>
    %cst_125 = arith.constant dense<0xFF800000> : vector<24xf32>
    %271 = vector.multi_reduction <maximumf>, %270, %cst_125 [1] : vector<24x24xf32> to vector<24xf32>
    %cst_126 = arith.constant 0xFF800000 : f32
    %272 = vector.broadcast %cst_126 : f32 to vector<24xf32>
    %273 = arith.maximumf %272, %271 : vector<24xf32>
    %274 = vector.shape_cast %273 : vector<24xf32> to vector<24x1xf32>
    %275 = vector.broadcast %274 : vector<24x1xf32> to vector<24x24xf32>
    %276 = arith.subf %270, %275 : vector<24x24xf32>
    %277 = math.exp %276 : vector<24x24xf32>
    %cst_127 = arith.constant dense<0.000000e+00> : vector<24xf32>
    %278 = vector.multi_reduction <add>, %277, %cst_127 [1] : vector<24x24xf32> to vector<24xf32>
    %279 = vector.shape_cast %278 : vector<24xf32> to vector<24x1xf32>
    %280 = vector.broadcast %279 : vector<24x1xf32> to vector<24x24xf32>
    %281 = arith.divf %277, %280 : vector<24x24xf32>
    %cst_128 = arith.constant dense<0.000000e+00> : vector<24x32xf32>
    %282 = tpu.matmul %281, %267, %cst_128 {dimension_numbers = #tpu.dot_dimension_numbers<[1], [0], [0], [1], [0, 0, 1, 1], [], []>} : vector<24x24xf32>, vector<24x32xf32>, vector<24x32xf32> -> vector<24x32xf32>
    %283 = vector.extract_strided_slice %237 {offsets = [32, 0], sizes = [32, 128], strides = [1, 1]} : vector<128x128xf32> to vector<32x128xf32>
    %cst_129 = arith.constant dense<0.000000e+00> : vector<24x128xf32>
    %284 = tpu.matmul %282, %283, %cst_129 {dimension_numbers = #tpu.dot_dimension_numbers<[1], [0], [0], [1], [0, 0, 1, 1], [], []>} : vector<24x32xf32>, vector<32x128xf32>, vector<24x128xf32> -> vector<24x128xf32>
    %285 = arith.addf %264, %284 : vector<24x128xf32>
    %286 = vector.extract_strided_slice %242 {offsets = [0, 64], sizes = [24, 32], strides = [1, 1]} : vector<24x384xf32> to vector<24x32xf32>
    %287 = vector.extract_strided_slice %242 {offsets = [0, 192], sizes = [24, 32], strides = [1, 1]} : vector<24x384xf32> to vector<24x32xf32>
    %288 = vector.extract_strided_slice %242 {offsets = [0, 320], sizes = [24, 32], strides = [1, 1]} : vector<24x384xf32> to vector<24x32xf32>
    %cst_130 = arith.constant dense<0.000000e+00> : vector<24x24xf32>
    %289 = tpu.matmul %286, %287, %cst_130 {dimension_numbers = #tpu.dot_dimension_numbers<[1], [1], [0], [0], [0, 0, 1, 0], [], []>} : vector<24x32xf32>, vector<24x32xf32>, vector<24x24xf32> -> vector<24x24xf32>
    %290 = vector.broadcast %39 : vector<1x24xf32> to vector<24x24xf32>
    %291 = arith.addf %289, %290 : vector<24x24xf32>
    %cst_131 = arith.constant dense<0xFF800000> : vector<24xf32>
    %292 = vector.multi_reduction <maximumf>, %291, %cst_131 [1] : vector<24x24xf32> to vector<24xf32>
    %cst_132 = arith.constant 0xFF800000 : f32
    %293 = vector.broadcast %cst_132 : f32 to vector<24xf32>
    %294 = arith.maximumf %293, %292 : vector<24xf32>
    %295 = vector.shape_cast %294 : vector<24xf32> to vector<24x1xf32>
    %296 = vector.broadcast %295 : vector<24x1xf32> to vector<24x24xf32>
    %297 = arith.subf %291, %296 : vector<24x24xf32>
    %298 = math.exp %297 : vector<24x24xf32>
    %cst_133 = arith.constant dense<0.000000e+00> : vector<24xf32>
    %299 = vector.multi_reduction <add>, %298, %cst_133 [1] : vector<24x24xf32> to vector<24xf32>
    %300 = vector.shape_cast %299 : vector<24xf32> to vector<24x1xf32>
    %301 = vector.broadcast %300 : vector<24x1xf32> to vector<24x24xf32>
    %302 = arith.divf %298, %301 : vector<24x24xf32>
    %cst_134 = arith.constant dense<0.000000e+00> : vector<24x32xf32>
    %303 = tpu.matmul %302, %288, %cst_134 {dimension_numbers = #tpu.dot_dimension_numbers<[1], [0], [0], [1], [0, 0, 1, 1], [], []>} : vector<24x24xf32>, vector<24x32xf32>, vector<24x32xf32> -> vector<24x32xf32>
    %304 = vector.extract_strided_slice %237 {offsets = [64, 0], sizes = [32, 128], strides = [1, 1]} : vector<128x128xf32> to vector<32x128xf32>
    %cst_135 = arith.constant dense<0.000000e+00> : vector<24x128xf32>
    %305 = tpu.matmul %303, %304, %cst_135 {dimension_numbers = #tpu.dot_dimension_numbers<[1], [0], [0], [1], [0, 0, 1, 1], [], []>} : vector<24x32xf32>, vector<32x128xf32>, vector<24x128xf32> -> vector<24x128xf32>
    %306 = arith.addf %285, %305 : vector<24x128xf32>
    %307 = vector.extract_strided_slice %242 {offsets = [0, 96], sizes = [24, 32], strides = [1, 1]} : vector<24x384xf32> to vector<24x32xf32>
    %308 = vector.extract_strided_slice %242 {offsets = [0, 224], sizes = [24, 32], strides = [1, 1]} : vector<24x384xf32> to vector<24x32xf32>
    %309 = vector.extract_strided_slice %242 {offsets = [0, 352], sizes = [24, 32], strides = [1, 1]} : vector<24x384xf32> to vector<24x32xf32>
    %cst_136 = arith.constant dense<0.000000e+00> : vector<24x24xf32>
    %310 = tpu.matmul %307, %308, %cst_136 {dimension_numbers = #tpu.dot_dimension_numbers<[1], [1], [0], [0], [0, 0, 1, 0], [], []>} : vector<24x32xf32>, vector<24x32xf32>, vector<24x24xf32> -> vector<24x24xf32>
    %311 = vector.broadcast %39 : vector<1x24xf32> to vector<24x24xf32>
    %312 = arith.addf %310, %311 : vector<24x24xf32>
    %cst_137 = arith.constant dense<0xFF800000> : vector<24xf32>
    %313 = vector.multi_reduction <maximumf>, %312, %cst_137 [1] : vector<24x24xf32> to vector<24xf32>
    %cst_138 = arith.constant 0xFF800000 : f32
    %314 = vector.broadcast %cst_138 : f32 to vector<24xf32>
    %315 = arith.maximumf %314, %313 : vector<24xf32>
    %316 = vector.shape_cast %315 : vector<24xf32> to vector<24x1xf32>
    %317 = vector.broadcast %316 : vector<24x1xf32> to vector<24x24xf32>
    %318 = arith.subf %312, %317 : vector<24x24xf32>
    %319 = math.exp %318 : vector<24x24xf32>
    %cst_139 = arith.constant dense<0.000000e+00> : vector<24xf32>
    %320 = vector.multi_reduction <add>, %319, %cst_139 [1] : vector<24x24xf32> to vector<24xf32>
    %321 = vector.shape_cast %320 : vector<24xf32> to vector<24x1xf32>
    %322 = vector.broadcast %321 : vector<24x1xf32> to vector<24x24xf32>
    %323 = arith.divf %319, %322 : vector<24x24xf32>
    %cst_140 = arith.constant dense<0.000000e+00> : vector<24x32xf32>
    %324 = tpu.matmul %323, %309, %cst_140 {dimension_numbers = #tpu.dot_dimension_numbers<[1], [0], [0], [1], [0, 0, 1, 1], [], []>} : vector<24x24xf32>, vector<24x32xf32>, vector<24x32xf32> -> vector<24x32xf32>
    %325 = vector.extract_strided_slice %237 {offsets = [96, 0], sizes = [32, 128], strides = [1, 1]} : vector<128x128xf32> to vector<32x128xf32>
    %cst_141 = arith.constant dense<0.000000e+00> : vector<24x128xf32>
    %326 = tpu.matmul %324, %325, %cst_141 {dimension_numbers = #tpu.dot_dimension_numbers<[1], [0], [0], [1], [0, 0, 1, 1], [], []>} : vector<24x32xf32>, vector<32x128xf32>, vector<24x128xf32> -> vector<24x128xf32>
    %327 = arith.addf %306, %326 : vector<24x128xf32>
    %328 = arith.addf %209, %327 : vector<24x128xf32>
    %c1_142 = arith.constant 1 : index
    %c0_143 = arith.constant 0 : index
    %c0_144 = arith.constant 0 : index
    %329 = vector.load %arg11[%c1_142, %c0_143, %c0_144] : memref<2x1x128xf32, #tpu.memory_space<vmem>>, vector<1x1x128xf32>
    %330 = vector.shape_cast %329 : vector<1x1x128xf32> to vector<1x128xf32>
    %331 = vector.broadcast %330 : vector<1x128xf32> to vector<24x128xf32>
    %332 = arith.addf %328, %331 : vector<24x128xf32>
    %c1_145 = arith.constant 1 : index
    %c0_146 = arith.constant 0 : index
    %c0_147 = arith.constant 0 : index
    %333 = vector.load %arg12[%c1_145, %c0_146, %c0_147] : memref<2x1x128xf32, #tpu.memory_space<vmem>>, vector<1x1x128xf32>
    %334 = vector.shape_cast %333 : vector<1x1x128xf32> to vector<1x128xf32>
    %c1_148 = arith.constant 1 : index
    %c0_149 = arith.constant 0 : index
    %c0_150 = arith.constant 0 : index
    %335 = vector.load %arg13[%c1_148, %c0_149, %c0_150] : memref<2x1x128xf32, #tpu.memory_space<vmem>>, vector<1x1x128xf32>
    %336 = vector.shape_cast %335 : vector<1x1x128xf32> to vector<1x128xf32>
    %cst_151 = arith.constant dense<0.000000e+00> : vector<24xf32>
    %337 = vector.multi_reduction <add>, %332, %cst_151 [1] : vector<24x128xf32> to vector<24xf32>
    %338 = vector.shape_cast %337 : vector<24xf32> to vector<24x1xf32>
    %cst_152 = arith.constant 1.280000e+02 : f32
    %339 = vector.broadcast %cst_152 : f32 to vector<24x1xf32>
    %340 = arith.divf %338, %339 : vector<24x1xf32>
    %341 = vector.broadcast %340 : vector<24x1xf32> to vector<24x128xf32>
    %342 = arith.subf %332, %341 : vector<24x128xf32>
    %343 = arith.mulf %342, %342 : vector<24x128xf32>
    %cst_153 = arith.constant dense<0.000000e+00> : vector<24xf32>
    %344 = vector.multi_reduction <add>, %343, %cst_153 [1] : vector<24x128xf32> to vector<24xf32>
    %345 = vector.shape_cast %344 : vector<24xf32> to vector<24x1xf32>
    %cst_154 = arith.constant 1.280000e+02 : f32
    %346 = vector.broadcast %cst_154 : f32 to vector<24x1xf32>
    %347 = arith.divf %345, %346 : vector<24x1xf32>
    %cst_155 = arith.constant 9.99999974E-6 : f32
    %348 = vector.broadcast %cst_155 : f32 to vector<24x1xf32>
    %349 = arith.addf %347, %348 : vector<24x1xf32>
    %350 = math.rsqrt %349 : vector<24x1xf32>
    %351 = vector.broadcast %350 : vector<24x1xf32> to vector<24x128xf32>
    %352 = arith.mulf %342, %351 : vector<24x128xf32>
    %353 = vector.broadcast %334 : vector<1x128xf32> to vector<24x128xf32>
    %354 = arith.mulf %352, %353 : vector<24x128xf32>
    %355 = vector.broadcast %336 : vector<1x128xf32> to vector<24x128xf32>
    %356 = arith.addf %354, %355 : vector<24x128xf32>
    %c1_156 = arith.constant 1 : index
    %c0_157 = arith.constant 0 : index
    %c0_158 = arith.constant 0 : index
    %357 = vector.load %arg14[%c1_156, %c0_157, %c0_158] : memref<2x128x512xf32, #tpu.memory_space<vmem>>, vector<1x128x512xf32>
    %358 = vector.shape_cast %357 : vector<1x128x512xf32> to vector<128x512xf32>
    %cst_159 = arith.constant dense<0.000000e+00> : vector<24x512xf32>
    %359 = tpu.matmul %356, %358, %cst_159 {dimension_numbers = #tpu.dot_dimension_numbers<[1], [0], [0], [1], [0, 0, 1, 1], [], []>} : vector<24x128xf32>, vector<128x512xf32>, vector<24x512xf32> -> vector<24x512xf32>
    %c1_160 = arith.constant 1 : index
    %c0_161 = arith.constant 0 : index
    %c0_162 = arith.constant 0 : index
    %360 = vector.load %arg15[%c1_160, %c0_161, %c0_162] : memref<2x1x512xf32, #tpu.memory_space<vmem>>, vector<1x1x512xf32>
    %361 = vector.shape_cast %360 : vector<1x1x512xf32> to vector<1x512xf32>
    %362 = vector.broadcast %361 : vector<1x512xf32> to vector<24x512xf32>
    %363 = arith.addf %359, %362 : vector<24x512xf32>
    %cst_163 = arith.constant 1.702000e+00 : f32
    %364 = vector.broadcast %cst_163 : f32 to vector<24x512xf32>
    %365 = arith.mulf %364, %363 : vector<24x512xf32>
    %366 = arith.negf %365 : vector<24x512xf32>
    %367 = math.exp %366 : vector<24x512xf32>
    %cst_164 = arith.constant 1.000000e+00 : f32
    %368 = vector.broadcast %cst_164 : f32 to vector<24x512xf32>
    %369 = arith.addf %368, %367 : vector<24x512xf32>
    %370 = arith.divf %368, %369 : vector<24x512xf32>
    %371 = arith.mulf %363, %370 : vector<24x512xf32>
    %c1_165 = arith.constant 1 : index
    %c0_166 = arith.constant 0 : index
    %c0_167 = arith.constant 0 : index
    %372 = vector.load %arg16[%c1_165, %c0_166, %c0_167] : memref<2x512x128xf32, #tpu.memory_space<vmem>>, vector<1x512x128xf32>
    %373 = vector.shape_cast %372 : vector<1x512x128xf32> to vector<512x128xf32>
    %cst_168 = arith.constant dense<0.000000e+00> : vector<24x128xf32>
    %374 = tpu.matmul %371, %373, %cst_168 {dimension_numbers = #tpu.dot_dimension_numbers<[1], [0], [0], [1], [0, 0, 1, 1], [], []>} : vector<24x512xf32>, vector<512x128xf32>, vector<24x128xf32> -> vector<24x128xf32>
    %375 = arith.addf %332, %374 : vector<24x128xf32>
    %c1_169 = arith.constant 1 : index
    %c0_170 = arith.constant 0 : index
    %c0_171 = arith.constant 0 : index
    %376 = vector.load %arg17[%c1_169, %c0_170, %c0_171] : memref<2x1x128xf32, #tpu.memory_space<vmem>>, vector<1x1x128xf32>
    %377 = vector.shape_cast %376 : vector<1x1x128xf32> to vector<1x128xf32>
    %378 = vector.broadcast %377 : vector<1x128xf32> to vector<24x128xf32>
    %379 = arith.addf %375, %378 : vector<24x128xf32>
    %c0_172 = arith.constant 0 : index
    %c0_173 = arith.constant 0 : index
    %c0_174 = arith.constant 0 : index
    %380 = vector.load %arg20[%c0_172, %c0_173, %c0_174] : memref<1x24x128xf32, #tpu.memory_space<vmem>>, vector<1x24x128xf32>
    %381 = vector.shape_cast %380 : vector<1x24x128xf32> to vector<24x128xf32>
    %382 = vector.shape_cast %379 : vector<24x128xf32> to vector<1x24x128xf32>
    tpu.vector_store %arg20[%c0_172, %c0_173, %c0_174], %382 {strides = array<i32>} : memref<1x24x128xf32, #tpu.memory_space<vmem>>, vector<1x24x128xf32>,
    %383 = vector.extract_strided_slice %379 {offsets = [0, 0], sizes = [1, 128], strides = [1, 1]} : vector<24x128xf32> to vector<1x128xf32>
    %c0_175 = arith.constant 0 : index
    %c0_176 = arith.constant 0 : index
    %384 = vector.load %arg18[%c0_175, %c0_176] : memref<1x128xf32, #tpu.memory_space<vmem>>, vector<1x128xf32>
    %c0_177 = arith.constant 0 : index
    %c0_178 = arith.constant 0 : index
    %385 = vector.load %arg19[%c0_177, %c0_178] : memref<1x128xf32, #tpu.memory_space<vmem>>, vector<1x128xf32>
    %cst_179 = arith.constant dense<0.000000e+00> : vector<1xf32>
    %386 = vector.multi_reduction <add>, %383, %cst_179 [1] : vector<1x128xf32> to vector<1xf32>
    %387 = vector.shape_cast %386 : vector<1xf32> to vector<1x1xf32>
    %cst_180 = arith.constant 1.280000e+02 : f32
    %388 = vector.broadcast %cst_180 : f32 to vector<1x1xf32>
    %389 = arith.divf %387, %388 : vector<1x1xf32>
    %390 = vector.broadcast %389 : vector<1x1xf32> to vector<1x128xf32>
    %391 = arith.subf %383, %390 : vector<1x128xf32>
    %392 = arith.mulf %391, %391 : vector<1x128xf32>
    %cst_181 = arith.constant dense<0.000000e+00> : vector<1xf32>
    %393 = vector.multi_reduction <add>, %392, %cst_181 [1] : vector<1x128xf32> to vector<1xf32>
    %394 = vector.shape_cast %393 : vector<1xf32> to vector<1x1xf32>
    %cst_182 = arith.constant 1.280000e+02 : f32
    %395 = vector.broadcast %cst_182 : f32 to vector<1x1xf32>
    %396 = arith.divf %394, %395 : vector<1x1xf32>
    %cst_183 = arith.constant 9.99999974E-6 : f32
    %397 = vector.broadcast %cst_183 : f32 to vector<1x1xf32>
    %398 = arith.addf %396, %397 : vector<1x1xf32>
    %399 = math.rsqrt %398 : vector<1x1xf32>
    %400 = vector.broadcast %399 : vector<1x1xf32> to vector<1x128xf32>
    %401 = arith.mulf %391, %400 : vector<1x128xf32>
    %402 = arith.mulf %401, %384 : vector<1x128xf32>
    %403 = arith.addf %402, %385 : vector<1x128xf32>
    %c0_184 = arith.constant 0 : index
    %c0_185 = arith.constant 0 : index
    %c0_186 = arith.constant 0 : index
    %404 = vector.load %arg21[%c0_184, %c0_185, %c0_186] : memref<1x1x128xf32, #tpu.memory_space<vmem>>, vector<1x1x128xf32>
    %405 = vector.shape_cast %404 : vector<1x1x128xf32> to vector<1x128xf32>
    %406 = vector.shape_cast %403 : vector<1x128xf32> to vector<1x1x128xf32>
    tpu.vector_store %arg21[%c0_184, %c0_185, %c0_186], %406 {strides = array<i32>} : memref<1x1x128xf32, #tpu.memory_space<vmem>>, vector<1x1x128xf32>,
    return
  }
  func.func @transform_0(%arg0: i32) -> (i32, i32, i32) {
    %c0_i32 = arith.constant 0 : i32
    %c0_i32_0 = arith.constant 0 : i32
    %c0_i32_1 = arith.constant 0 : i32
    return %arg0, %c0_i32, %c0_i32_0 : i32, i32, i32
  }
  func.func @transform_1(%arg0: i32) -> (i32, i32) {
    %c0_i32 = arith.constant 0 : i32
    %c0_i32_0 = arith.constant 0 : i32
    %c0_i32_1 = arith.constant 0 : i32
    return %c0_i32, %c0_i32_0 : i32, i32
  }
  func.func @transform_2(%arg0: i32) -> (i32, i32, i32) {
    %c0_i32 = arith.constant 0 : i32
    %c0_i32_0 = arith.constant 0 : i32
    %c0_i32_1 = arith.constant 0 : i32
    return %arg0, %c0_i32, %c0_i32_0 : i32, i32, i32
  }
  func.func @transform_3(%arg0: i32) -> (i32, i32) {
    %c0_i32 = arith.constant 0 : i32
    %c0_i32_0 = arith.constant 0 : i32
    %c0_i32_1 = arith.constant 0 : i32
    return %c0_i32, %c0_i32_0 : i32, i32
  }
  func.func @transform_4(%arg0: i32) -> (i32, i32) {
    %c0_i32 = arith.constant 0 : i32
    %c0_i32_0 = arith.constant 0 : i32
    %c0_i32_1 = arith.constant 0 : i32
    return %c0_i32, %c0_i32_0 : i32, i32
  }
  func.func @transform_5(%arg0: i32) -> (i32, i32, i32) {
    %c0_i32 = arith.constant 0 : i32
    %c0_i32_0 = arith.constant 0 : i32
    %c0_i32_1 = arith.constant 0 : i32
    %c0_i32_2 = arith.constant 0 : i32
    return %c0_i32, %c0_i32_0, %c0_i32_1 : i32, i32, i32
  }
  func.func @transform_6(%arg0: i32) -> (i32, i32, i32) {
    %c0_i32 = arith.constant 0 : i32
    %c0_i32_0 = arith.constant 0 : i32
    %c0_i32_1 = arith.constant 0 : i32
    %c0_i32_2 = arith.constant 0 : i32
    return %c0_i32, %c0_i32_0, %c0_i32_1 : i32, i32, i32
  }
  func.func @transform_7(%arg0: i32) -> (i32, i32, i32) {
    %c0_i32 = arith.constant 0 : i32
    %c0_i32_0 = arith.constant 0 : i32
    %c0_i32_1 = arith.constant 0 : i32
    %c0_i32_2 = arith.constant 0 : i32
    return %c0_i32, %c0_i32_0, %c0_i32_1 : i32, i32, i32
  }
  func.func @transform_8(%arg0: i32) -> (i32, i32, i32) {
    %c0_i32 = arith.constant 0 : i32
    %c0_i32_0 = arith.constant 0 : i32
    %c0_i32_1 = arith.constant 0 : i32
    %c0_i32_2 = arith.constant 0 : i32
    return %c0_i32, %c0_i32_0, %c0_i32_1 : i32, i32, i32
  }
  func.func @transform_9(%arg0: i32) -> (i32, i32, i32) {
    %c0_i32 = arith.constant 0 : i32
    %c0_i32_0 = arith.constant 0 : i32
    %c0_i32_1 = arith.constant 0 : i32
    %c0_i32_2 = arith.constant 0 : i32
    return %c0_i32, %c0_i32_0, %c0_i32_1 : i32, i32, i32
  }
  func.func @transform_10(%arg0: i32) -> (i32, i32, i32) {
    %c0_i32 = arith.constant 0 : i32
    %c0_i32_0 = arith.constant 0 : i32
    %c0_i32_1 = arith.constant 0 : i32
    %c0_i32_2 = arith.constant 0 : i32
    return %c0_i32, %c0_i32_0, %c0_i32_1 : i32, i32, i32
  }
  func.func @transform_11(%arg0: i32) -> (i32, i32, i32) {
    %c0_i32 = arith.constant 0 : i32
    %c0_i32_0 = arith.constant 0 : i32
    %c0_i32_1 = arith.constant 0 : i32
    %c0_i32_2 = arith.constant 0 : i32
    return %c0_i32, %c0_i32_0, %c0_i32_1 : i32, i32, i32
  }
  func.func @transform_12(%arg0: i32) -> (i32, i32, i32) {
    %c0_i32 = arith.constant 0 : i32
    %c0_i32_0 = arith.constant 0 : i32
    %c0_i32_1 = arith.constant 0 : i32
    %c0_i32_2 = arith.constant 0 : i32
    return %c0_i32, %c0_i32_0, %c0_i32_1 : i32, i32, i32
  }
  func.func @transform_13(%arg0: i32) -> (i32, i32, i32) {
    %c0_i32 = arith.constant 0 : i32
    %c0_i32_0 = arith.constant 0 : i32
    %c0_i32_1 = arith.constant 0 : i32
    %c0_i32_2 = arith.constant 0 : i32
    return %c0_i32, %c0_i32_0, %c0_i32_1 : i32, i32, i32
  }
  func.func @transform_14(%arg0: i32) -> (i32, i32, i32) {
    %c0_i32 = arith.constant 0 : i32
    %c0_i32_0 = arith.constant 0 : i32
    %c0_i32_1 = arith.constant 0 : i32
    %c0_i32_2 = arith.constant 0 : i32
    return %c0_i32, %c0_i32_0, %c0_i32_1 : i32, i32, i32
  }
  func.func @transform_15(%arg0: i32) -> (i32, i32, i32) {
    %c0_i32 = arith.constant 0 : i32
    %c0_i32_0 = arith.constant 0 : i32
    %c0_i32_1 = arith.constant 0 : i32
    %c0_i32_2 = arith.constant 0 : i32
    return %c0_i32, %c0_i32_0, %c0_i32_1 : i32, i32, i32
  }
  func.func @transform_16(%arg0: i32) -> (i32, i32, i32) {
    %c0_i32 = arith.constant 0 : i32
    %c0_i32_0 = arith.constant 0 : i32
    %c0_i32_1 = arith.constant 0 : i32
    %c0_i32_2 = arith.constant 0 : i32
    return %c0_i32, %c0_i32_0, %c0_i32_1 : i32, i32, i32
  }
  func.func @transform_17(%arg0: i32) -> (i32, i32) {
    %c0_i32 = arith.constant 0 : i32
    %c0_i32_0 = arith.constant 0 : i32
    %c0_i32_1 = arith.constant 0 : i32
    return %c0_i32, %c0_i32_0 : i32, i32
  }
  func.func @transform_18(%arg0: i32) -> (i32, i32) {
    %c0_i32 = arith.constant 0 : i32
    %c0_i32_0 = arith.constant 0 : i32
    %c0_i32_1 = arith.constant 0 : i32
    return %c0_i32, %c0_i32_0 : i32, i32
  }
  func.func @transform_19(%arg0: i32) -> (i32, i32, i32) {
    %c0_i32 = arith.constant 0 : i32
    %c0_i32_0 = arith.constant 0 : i32
    %c0_i32_1 = arith.constant 0 : i32
    return %arg0, %c0_i32, %c0_i32_0 : i32, i32, i32
  }
  func.func @transform_20(%arg0: i32) -> (i32, i32, i32) {
    %c0_i32 = arith.constant 0 : i32
    %c0_i32_0 = arith.constant 0 : i32
    %c0_i32_1 = arith.constant 0 : i32
    return %arg0, %c0_i32, %c0_i32_0 : i32, i32, i32
  }
}

</mosaic_0001>

<bundles_post_ra>
// kernel: tpu_custom_call.1
= control target key start
LH: loop header
LB: loop body
LE: loop exit
PB: predicated region body
PF: predicated region fallthrough
CT: control target
= control target key end

     0   :  { %s7414_s0 = inlined_call_operand.hbm [shape: f32[2,24,192], index: 0, kind: input, shape index: {}]   ;;  %s7415_s1 = inlined_call_operand.hbm [shape: f32[192,128], index: 1, kind: input, shape index: {}]   ;;  %s7416_s2 = inlined_call_operand.hbm [shape: f32[2,24,128], index: 2, kind: input, shape index: {}]   ;;  %s7417_s3 = inlined_call_operand.hbm [shape: f32[1,128], index: 3, kind: input, shape index: {}]   ;;  %s7418_s4 = inlined_call_operand.hbm [shape: f32[1,128], index: 4, kind: input, shape index: {}]   ;;  %s7419_s5 = inlined_call_operand.vmem [shape: f32[2,1,128], index: 5, kind: input, shape index: {}]   ;;  %s7420_s6 = inlined_call_operand.vmem [shape: f32[2,1,128], index: 6, kind: input, shape index: {}]   ;;  %s7421_s7 = inlined_call_operand.hbm [shape: f32[2,128,384], index: 7, kind: input, shape index: {}]   ;;  %s7422_s8 = inlined_call_operand.hbm [shape: f32[2,1,384], index: 8, kind: input, shape index: {}]   ;;  %s7423_s9 = inlined_call_operand.hbm [shape: f32[2,128,128], index: 9, kind: input, shape index: {}]   ;;  %s7424_s10 = inlined_call_operand.hbm [shape: f32[2,1,128], index: 10, kind: input, shape index: {}]   ;;  %s7425_s11 = inlined_call_operand.hbm [shape: f32[2,1,128], index: 11, kind: input, shape index: {}]   ;;  %s7426_s12 = inlined_call_operand.hbm [shape: f32[2,1,128], index: 12, kind: input, shape index: {}]   ;;  %s7427_s13 = inlined_call_operand.hbm [shape: f32[2,128,512], index: 13, kind: input, shape index: {}]   ;;  %s7428_s14 = inlined_call_operand.vmem [shape: f32[2,1,512], index: 14, kind: input, shape index: {}]   ;;  %s7429_s15 = inlined_call_operand.hbm [shape: f32[2,512,128], index: 15, kind: input, shape index: {}]   ;;  %s7430_s16 = inlined_call_operand.vmem [shape: f32[2,1,128], index: 16, kind: input, shape index: {}]   ;;  %s7431_s17 = inlined_call_operand.vmem [shape: f32[1,128], index: 17, kind: input, shape index: {}]   ;;  %s7432_s18 = inlined_call_operand.vmem [shape: f32[1,128], index: 18, kind: input, shape index: {}]   ;;  %s7433_s19 = inlined_call_operand.hbm [shape: f32[2,24,128], index: 19, kind: output, shape index: {0}]   ;;  %s7434_s20 = inlined_call_operand.hbm [shape: f32[2,1,128], index: 20, kind: output, shape index: {1}]  }
   0x1   :  { %7458 = sst [smem:[#allocation43_spill]] %s7414_s0 }
   0x2   :  { %7459 = sst [smem:[#allocation44_spill]] %s7415_s1 }
   0x3   :  { %7460 = sst [smem:[#allocation45_spill]] %s7416_s2 }
   0x4   :  { %7461 = sst [smem:[#allocation46_spill]] %s7417_s3 }
   0x5   :  { %7462 = sst [smem:[#allocation47_spill]] %s7418_s4 }
   0x6   :  { %7463 = sst [smem:[#allocation48_spill]] %s7421_s7 }
   0x7   :  { %7464 = sst [smem:[#allocation49_spill]] %s7422_s8 }
   0x8   :  { %7465 = sst [smem:[#allocation50_spill]] %s7423_s9 }
   0x9   :  { %7466 = sst [smem:[#allocation51_spill]] %s7424_s10 }
   0xa   :  { %7467 = sst [smem:[#allocation52_spill]] %s7425_s11 }
   0xb   :  { %7468 = sst [smem:[#allocation53_spill]] %s7426_s12 }
   0xc   :  { %7469 = sst [smem:[#allocation54_spill]] %s7427_s13 }
   0xd   :  { %7470 = sst [smem:[#allocation55_spill]] %s7428_s14 }
   0xe   :  { %7471 = sst [smem:[#allocation56_spill]] %s7430_s16 }
   0xf   :  { %7472 = sst [smem:[#allocation57_spill]] %s7431_s17 }
  0x10   :  { %7473 = sst [smem:[#allocation58_spill]] %s7432_s18 }
  0x11   :  { %7474 = sst [smem:[#allocation59_spill]] %s7433_s19 }
  0x12   :  { %7475 = sst [smem:[#allocation60_spill]] %s7434_s20 }
  0x13   :  { %26 = vsyncpa [#allocation3], 0 }
  0x14   :  { %28 = vsyncpa [#allocation3 + $0x1], 0 }
  0x15   :  { %29 = vsyncpa [#allocation6], 0 }
  0x16   :  { %30 = vsyncpa [#allocation10], 0 }
  0x17   :  { %31 = vsyncpa [#allocation13], 0 }
  0x18   :  { %32 = vsyncpa [#allocation16], 0 }
  0x19   :  { %33 = vsyncpa [#allocation19], 0 }
  0x1a   :  { %34 = vsyncpa [#allocation22], 0 }
  0x1b   :  { %35 = vsyncpa [#allocation4], 0 }
  0x1c   :  { %37 = vsyncpa [#allocation4 + $0x1], 0 }
  0x1d   :  { %38 = vsyncpa [#allocation25], 0 }
  0x1e   :  { %40 = vsyncpa [#allocation25 + $0x1], 0  ;;  %s6093_s1 = smov 0   ;;  %s6095_s22 = smov 0  }
  0x1f   :  { %s6097_s23 = smov 0   ;;  %s6099_s24 = smov 0  }
  0x20 LB: > { %7476 = sst [smem:[#allocation37_spill]] %s5944_s1  ;;  %s6117_s27 = sadd.s32 4294967295, %s5956_s24   ;;  %s5956_s24 = sphi %s6099_s24, %s7543_s24   ;;  %s5952_s23 = sphi %s6097_s23, %s7545_s23   ;;  %s5948_s22 = sphi %s6095_s22, %s7547_s22   ;;  %s5944_s1 = sphi %s6093_s1, %s7546_s1  }
  0x21   : > { %7477 = sst [smem:[#allocation38_spill]] %s5952_s23  ;;  %p4813_p0 = scmp.ge.s32.totalorder %s5956_s24, 1 }
  0x22   : > { %s7478_s3 = sld [smem:[#allocation44_spill]]  ;;  %p7451_p1 = scmp.eq.s32.totalorder %s6117_s27, 0 }
  0x23   : > { %p512_p2 = scmp.lt.s32.totalorder %s5956_s24, 3  ;;  %s5958_s4 = smov [#allocation5]  }
  0x24   : > { %s525_s29 = sshll.u32 %s5958_s4, 4  ;;  %s7480_s21 = sld [smem:[#allocation47_spill]]  ;;  %s526_s29 = int_to_ptr.vmem [resolvable:$true] %s525_s29 }
  0x25   : > { %p6122_p3 = pnand %p4813_p0, %p512_p2  ;;  %s7482_s8 = sld [smem:[#allocation49_spill]] }
  0x26   : > { %s5959_s17 = smov [#allocation9]   ;;  %s7441_s19 = smov 128  }
  0x27   : > { %p5032_p4 = pneg %p6122_p3  ;;  %s552_s20 = sshll.u32 %s5959_s17, 4  ;;  %s553_s20 = int_to_ptr.vmem [resolvable:$true] %s552_s20 }
  0x28   : > { %s523_s26 = sshll.u32 %s7478_s3, 4  ;;  %s7443_s16 = smov 8   ;;  %s524_s26 = int_to_ptr.hbm [resolvable:$true] %s523_s26 }
  0x29   : > { %p6134_p6 = pnand %p5032_p4, %p7451_p1  ;;  %s5962_s30 = smov [#allocation12]  }
  0x2a   : > { %s550_s2 = sshll.u32 %s7480_s21, 4  ;;  %s583_s0 = sshll.u32 %s5962_s30, 4  ;;  %s551_s2 = int_to_ptr.hbm [resolvable:$true] %s550_s2  ;;  %s584_s0 = int_to_ptr.vmem [resolvable:$true] %s583_s0 }
  0x2b   : > { %s581_s4 = sshll.u32 %s7482_s8, 4  ;;  %s7483_s10 = sld [smem:[#allocation51_spill]]  ;;  %s582_s4 = int_to_ptr.hbm [resolvable:$true] %s581_s4 }
  0x2c   : > { %5035 = dma.hbm_to_vmem [thread:$0]  (!%p6134_p6), %s524_s26, 3072, %s526_s29, [#allocation6], %s7441_s19, %s7441_s19, %s7443_s16  }
  0x2d   : > { %5041 = dma.hbm_to_vmem [thread:$0]  (!%p6134_p6), %s551_s2, 16, %s553_s20, [#allocation10]  }
  0x2e   : > { %s5963_s17 = smov 48   ;;  %s5964_s8 = smov 3  }
  0x2f   : > { %5047 = dma.hbm_to_vmem [thread:$0]  (!%p6134_p6), %s582_s4, 96, %s584_s0, [#allocation13], %s5963_s17, %s5963_s17, %s5964_s8  }
  0x30   : > { %s5965_s26 = smov [#allocation15]   ;;  %s7445_s29 = smov 16  }
  0x31   : > { %s609_s3 = sshll.u32 %s7483_s10, 4  ;;  %s611_s20 = sshll.u32 %s5965_s26, 4  ;;  %s610_s3 = int_to_ptr.hbm [resolvable:$true] %s609_s3  ;;  %s612_s20 = int_to_ptr.vmem [resolvable:$true] %s611_s20 }
  0x32   : > { %s7440_s2 = smov 1   ;;  %s7484_s12 = sld [smem:[#allocation53_spill]] }
  0x33   : > { %5053 = dma.hbm_to_vmem [thread:$0]  (!%p6134_p6), %s610_s3, 32, %s612_s20, [#allocation16], %s7445_s29, %s7445_s29, %s7440_s2  }
  0x34   : > { %s5968_s0 = smov [#allocation18]   ;;  %s4812_s21 = sadd.s32 4294967294, %s5956_s24  }
  0x35   : > { %s639_s18 = sshll.u32 %s5968_s0, 4  ;;  %s6168_s17 = sadd.s32 1, %s5956_s24   ;;  %s640_s18 = int_to_ptr.vmem [resolvable:$true] %s639_s18 }
  0x36   : > { %7485 = sst [smem:[#allocation39_spill]] %s6168_s17  ;;  %s53_s3 = sadd.s32 1, %s5952_s23 }
  0x37   : > { %s50_s26 = ssub.s32 %s5956_s24, %s6168_s17  ;;  %p60_p7 = scmp.ne.s32.totalorder %s5952_s23, %s5948_s22 }
  0x38   : > { %s637_s30 = sshll.u32 %s7484_s12, 4  ;;  %p51_p8 = scmp.eq.s32.totalorder %s50_s26, 0  ;;  %s638_s30 = int_to_ptr.hbm [resolvable:$true] %s637_s30 }
  0x39   : > { %5059 = dma.hbm_to_vmem [thread:$0]  (!%p6134_p6), %s638_s30, 32, %s640_s18, [#allocation19], %s7445_s29, %s7445_s29, %s7440_s2  }
  0x3a   : > { %p61_p9 = scmp.eq.s32.totalorder %s5956_s24, 0  ;;  %p66_p10 = scmp.ne.s32.totalorder %s5948_s22, %s5944_s1 }
  0x3b   : > { %p473_p11 = scmp.eq.s32.totalorder %s6117_s27, 1  ;;  %p479_p2 = scmp.eq.s32.totalorder %s4812_s21, 1 }
  0x3c   : > { %s6180_s20 = scalar_select %p51_p8, %s5952_s23, %s53_s3  }
  0x3d   : > { %p62_p12 = por %p61_p9, %p60_p7  ;;  %p6184_p13 = por %p7451_p1, %p66_p10 }
  0x3e   : > { %7486 = sst [smem:[#allocation40_spill]] %s6180_s20  ;;  %p6188_p0 = por %p473_p11, %p60_p7 }
  0x3f   : > { %p5091_p4 = scmp.lt.s32.totalorder %s5956_s24, 2  ;;  %s693_s30 = sand.u32 1, %s5956_s24  }
  0x40   : > { %s7488_s4 = scalar_select %p6188_p0, 1, 0 }
  0x41   : > { %p6194_p5 = por %p479_p2, %p66_p10  ;;  %s7450_s18 = sand.u32 1, %s5952_s23  }
  0x42   : > { %7489 = sst [smem:[#allocation41_spill]] %s7488_s4  ;;  %s4974_s3 = smul.u32 48, %s5956_s24 }
  0x43   : > { %s7490_s0 = scalar_select %p6194_p5, 1, 0 }
  0x44   : > { %s4973_s26 = smul.u32 48, %s7450_s18  ;;  %p6202_p8 = pnand %p5091_p4, %p62_p12 }
  0x45   : > { %7491 = sst [smem:[#allocation42_spill]] %s7490_s0  ;;  %s6209_s17 = scalar_lea.sflag [#allocation3], %s693_s30 }
  0x46   : > { %s7493_s29 = sld [smem:[#allocation43_spill]]  ;;  %s697_s12 = scalar_lea.vmem [#allocation2], %s4973_s26 }
  0x47   : > { %s705_s20 = sshll.u32 %s697_s12, 4  ;;  %p5590_p9 = pneg %p6202_p8  ;;  %s706_s20 = int_to_ptr.vmem [resolvable:$true] %s705_s20 }
  0x4c   : > { %s702_s21 = scalar_lea.hbm %s7493_s29, %s4974_s3  ;;  %s5593_s3 = scalar_lea.hbm %s7493_s29, 96 }
  0x4d   : > { %s703_s10 = sshll.u32 %s702_s21, 4  ;;  %s704_s10 = int_to_ptr.hbm [resolvable:$true] %s703_s10 }
  0x4e   : > { %s5586_s0 = sshra.s32 %s704_s10, 4  ;;  %s5587_s0 = int_to_ptr.hbm [resolvable:$true] %s5586_s0 }
  0x4f   : > { %s5588_s18 = scalar_lea.hbm %s5587_s0, 48  ;;  %p5594_p12 = scmp.lt.s32.totalorder %s5587_s0, %s7493_s29 }
  0x50   : > { %p5589_p7 = scmp.ne.s32.totalorder %s5587_s0, %s5588_s18  ;;  %p5595_p2 = scmp.lt.s32.totalorder %s5593_s3, %s5588_s18 }
  0x52   : > { %p5591_p10 = pnand %p5590_p9, %p5589_p7  ;;  %p5596_p4 = por %p5595_p2, %p5594_p12 }
  0x54   : > { %p5592_p11 = pneg %p5591_p10 }
  0x56   : > { %p5597_p1 = pnand %p5596_p4, %p5592_p11 }
  0x58   : > { %5600 = shalt.err (!%p5597_p1)
}
  0x59   : > { %s5969_s12 = smov 256   ;;  %s7494_s30 = smov 16  }
  0x5a   : > { %5069 = dma.hbm_to_vmem [thread:$0]  (!%p6202_p8), %s704_s10, 768, %s706_s20, %s6209_s17, %s5969_s12, %s5969_s12, %s7494_s30  }
  0x5b   : > { %s7495_s1 = sand.u32 1, %s5952_s23   ;;  %s7496_s21 = sld [smem:[#allocation46_spill]] }
  0x5c   : > { %s6228_s16 = smul.u32 24, %s7495_s1  ;;  %s5970_s18 = smov [#allocation8]  }
  0x5d   : > { %s540_s3 = sshll.u32 %s5970_s18, 4  ;;  %s7497_s7 = sld [smem:[#allocation48_spill]]  ;;  %s541_s3 = int_to_ptr.vmem [resolvable:$true] %s540_s3 }
  0x5e   : > { %s5971_s10 = smov [#allocation11]   ;;  %s5972_s1 = smov 384  }
  0x5f   : > { %s569_s20 = sshll.u32 %s5971_s10, 4  ;;  %s5973_s12 = smov 24   ;;  %s570_s20 = int_to_ptr.vmem [resolvable:$true] %s569_s20 }
  0x60   : > { %s7498_s9 = sld [smem:[#allocation50_spill]]  ;;  %s5974_s18 = smov [#allocation14]  }
  0x61   : > { %s538_s0 = sshll.u32 %s7496_s21, 4  ;;  %s597_s29 = sshll.u32 %s5974_s18, 4  ;;  %s539_s0 = int_to_ptr.hbm [resolvable:$true] %s538_s0  ;;  %s598_s29 = int_to_ptr.vmem [resolvable:$true] %s597_s29 }
  0x62   : > { %5038 = dma.hbm_to_vmem [thread:$0]  (!%p6134_p6), %s539_s0, 16, %s541_s3, [#allocation6]  }
  0x63   : > { %s567_s14 = sshll.u32 %s7497_s7, 4  ;;  %s7499_s11 = sld [smem:[#allocation52_spill]]  ;;  %s568_s14 = int_to_ptr.hbm [resolvable:$true] %s567_s14 }
  0x64   : > { %5044 = dma.hbm_to_vmem [thread:$0]  (!%p6134_p6), %s568_s14, 12288, %s570_s20, [#allocation10], %s5972_s1, %s5972_s1, %s5973_s12  }
  0x65   : > { %s7500_s3 = smov 8   ;;  %s7501_s10 = smov 128  }
  0x66   : > { %s595_s21 = sshll.u32 %s7498_s9, 4  ;;  %s5975_s14 = smov [#allocation17]   ;;  %s596_s21 = int_to_ptr.hbm [resolvable:$true] %s595_s21 }
  0x67   : > { %5050 = dma.hbm_to_vmem [thread:$0]  (!%p6134_p6), %s596_s21, 4096, %s598_s29, [#allocation13], %s7501_s10, %s7501_s10, %s7500_s3  }
  0x68   : > { %s625_s20 = sshll.u32 %s5975_s14, 4  ;;  %s7502_s13 = sld [smem:[#allocation54_spill]]  ;;  %s626_s20 = int_to_ptr.vmem [resolvable:$true] %s625_s20 }
  0x69   : > { %s623_s0 = sshll.u32 %s7499_s11, 4  ;;  %s7503_s7 = smov 1   ;;  %s624_s0 = int_to_ptr.hbm [resolvable:$true] %s623_s0 }
  0x6a   : > { %5056 = dma.hbm_to_vmem [thread:$0]  (!%p6134_p6), %s624_s0, 32, %s626_s20, [#allocation16], %s7494_s30, %s7494_s30, %s7503_s7  }
  0x6b   : > { %s5976_s19 = smov [#allocation20]   ;;  %s668_s26 = sshll.u32 %s7429_s15, 4  ;;  %s669_s26 = int_to_ptr.hbm [resolvable:$true] %s668_s26 }
  0x6c   : > { %s653_s18 = sshll.u32 %s5976_s19, 4  ;;  %s5977_s14 = smov 512   ;;  %s654_s18 = int_to_ptr.vmem [resolvable:$true] %s653_s18 }
  0x6d   : > { %s5978_s9 = smov 32   ;;  %s5979_s1 = smov [#allocation21]  }
  0x6e   : > { %s651_s4 = sshll.u32 %s7502_s13, 4  ;;  %s670_s12 = sshll.u32 %s5979_s1, 4  ;;  %s652_s4 = int_to_ptr.hbm [resolvable:$true] %s651_s4  ;;  %s671_s12 = int_to_ptr.vmem [resolvable:$true] %s670_s12 }
  0x6f   : > { %5062 = dma.hbm_to_vmem [thread:$0]  (!%p6134_p6), %s652_s4, 16384, %s654_s18, [#allocation19], %s5977_s14, %s5977_s14, %s5978_s9  }
  0x70   : > { %s4976_s11 = smul.u32 24, %s5956_s24  ;;  %s719_s13 = scalar_lea.vmem [#allocation7], %s6228_s16 }
  0x71   : > { %s727_s23 = sshll.u32 %s719_s13, 4  ;;  %s7504_s20 = sld [smem:[#allocation45_spill]]  ;;  %s728_s23 = int_to_ptr.vmem [resolvable:$true] %s727_s23 }
  0x72   : > { %5065 = dma.hbm_to_vmem [thread:$0]  (!%p6134_p6), %s669_s26, 16384, %s671_s12, [#allocation22], %s7501_s10, %s7501_s10, %s7500_s3  }
  0x77   : > { %s724_s7 = scalar_lea.hbm %s7504_s20, %s4976_s11  ;;  %s5803_s16 = scalar_lea.hbm %s7504_s20, 48 }
  0x78   : > { %s725_s19 = sshll.u32 %s724_s7, 4  ;;  %s726_s19 = int_to_ptr.hbm [resolvable:$true] %s725_s19 }
  0x79   : > { %s5796_s9 = sshra.s32 %s726_s19, 4  ;;  %s5797_s9 = int_to_ptr.hbm [resolvable:$true] %s5796_s9 }
  0x7a   : > { %s5798_s4 = scalar_lea.hbm %s5797_s9, 24  ;;  %p5804_p6 = scmp.lt.s32.totalorder %s5797_s9, %s7504_s20 }
  0x7b   : > { %p5799_p1 = scmp.ne.s32.totalorder %s5797_s9, %s5798_s4  ;;  %p5805_p11 = scmp.lt.s32.totalorder %s5803_s16, %s5798_s4 }
  0x7d   : > { %p5801_p7 = pnand %p5799_p1, %p5590_p9  ;;  %p5806_p12 = por %p5805_p11, %p5804_p6 }
  0x7f   : > { %p5802_p10 = pneg %p5801_p7 }
  0x81   : > { %p5807_p2 = pnand %p5806_p12, %p5802_p10 }
  0x83   : > { %5810 = shalt.err (!%p5807_p2)
}
  0x84   : > { %5072 = dma.hbm_to_vmem [thread:$0]  (!%p6202_p8), %s726_s19, 384, %s728_s23, %s6209_s17, %s7501_s10, %s7501_s10, %s7500_s3  }
  0x85   : > { %739 = sbr.rel (%p6122_p3) target bundleno = 5371 (0x14fb), region = 96  ;;  %s741_s11 = sand.u32 (!%p6122_p3), 1, %s6117_s27  }
  0x86   : > { %s6293_s29 = sand.u32 (!%p6122_p3), 1, %s5948_s22   ;;  %s742_s14 = scalar_lea.sflag (!%p6122_p3), [#allocation3], %s741_s11 }
  0x87   : > { %s4977_s26 = smul.u32 (!%p6122_p3), 48, %s6293_s29 }
  0x89   : > { %s6296_s1 = scalar_lea.vmem (!%p6122_p3), [#allocation2], %s4977_s26 }
  0x8a   : > { %5899 = dma.done.wait (%p6184_p13), %s742_s14, 768  }
  0x8b   : > { %5901 = vsyncadd (%p6184_p13), %s742_s14, 4294966528  ;;  %p7505_p8 = scmp.eq.s32.totalorder %s6117_s27, 0 }
  0x8d   : > { %5903 = dma.done.wait (%p7505_p8), [#allocation6], 3072   ;;  %p7506_p3 = pmov %p7505_p8 }
  0x8e   : > { %s4978_s23 = smul.u32 24, %s6293_s29 }
  0x8f   : > { %5905 = vsyncadd (%p7506_p3), [#allocation6], 4294964224 }
  0x90   : > { %s6309_s28 = scalar_lea.vmem [#allocation7], %s4978_s23 }
  0x91   : > { %5907 = dma.done.wait (%p6184_p13), %s742_s14, 384  }
  0x92   : > { %5909 = vsyncadd (%p6184_p13), %s742_s14, 4294966912  ;;  %p7507_p9 = pmov %p7506_p3 }
  0x93   : > { %p7508_p4 = pmov %p7506_p3 }
  0x94   : > { %5911 = dma.done.wait (%p7507_p9), [#allocation6], 16  }
  0x95   : > { %5913 = vsyncadd (%p7508_p4), [#allocation6], 4294967280  ;;  %p7509_p1 = pmov %p7506_p3 }
  0x97   : > { %5915 = dma.done.wait (%p7509_p1), [#allocation10], 12304   ;;  %p7510_p7 = pmov %p7509_p1 }
  0x98   : > { %p7511_p10 = pmov %p7509_p1 }
  0x99   : > { %5917 = vsyncadd (%p7510_p7), [#allocation10], 4294954992 }
  0x9a   : > { %5919 = dma.done.wait (%p7511_p10), [#allocation13], 4192   ;;  %p7512_p6 = pmov %p7509_p1 }
  0x9b   : > { %p7513_p13 = pmov %p7509_p1 }
  0x9c   : > { %5921 = vsyncadd (%p7512_p6), [#allocation13], 4294963104 }
  0x9d   : > { %5923 = dma.done.wait (%p7513_p13), [#allocation16], 64   ;;  %p7514_p11 = pmov %p7509_p1 }
  0x9e   : > { %p7515_p12 = pmov %p7509_p1 }
  0x9f   : > { %5925 = vsyncadd (%p7514_p11), [#allocation16], 4294967232 }
  0xa0   : > { %5927 = dma.done.wait (%p7515_p12), [#allocation19], 16416   ;;  %p7516_p2 = pmov %p7509_p1 }
  0xa1   : > { %p7517_p8 = pmov %p7509_p1 }
  0xa2   : > { %5929 = vsyncadd (%p7516_p2), [#allocation19], 4294950880 }
  0xa3   : > { %5931 = dma.done.wait (%p7517_p8), [#allocation22], 16384   ;;  %p7518_p3 = pmov %p7509_p1 }
  0xa4   : > { %v898_v0 = vld [vmem:[#allocation5 + $0x78] sm:$0xff]  ;;  %v897_v1 = vld [vmem:[#allocation5 + $0x70] sm:$0xff]  ;;  %v896_v2 = vld [vmem:[#allocation5 + $0x68] sm:$0xff]  ;;  %vm910_vm0 = vcmask 523264   ;;  %v5980_v45 = vmov 128.0   ;;  %s5983_s10 = smov 96  }
  0xa5   : > { %5933 = vsyncadd (%p7518_p3), [#allocation22], 4294950912  ;;  %920 = vmatpush.msra.mxu0 %v898_v0  ;;  %v906_v3 = vld [vmem:[#allocation5 + $0xb8] sm:$0xff]  ;;  %v895_v4 = vld [vmem:[#allocation5 + $0x60] sm:$0xff]  ;;  %5210 = vrcp.f32 %v5980_v45  ;;  %s5984_s12 = smov 64   ;;  %s5985_s30 = smov 32  }
  0xa6   : > { %954 = vmatpush.msra.mxu1 %v906_v3  ;;  %v905_v5 = vld [vmem:[#allocation5 + $0xb0] sm:$0xff]  ;;  %v904_v6 = vld [vmem:[#allocation5 + $0xa8] sm:$0xff]  ;;  %v894_v7 = vld [vmem:[#allocation5 + $0x58] sm:$0xff]  ;;  %s7519_s19 = sld [smem:[#allocation55_spill]]  ;;  %s4979_s17 = smul.u32 24, %s6117_s27 }
  0xa7   : > { %921 = vmatpush.msra.mxu0 %v897_v1  ;;  %v903_v8 = vld [vmem:[#allocation5 + $0xa0] sm:$0xff]  ;;  %v893_v9 = vld [vmem:[#allocation5 + $0x50] sm:$0xff]  ;;  %v892_v10 = vld [vmem:[#allocation5 + $0x48] sm:$0xff]  ;;  %s7530_s13 = sld [smem:[#allocation56_spill]]  ;;  %s4554_s0 = scalar_lea.sflag [#allocation4], %s6293_s29 }
  0xa8   : > { %955 = vmatpush.msra.mxu1 %v905_v5  ;;  %v902_v11 = vld [vmem:[#allocation5 + $0x98] sm:$0xff]  ;;  %v901_v12 = vld [vmem:[#allocation5 + $0x90] sm:$0xff]  ;;  %v891_v13 = vld [vmem:[#allocation5 + $0x40] sm:$0xff] }
  0xa9   : > { %922 = vmatpush.msra.mxu0 %v896_v2  ;;  %v900_v14 = vld [vmem:[#allocation5 + $0x88] sm:$0xff]  ;;  %v890_v15 = vld [vmem:[#allocation5 + $0x38] sm:$0xff]  ;;  %v899_v16 = vld [vmem:[#allocation5 + $0x80] sm:$0xff] }
  0xaa   : > { %956 = vmatpush.msra.mxu1 %v904_v6  ;;  %v889_v17 = vld [vmem:[#allocation5 + $0x30] sm:$0xff]  ;;  %v878_v18 = vld [vmem:[%s6296_s1 + $0x8] sm:$0xff]  ;;  %v887_v20 = vld [vmem:[#allocation5 + $0x20] sm:$0xff] }
  0xab   : > { %923 = vmatpush.msra.mxu0 %v895_v4  ;;  %v888_v19 = vld [vmem:[#allocation5 + $0x28] sm:$0xff]  ;;  %v886_v21 = vld [vmem:[#allocation5 + $0x18] sm:$0xff]  ;;  %v885_v22 = vld [vmem:[#allocation5 + $0x10] sm:$0xff]  ;;  %v5211_v46 = vpop.eup %5210 }
  0xac   : > { %957 = vmatpush.msra.mxu1 %v903_v8  ;;  %v880_v23 = vld [vmem:[%s6296_s1 + $0x18] sm:$0xff]  ;;  %v883_v25 = vld [vmem:[#allocation5] sm:$0xff]  ;;  %v882_v27 = vld [vmem:[%s6296_s1 + $0x28] sm:$0xff]  ;;  %v981_v47 = vmul.f32 128.0, %v5211_v46  ;;  %vm985_vm1 = vweird.f32 %v5211_v46 }
  0xad   : > { %924 = vmatpush.msra.mxu0 %v894_v7  ;;  %v884_v24 = vld [vmem:[#allocation5 + $0x8] sm:$0xff]  ;;  %v877_v26 = vld [vmem:[%s6296_s1] sm:$0xff]  ;;  %v879_v28 = vld [vmem:[%s6296_s1 + $0x10] sm:$0xff] }
  0xae   : > { %958 = vmatpush.msra.mxu1 %v902_v11  ;;  %v881_v29 = vld [vmem:[%s6296_s1 + $0x20] sm:$0xff]  ;;  %v908_v35 = vld [vmem:[%s6309_s28 + $0x8] sm:$0xff]  ;;  %v909_v40 = vld [vmem:[%s6309_s28 + $0x10] sm:$0xff]  ;;  %v982_v48 = vsub.f32 1.0, %v981_v47 }
  0xaf   : > { %925 = vmatpush.msra.mxu0 %v893_v9  ;;  %v907_v31 = vld [vmem:[%s6309_s28] sm:$0xff]  ;;  %v1196_v45 = vld [vmem:[#allocation11 + $0x158] sm:$0xff]  ;;  %s7348_s28 = scalar_lea.vmem [#allocation23], %s4978_s23 }
  0xb0   : > { %959 = vmatpush.msra.mxu1 %v901_v12  ;;  %v983_v49 = vmul.f32 %v5211_v46, %v982_v48  ;;  %s4570_s2 = sshll.u32 %s7348_s28, 4  ;;  %s4571_s2 = int_to_ptr.vmem [resolvable:$true] %s4570_s2 }
  0xb1   : > { %926 = vmatpush.msra.mxu0 %v892_v10 }
  0xb2   : > { %960 = vmatpush.msra.mxu1 %v900_v14  ;;  %v984_v50 = vadd.f32 %v5211_v46, %v983_v49 }
  0xb3   : > { %927 = vmatpush.msra.mxu0 %v891_v13 }
  0xb4   : > { %961 = vmatpush.msra.mxu1 %v899_v16  ;;  %v6351_v51 = vsel %vm985_vm1, %v5211_v46, %v984_v50  ;;  %v1197_v46 = vld [vmem:[#allocation11 + $0x160] sm:$0xff] }
  0xb5   : > { %928 = vmatpush.msra.mxu0 %v890_v15  ;;  %4840 = vmatmul.msk.f32.vlgmr.msra.gmra.mxu1 %vm910_vm0, %v878_v18 }
  0xb7   : > { %929 = vmatpush.msra.mxu0 %v889_v17  ;;  %v5196_v17 = vld [vmem:[#allocation8] ss:$0 sm:$0xff] }
  0xb9   : > { %930 = vmatpush.msra.mxu0 %v888_v19 }
  0xbb   : > { %931 = vmatpush.msra.mxu0 %v887_v20 }
  0xbd   : > { %932 = vmatpush.msra.mxu0 %v886_v21  ;;  %4841 = vmatmul.msk.f32.gmra.mxu1 %vm910_vm0, %v880_v23  ;;  %v5197_v21 = vld [vmem:[#allocation9] ss:$0 sm:$0xff] }
  0xbf   : > { %933 = vmatpush.msra.mxu0 %v885_v22 }
  0xc1   : > { %934 = vmatpush.msra.mxu0 %v884_v24 }
  0xc3   : > { %935 = vmatpush.msra.mxu0 %v883_v25 }
  0xc4   : > { %936 = vmatmul.f32.vlgmr.msra.gmra.mxu0 %v877_v26 }
  0xc5   : > { %4842 = vmatmul.msk.f32.gmra.mxu1 %vm910_vm0, %v882_v27 }
  0xcc   : > { %939 = vmatmul.f32.gmra.mxu0 %v879_v28 }
  0xd4   : > { %942 = vmatmul.f32.gmra.mxu0 %v881_v29 }
 0x132   : > { %v963_v30 = vpop.f32.mrf.mxu1 }
 0x13a   : > { %v966_v36 = vpop.f32.mrf.mxu1 }
 0x141   : > { %v937_v32 = vpop.f32.mrf.mxu0 }
 0x142   : > { %v938_v33 = vadd.f32 %v937_v32, %v907_v31  ;;  %v969_v42 = vpop.f32.mrf.mxu1 }
 0x144   : > { %v964_v34 = vadd.f32 %v963_v30, %v938_v33 }
 0x146   : > { %974 = vadd.xlane.f32.xlu0 %v964_v34 }
 0x149   : > { %v940_v37 = vpop.f32.mrf.mxu0 }
 0x14a   : > { %v941_v38 = vadd.f32 %v940_v37, %v908_v35 }
 0x14c   : > { %v967_v39 = vadd.f32 %v966_v36, %v941_v38 }
 0x14e   : > { %976 = vadd.xlane.f32.xlu0 %v967_v39 }
 0x151   : > { %v943_v41 = vpop.f32.mrf.mxu0 }
 0x152   : > { %v944_v43 = vadd.f32 %v943_v41, %v909_v40  ;;  %v1198_v41 = vld [vmem:[#allocation11 + $0x168] sm:$0xff] }
 0x153   : > { %1225 = vmatpush.msra.mxu3 %v1198_v41  ;;  %v1155_v41 = vld [vmem:[#allocation11 + $0x10] sm:$0xff] }
 0x154   : > { %v970_v44 = vadd.f32 %v969_v42, %v944_v43  ;;  %v1199_v42 = vld [vmem:[#allocation11 + $0x170] sm:$0xff]  ;;  %v1200_v43 = vld [vmem:[#allocation11 + $0x178] sm:$0xff] }
 0x155   : > { %1277 = vmatpush.msrb.mxu1 %v1200_v43 }
 0x156   : > { %978 = vadd.xlane.f32.xlu1 %v970_v44 }
 0x157   : > { %1278 = vmatpush.msrb.mxu1 %v1197_v46 }
 0x1b9   : > { %v975_v52 = vpop.xlane.xlu0 %974 }
 0x1ba   : > { %v987_v53 = vmul.f32 %v6351_v51, %v975_v52 }
 0x1bc   : > { %v990_v54 = vsub.f32 %v964_v34, %v987_v53 }
 0x1be   : > { %v993_v55 = vmul.f32 %v990_v54, %v990_v54 }
 0x1c0   : > { %996 = vadd.xlane.f32.xlu1 %v993_v55 }
 0x1c1   : > { %v977_v56 = vpop.xlane.xlu0 %976 }
 0x1c2   : > { %v988_v57 = vmul.f32 %v6351_v51, %v977_v56 }
 0x1c4   : > { %v991_v58 = vsub.f32 %v967_v39, %v988_v57 }
 0x1c6   : > { %v994_v59 = vmul.f32 %v991_v58, %v991_v58 }
 0x1c8   : > { %998 = vadd.xlane.f32.xlu2 %v994_v59 }
 0x1c9   : > { %v979_v60 = vpop.xlane.xlu1 %978 }
 0x1ca   : > { %v989_v61 = vmul.f32 %v6351_v51, %v979_v60  ;;  %v1192_v60 = vld [vmem:[#allocation11 + $0x138] sm:$0xff] }
 0x1cc   : > { %v992_v62 = vsub.f32 %v970_v44, %v989_v61  ;;  %v1195_v44 = vld [vmem:[#allocation11 + $0x150] sm:$0xff]  ;;  %v1193_v61 = vld [vmem:[#allocation11 + $0x140] sm:$0xff] }
 0x1cd   : > { %1226 = vmatpush.msra.mxu3 %v1195_v44 }
 0x1ce   : > { %v995_v63 = vmul.f32 %v992_v62, %v992_v62 }
 0x1cf   : > { %1227 = vmatpush.msra.mxu3 %v1192_v60 }
 0x1d0   : > { %1000 = vadd.xlane.f32.xlu2 %v995_v63  ;;  %v1189_v63 = vld [vmem:[#allocation11 + $0x120] sm:$0xff] }
 0x1d1   : > { %1228 = vmatpush.msra.mxu3 %v1189_v63  ;;  %v5198_v63 = vld [vmem:[%s7419_s5] ss:$0 sm:$0xff] }
 0x233   : > { %v997_v0 = vpop.xlane.xlu1 %996 }
 0x234   : > { %v1002_v1 = vmul.f32 %v997_v0, %v6351_v51  ;;  %v1190_v0 = vld [vmem:[#allocation11 + $0x128] sm:$0xff] }
 0x236   : > { %v1005_v2 = vadd.f32 1e-05, %v1002_v1  ;;  %v1191_v1 = vld [vmem:[#allocation11 + $0x130] sm:$0xff] }
 0x238   : > { %5212 = vrsqrt.f32 %v1005_v2  ;;  %vm1014_vm3 = vweird.f32 %v1005_v2 }
 0x23b   : > { %v999_v3 = vpop.xlane.xlu2 %998 }
 0x23c   : > { %v1003_v4 = vmul.f32 %v999_v3, %v6351_v51  ;;  %v1187_v3 = vld [vmem:[#allocation11 + $0x110] sm:$0xff] }
 0x23e   : > { %v5213_v5 = vpop.eup %5212  ;;  %v1006_v6 = vadd.f32 1e-05, %v1003_v4  ;;  %v1188_v4 = vld [vmem:[#allocation11 + $0x118] sm:$0xff] }
 0x23f   : > { %v1009_v7 = vmul.f32 %v5213_v5, %v1005_v2  ;;  %vm1015_vm2 = vweird.f32 %v5213_v5  ;;  %v1186_v2 = vld [vmem:[#allocation11 + $0x108] sm:$0xff] }
 0x240   : > { %5214 = vrsqrt.f32 %v1006_v6  ;;  %vm1016_vm4 = vmor %vm1014_vm3, %vm1015_vm2  ;;  %vm1024_vm6 = vweird.f32 %v1006_v6  ;;  %1229 = vmatpush.msra.mxu3 %v1186_v2 }
 0x241   : > { %v1010_v8 = vmul.f32 %v5213_v5, %v1009_v7  ;;  %v1184_v7 = vld [vmem:[#allocation11 + $0xf8] sm:$0xff] }
 0x243   : > { %v1011_v9 = vmul.f32 0.5, %v1010_v8  ;;  %v1001_v10 = vpop.xlane.xlu2 %1000  ;;  %v1180_v8 = vld [vmem:[#allocation11 + $0xd8] sm:$0xff] }
 0x244   : > { %v1004_v11 = vmul.f32 %v1001_v10, %v6351_v51  ;;  %v1182_v10 = vld [vmem:[#allocation11 + $0xe8] sm:$0xff] }
 0x245   : > { %v1012_v12 = vsub.f32 1.5, %v1011_v9  ;;  %v1181_v9 = vld [vmem:[#allocation11 + $0xe0] sm:$0xff] }
 0x246   : > { %v5215_v13 = vpop.eup %5214  ;;  %v1007_v14 = vadd.f32 1e-05, %v1004_v11  ;;  %v1177_v11 = vld [vmem:[#allocation11 + $0xc0] sm:$0xff] }
 0x247   : > { %v1013_v15 = vmul.f32 %v5213_v5, %v1012_v12  ;;  %v1019_v16 = vmul.f32 %v5215_v13, %v1006_v6  ;;  %vm1025_vm5 = vweird.f32 %v5215_v13  ;;  %v1185_v6 = vld [vmem:[#allocation11 + $0x100] sm:$0xff]  ;;  %v1178_v12 = vld [vmem:[#allocation11 + $0xc8] sm:$0xff] }
 0x248   : > { %5216 = vrsqrt.f32 %v1007_v14  ;;  %vm1026_vm7 = vmor %vm1024_vm6, %vm1025_vm5  ;;  %vm1034_vm9 = vweird.f32 %v1007_v14 }
 0x249   : > { %v1017_v18 = vsel %vm1016_vm4, %v5213_v5, %v1013_v15  ;;  %v1020_v19 = vmul.f32 %v5215_v13, %v1019_v16  ;;  %v1183_v5 = vld [vmem:[#allocation11 + $0xf0] sm:$0xff]  ;;  %v1176_v16 = vld [vmem:[#allocation11 + $0xb8] sm:$0xff]  ;;  %vm1304_vm4 = vcmask 261120  }
 0x24a   : > { %v1038_v20 = vmul.f32 %v1017_v18, %v990_v54  ;;  %1230 = vmatpush.msra.mxu3 %v1183_v5  ;;  %v1175_v15 = vld [vmem:[#allocation11 + $0xb0] sm:$0xff]  ;;  %v1173_v18 = vld [vmem:[#allocation11 + $0xa0] sm:$0xff] }
 0x24b   : > { %v1021_v22 = vmul.f32 0.5, %v1020_v19  ;;  %v1172_v19 = vld [vmem:[#allocation11 + $0x98] sm:$0xff] }
 0x24c   : > { %v1044_v23 = vmul.f32 %v5196_v17, %v1038_v20  ;;  %1231 = vmatpush.msra.mxu3 %v1180_v8  ;;  %v1168_v20 = vld [vmem:[#allocation11 + $0x78] sm:$0xff] }
 0x24d   : > { %v1022_v24 = vsub.f32 1.5, %v1021_v22  ;;  %v1170_v22 = vld [vmem:[#allocation11 + $0x88] sm:$0xff] }
 0x24e   : > { %v5217_v25 = vpop.eup %5216  ;;  %v6359_v26 = vadd.f32 %v5197_v21, %v1044_v23  ;;  %1232 = vmatpush.msra.mxu3 %v1177_v11  ;;  %v1165_v23 = vld [vmem:[#allocation11 + $0x60] sm:$0xff] }
 0x24f   : > { %v1023_v27 = vmul.f32 %v5215_v13, %v1022_v24  ;;  %v1029_v28 = vmul.f32 %v5217_v25, %v1007_v14  ;;  %vm1035_vm8 = vweird.f32 %v5217_v25  ;;  %v1174_v14 = vld [vmem:[#allocation11 + $0xa8] sm:$0xff] }
 0x250   : > { %1081 = vadd.xlane.f32.xlu0 %v6359_v26  ;;  %vm1036_vm10 = vmor %vm1034_vm9, %vm1035_vm8  ;;  %1233 = vmatpush.msra.mxu3 %v1174_v14  ;;  %v1166_v24 = vld [vmem:[#allocation11 + $0x68] sm:$0xff]  ;;  %vm1349_vm8 = vcmask 195584  }
 0x251   : > { %v1027_v29 = vsel %vm1026_vm7, %v5215_v13, %v1023_v27  ;;  %v1030_v30 = vmul.f32 %v5217_v25, %v1029_v28  ;;  %v1179_v13 = vld [vmem:[#allocation11 + $0xd0] sm:$0xff]  ;;  %v5981_v27 = vmov 1.0   ;;  %v1162_v28 = vld [vmem:[#allocation11 + $0x48] sm:$0xff] }
 0x252   : > { %v1039_v31 = vmul.f32 %v1027_v29, %v991_v58  ;;  %v1163_v29 = vld [vmem:[#allocation11 + $0x50] sm:$0xff] }
 0x253   : > { %v1031_v32 = vmul.f32 0.5, %v1030_v30  ;;  %v1164_v30 = vld [vmem:[#allocation11 + $0x58] sm:$0xff] }
 0x254   : > { %v1045_v33 = vmul.f32 %v5196_v17, %v1039_v31  ;;  %v1159_v31 = vld [vmem:[#allocation11 + $0x30] sm:$0xff] }
 0x255   : > { %v1032_v34 = vsub.f32 1.5, %v1031_v32  ;;  %v1160_v32 = vld [vmem:[#allocation11 + $0x38] sm:$0xff] }
 0x256   : > { %v6362_v35 = vadd.f32 %v5197_v21, %v1045_v33  ;;  %v1161_v33 = vld [vmem:[#allocation11 + $0x40] sm:$0xff] }
 0x257   : > { %v1033_v36 = vmul.f32 %v5217_v25, %v1032_v34  ;;  %v1156_v34 = vld [vmem:[#allocation11 + $0x18] sm:$0xff] }
 0x258   : > { %1083 = vadd.xlane.f32.xlu1 %v6362_v35 }
 0x259   : > { %v1037_v37 = vsel %vm1036_vm10, %v5217_v25, %v1033_v36  ;;  %v1167_v25 = vld [vmem:[#allocation11 + $0x70] sm:$0xff]  ;;  %v1157_v36 = vld [vmem:[#allocation11 + $0x20] sm:$0xff] }
 0x25a   : > { %v1040_v38 = vmul.f32 %v1037_v37, %v992_v62  ;;  %v1194_v62 = vld [vmem:[#allocation11 + $0x148] sm:$0xff] }
 0x25b   : > { %1279 = vmatpush.msrb.mxu1 %v1194_v62  ;;  %v1158_v37 = vld [vmem:[#allocation11 + $0x28] sm:$0xff] }
 0x25c   : > { %v1046_v39 = vmul.f32 %v5196_v17, %v1040_v38  ;;  %v1171_v17 = vld [vmem:[#allocation11 + $0x90] sm:$0xff]  ;;  %v1153_v38 = vld [vmem:[#allocation11] sm:$0xff] }
 0x25d   : > { %1280 = vmatpush.msrb.mxu1 %v1191_v1  ;;  %1234 = vmatpush.msra.mxu3 %v1171_v17 }
 0x25e   : > { %v6365_v40 = vadd.f32 %v5197_v21, %v1046_v39  ;;  %v1169_v21 = vld [vmem:[#allocation11 + $0x80] sm:$0xff]  ;;  %v1154_v39 = vld [vmem:[#allocation11 + $0x8] sm:$0xff] }
 0x25f   : > { %1281 = vmatpush.msrb.mxu1 %v1188_v4  ;;  %1235 = vmatpush.msra.mxu3 %v1168_v20 }
 0x260   : > { %1085 = vadd.xlane.f32.xlu2 %v6365_v40  ;;  %1066 = vmatpush.xpose.msra.mxu2 %v6365_v40 }
 0x261   : > { %1282 = vmatpush.msrb.mxu1 %v1185_v6  ;;  %1236 = vmatpush.msra.mxu3 %v1165_v23 }
 0x263   : > { %1283 = vmatpush.msrb.mxu1 %v1182_v10  ;;  %1237 = vmatpush.msra.mxu3 %v1162_v28 }
 0x264   : > { %1067 = vmatpush.xpose.msra.mxu2 %v6362_v35 }
 0x265   : > { %1284 = vmatpush.msrb.mxu1 %v1179_v13  ;;  %1238 = vmatpush.msra.mxu3 %v1159_v31 }
 0x267   : > { %1285 = vmatpush.msrb.mxu1 %v1176_v16  ;;  %1239 = vmatpush.msra.mxu3 %v1156_v34 }
 0x268   : > { %1068 = vmatpush.xpose.msra.mxu2 %v6359_v26 }
 0x269   : > { %1286 = vmatpush.msrb.mxu1 %v1173_v18  ;;  %1240 = vmatpush.msra.mxu3 %v1153_v38 }
 0x26b   : > { %1287 = vmatpush.msrb.mxu1 %v1170_v22  ;;  %1069 = vmatmul.f32.vlgmr.msra.gmra.mxu2 %v5981_v27 }
 0x26c   : > { %1251 = vmatpush.msrb.mxu2 %v1199_v42 }
 0x26d   : > { %1288 = vmatpush.msrb.mxu1 %v1167_v25  ;;  %v1217_v25 = vld [vmem:[#allocation12] sm:$0x7] }
 0x26e   : > { %1252 = vmatpush.msrb.mxu2 %v1196_v45  ;;  %v1221_v28 = vperm.slane %v1217_v25, 2 }
 0x26f   : > { %1289 = vmatpush.msrb.mxu1 %v1164_v30 }
 0x270   : > { %1253 = vmatpush.msrb.mxu2 %v1193_v61 }
 0x271   : > { %1290 = vmatpush.msrb.mxu1 %v1161_v33  ;;  %v1220_v33 = vperm.slane %v1217_v25, 1 }
 0x272   : > { %1254 = vmatpush.msrb.mxu2 %v1190_v0 }
 0x273   : > { %1291 = vmatpush.msrb.mxu1 %v1158_v37 }
 0x274   : > { %1255 = vmatpush.msrb.mxu2 %v1187_v3  ;;  %v5199_v3 = vld [vmem:[%s7420_s6] ss:$0 sm:$0xff] }
 0x275   : > { %1292 = vmatpush.msrb.mxu1 %v1155_v41 }
 0x276   : > { %1256 = vmatpush.msrb.mxu2 %v1184_v7 }
 0x278   : > { %1257 = vmatpush.msrb.mxu2 %v1181_v9 }
 0x27a   : > { %1258 = vmatpush.msrb.mxu2 %v1178_v12 }
 0x27c   : > { %1259 = vmatpush.msrb.mxu2 %v1175_v15 }
 0x27e   : > { %1260 = vmatpush.msrb.mxu2 %v1172_v19 }
 0x280   : > { %1261 = vmatpush.msrb.mxu2 %v1169_v21 }
 0x282   : > { %1262 = vmatpush.msrb.mxu2 %v1166_v24 }
 0x284   : > { %1263 = vmatpush.msrb.mxu2 %v1163_v29 }
 0x286   : > { %1264 = vmatpush.msrb.mxu2 %v1160_v32 }
 0x288   : > { %1265 = vmatpush.msrb.mxu2 %v1157_v36 }
 0x28a   : > { %1266 = vmatpush.msrb.mxu2 %v1154_v39  ;;  %v1219_v39 = vperm.slane %v1217_v25, 0 }
 0x2c3   : > { %v1082_v47 = vpop.xlane.xlu0 %1081 }
 0x2c4   : > { %v1087_v48 = vmul.f32 %v1082_v47, %v6351_v51 }
 0x2c6   : > { %v6373_v49 = vsub.f32 %v6359_v26, %v1087_v48 }
 0x2c8   : > { %v1093_v50 = vmul.f32 %v6373_v49, %v6373_v49 }
 0x2ca   : > { %1096 = vadd.xlane.f32.xlu0 %v1093_v50 }
 0x2cb   : > { %v1084_v52 = vpop.xlane.xlu1 %1083 }
 0x2cc   : > { %v1088_v53 = vmul.f32 %v1084_v52, %v6351_v51 }
 0x2ce   : > { %v6379_v54 = vsub.f32 %v6362_v35, %v1088_v53 }
 0x2d0   : > { %v1094_v55 = vmul.f32 %v6379_v54, %v6379_v54 }
 0x2d2   : > { %1098 = vadd.xlane.f32.xlu1 %v1094_v55 }
 0x2d3   : > { %v1086_v56 = vpop.xlane.xlu2 %1085 }
 0x2d4   : > { %v1089_v57 = vmul.f32 %v1086_v56, %v6351_v51 }
 0x2d6   : > { %v6385_v58 = vsub.f32 %v6365_v40, %v1089_v57 }
 0x2d8   : > { %v1095_v59 = vmul.f32 %v6385_v58, %v6385_v58 }
 0x2da   : > { %1100 = vadd.xlane.f32.xlu2 %v1095_v59 }
 0x33d   : > { %v1097_v42 = vpop.xlane.xlu0 %1096 }
 0x33e   : > { %v1102_v43 = vmul.f32 %v1097_v42, %v6351_v51 }
 0x340   : > { %v1105_v44 = vadd.f32 1e-05, %v1102_v43 }
 0x342   : > { %5218 = vrsqrt.f32 %v1105_v44  ;;  %vm1114_vm12 = vweird.f32 %v1105_v44 }
 0x345   : > { %v1099_v45 = vpop.xlane.xlu1 %1098 }
 0x346   : > { %v1103_v46 = vmul.f32 %v1099_v45, %v6351_v51 }
 0x348   : > { %v5219_v47 = vpop.eup %5218  ;;  %v1106_v48 = vadd.f32 1e-05, %v1103_v46 }
 0x349   : > { %v1109_v50 = vmul.f32 %v5219_v47, %v1105_v44  ;;  %vm1115_vm11 = vweird.f32 %v5219_v47 }
 0x34a   : > { %5220 = vrsqrt.f32 %v1106_v48  ;;  %vm1116_vm13 = vmor %vm1114_vm12, %vm1115_vm11  ;;  %vm1124_vm15 = vweird.f32 %v1106_v48 }
 0x34b   : > { %v1110_v52 = vmul.f32 %v5219_v47, %v1109_v50  ;;  %v5982_v50 = vmov 0.0  }
 0x34d   : > { %v1111_v53 = vmul.f32 0.5, %v1110_v52  ;;  %v1101_v55 = vpop.xlane.xlu2 %1100 }
 0x34e   : > { %v1104_v56 = vmul.f32 %v1101_v55, %v6351_v51 }
 0x34f   : > { %v1112_v57 = vsub.f32 1.5, %v1111_v53 }
 0x350   : > { %v5221_v59 = vpop.eup %5220  ;;  %v1107_v60 = vadd.f32 1e-05, %v1104_v56 }
 0x351   : > { %v1113_v61 = vmul.f32 %v5219_v47, %v1112_v57  ;;  %v1119_v62 = vmul.f32 %v5221_v59, %v1106_v48  ;;  %vm1125_vm14 = vweird.f32 %v5221_v59 }
 0x352   : > { %5222 = vrsqrt.f32 %v1107_v60  ;;  %vm1126_vm0 = vmor %vm1124_vm15, %vm1125_vm14  ;;  %vm1134_vm2 = vweird.f32 %v1107_v60 }
 0x353   : > { %v1117_v0 = vsel %vm1116_vm13, %v5219_v47, %v1113_v61  ;;  %v1120_v1 = vmul.f32 %v5221_v59, %v1119_v62  ;;  %v1073_v47 = vlaneseq }
 0x354   : > { %v1138_v2 = vmul.f32 %v1117_v0, %v6373_v49 }
 0x355   : > { %v1121_v4 = vmul.f32 0.5, %v1120_v1  ;;  %v1074_v48 = vand.u32 127, %v1073_v47 }
 0x356   : > { %v1144_v5 = vmul.f32 %v5198_v63, %v1138_v2 }
 0x357   : > { %v1122_v6 = vsub.f32 1.5, %v1121_v4  ;;  %vm1076_vm6 = vcmp.ge.s32.totalorder %v1074_v48, 17 }
 0x358   : > { %v5223_v7 = vpop.eup %5222  ;;  %v1150_v8 = vadd.f32 %v5199_v3, %v1144_v5 }
 0x359   : > { %v1123_v9 = vmul.f32 %v5221_v59, %v1122_v6  ;;  %v1129_v10 = vmul.f32 %v5223_v7, %v1107_v60  ;;  %vm1135_vm1 = vweird.f32 %v5223_v7 }
 0x35a   : > { %1241 = vmatmul.f32.vlgmr.msra.gmra.mxu3 %v1150_v8  ;;  %1267 = vmatmul.f32.vlgmr.msrb.gmra.mxu2 %v1150_v8  ;;  %vm1136_vm3 = vmor %vm1134_vm2, %vm1135_vm1 }
 0x35b   : > { %v1127_v11 = vsel %vm1126_vm0, %v5221_v59, %v1123_v9  ;;  %v1130_v12 = vmul.f32 %v5223_v7, %v1129_v10  ;;  %1293 = vmatmul.f32.vlgmr.msrb.gmra.mxu1 %v1150_v8 }
 0x35c   : > { %v1139_v49 = vmul.f32 %v1127_v11, %v6379_v54  ;;  %v1070_v54 = vpop.f32.mrf.mxu2 }
 0x35d   : > { %v1131_v13 = vmul.f32 0.5, %v1130_v12  ;;  %vm1075_vm5 = vcmp.eq.f32.partialorder %v1070_v54, -1.0 }
 0x35e   : > { %v1145_v14 = vmul.f32 %v5198_v63, %v1139_v49  ;;  %vm1077_vm7 = vmor %vm1075_vm5, %vm1076_vm6 }
 0x35f   : > { %v1132_v15 = vsub.f32 1.5, %v1131_v13  ;;  %v1078_v52 = vsel %vm1077_vm7, -inf, %v5982_v50 }
 0x360   : > { %v1151_v16 = vadd.f32 %v5199_v3, %v1145_v14  ;;  %v6427_v53 = vperm.slane %v1078_v52, 0 }
 0x361   : > { %v1133_v17 = vmul.f32 %v5223_v7, %v1132_v15 }
 0x362   : > { %1244 = vmatmul.f32.gmra.mxu3 %v1151_v16  ;;  %1270 = vmatmul.f32.gmra.mxu2 %v1151_v16 }
 0x363   : > { %v1137_v18 = vsel %vm1136_vm3, %v5223_v7, %v1133_v17  ;;  %1296 = vmatmul.f32.gmra.mxu1 %v1151_v16 }
 0x364   : > { %v1140_v19 = vmul.f32 %v1137_v18, %v6385_v58 }
 0x366   : > { %v1146_v20 = vmul.f32 %v5198_v63, %v1140_v19 }
 0x368   : > { %v1152_v21 = vadd.f32 %v5199_v3, %v1146_v20 }
 0x36a   : > { %1247 = vmatmul.f32.gmra.mxu3 %v1152_v21  ;;  %1273 = vmatmul.f32.gmra.mxu2 %v1152_v21 }
 0x36b   : > { %1299 = vmatmul.f32.gmra.mxu1 %v1152_v21 }
 0x3d8   : > { %v1294_v22 = vpop.f32.mrf.mxu1 }
 0x3d9   : > { %v6403_v58 = vadd.f32 %v1294_v22, %v1221_v28 }
 0x3dd   : > { %v1268_v23 = vpop.f32.mrf.mxu2  ;;  %v1242_v37 = vpop.f32.mrf.mxu3 }
 0x3de   : > { %v6414_v41 = vadd.f32 %v1268_v23, %v1220_v33  ;;  %v6418_v42 = vadd.f32 %v1242_v37, %v1219_v39  ;;  %v1203_v37 = vld [vmem:[#allocation14 + $0x10] sm:$0xff] }
 0x3e0   : > { %v1297_v24 = vpop.f32.mrf.mxu1 }
 0x3e1   : > { %v1298_v30 = vadd.f32 %v1297_v24, %v1221_v28 }
 0x3e5   : > { %v1271_v27 = vpop.f32.mrf.mxu2  ;;  %v1245_v43 = vpop.f32.mrf.mxu3 }
 0x3e6   : > { %v6410_v38 = vadd.f32 %v1271_v27, %v1220_v33  ;;  %v6422_v44 = vadd.f32 %v1245_v43, %v1219_v39  ;;  %v1201_v43 = vld [vmem:[#allocation14] sm:$0xff] }
 0x3e8   : > { %v1300_v29 = vpop.f32.mrf.mxu1 }
 0x3e9   : > { %v1301_v31 = vadd.f32 %v1300_v29, %v1221_v28 }
 0x3eb   : > { %1444 = vmatpush.msrb.mxu3 %v1301_v31  ;;  %v6401_v32 = vpack.i.bf16 %v1298_v30, %v1301_v31 }
 0x3ed   : > { %1445 = vmatpush.msrb.mxu3 %v1298_v30  ;;  %v1274_v34 = vpop.f32.mrf.mxu2  ;;  %v1248_v45 = vpop.f32.mrf.mxu3  ;;  %v1204_v30 = vld [vmem:[#allocation14 + $0x18] sm:$0xff] }
 0x3ee   : > { %v6405_v36 = vadd.f32 %v1274_v34, %v1220_v33  ;;  %v1249_v46 = vadd.f32 %v1248_v45, %v1219_v39 }
 0x3ef   : > { %1446 = vmatpush.msrb.mxu3 %v6403_v58 }
 0x3f0   : > { %4843 = vmatpush.xpose.msk.msrb.mxu0 %vm1304_vm4, %v6405_v36 }
 0x3f1   : > { %1682 = vmatpush.msra.mxu3 %v1204_v30 }
 0x3f3   : > { %1683 = vmatpush.msra.mxu3 %v1203_v37 }
 0x3f4   : > { %4844 = vmatpush.xpose.msk.msrb.mxu0 %vm1304_vm4, %v6410_v38 }
 0x3f8   : > { %4845 = vmatpush.xpose.msk.msrb.mxu0 %vm1304_vm4, %v6414_v41 }
 0x3fb   : > { %4846 = vmatmul.msk.f32.vlgmr.msrb.gmra.mxu0 %vm1304_vm4, %v6418_v42 }
 0x403   : > { %4847 = vmatmul.msk.f32.gmra.mxu0 %vm1304_vm4, %v6422_v44 }
 0x40b   : > { %4848 = vmatmul.msk.f32.gmra.mxu0 %vm1304_vm4, %v1249_v46 }
 0x478   : > { %v1340_v55 = vpop.f32.mrf.mxu0 }
 0x479   : > { %v1341_v56 = vadd.f32 %v1340_v55, %v6427_v53 }
 0x47b   : > { %v1350_v57 = vsel %vm1349_vm8, %v1341_v56, -inf }
 0x47c   : > { %1351 = vmax.xlane.f32.xlu0 %v1350_v57 }
 0x480   : > { %v1343_v59 = vpop.f32.mrf.mxu0 }
 0x481   : > { %v1344_v60 = vadd.f32 %v1343_v59, %v6427_v53 }
 0x483   : > { %v1353_v61 = vsel %vm1349_vm8, %v1344_v60, -inf }
 0x484   : > { %1354 = vmax.xlane.f32.xlu1 %v1353_v61 }
 0x488   : > { %v1346_v62 = vpop.f32.mrf.mxu0 }
 0x489   : > { %v1347_v63 = vadd.f32 %v1346_v62, %v6427_v53 }
 0x48b   : > { %v1356_v0 = vsel %vm1349_vm8, %v1347_v63, -inf }
 0x48c   : > { %1357 = vmax.xlane.f32.xlu2 %v1356_v0 }
 0x4ef   : > { %v1352_v1 = vpop.xlane.xlu0 %1351 }
 0x4f0   : > { %v1359_v2 = vsub.f32 %v1341_v56, %v1352_v1 }
 0x4f2   : > { %v1362_v3 = vmul.f32 1.442695, %v1359_v2 }
 0x4f4   : > { %5224 = vpow2.f32 %v1362_v3 }
 0x4f7   : > { %v1355_v4 = vpop.xlane.xlu1 %1354 }
 0x4f8   : > { %v1360_v5 = vsub.f32 %v1344_v60, %v1355_v4 }
 0x4fa   : > { %v5225_v6 = vpop.eup %5224  ;;  %v1364_v7 = vmul.f32 1.442695, %v1360_v5 }
 0x4fb   : > { %v1368_v8 = vsel %vm1349_vm8, %v5225_v6, 0.0 }
 0x4fc   : > { %5226 = vpow2.f32 %v1364_v7  ;;  %1369 = vadd.xlane.f32.xlu0 %v1368_v8 }
 0x4ff   : > { %v1358_v9 = vpop.xlane.xlu2 %1357 }
 0x500   : > { %v1361_v10 = vsub.f32 %v1347_v63, %v1358_v9 }
 0x502   : > { %v6436_v11 = vpop.eup %5226  ;;  %v1366_v12 = vmul.f32 1.442695, %v1361_v10 }
 0x503   : > { %v1371_v49 = vsel %vm1349_vm8, %v6436_v11, 0.0 }
 0x504   : > { %5228 = vpow2.f32 %v1366_v12  ;;  %1372 = vadd.xlane.f32.xlu1 %v1371_v49 }
 0x50a   : > { %v6440_v13 = vpop.eup %5228 }
 0x50b   : > { %v1374_v14 = vsel %vm1349_vm8, %v6440_v13, 0.0 }
 0x50c   : > { %1375 = vadd.xlane.f32.xlu2 %v1374_v14 }
 0x510   : > { %1467 = vrot.lane.b32.xlu0 %v6405_v36, %s5983_s10 }
 0x518   : > { %1457 = vrot.lane.b32.xlu0 %v6418_v42, %s5983_s10 }
 0x51d   : > { %1465 = vrot.lane.b32.xlu1 %v6410_v38, %s5983_s10 }
 0x520   : > { %1461 = vrot.lane.b32.xlu0 %v1249_v46, %s5983_s10 }
 0x524   : > { %1463 = vrot.lane.b32.xlu2 %v6414_v41, %s5983_s10 }
 0x525   : > { %1706 = vrot.lane.b32.xlu1 %v6405_v36, %s5984_s12 }
 0x528   : > { %1696 = vrot.lane.b32.xlu0 %v6418_v42, %s5984_s12 }
 0x52c   : > { %1459 = vrot.lane.b32.xlu2 %v6422_v44, %s5983_s10 }
 0x52d   : > { %1702 = vrot.lane.b32.xlu1 %v6414_v41, %s5984_s12 }
 0x530   : > { %1700 = vrot.lane.b32.xlu0 %v1249_v46, %s5984_s12 }
 0x534   : > { %1704 = vrot.lane.b32.xlu2 %v6410_v38, %s5984_s12 }
 0x535   : > { %1910 = vrot.lane.b32.xlu1 %v6405_v36, %s5985_s30 }
 0x538   : > { %1900 = vrot.lane.b32.xlu0 %v6418_v42, %s5985_s30 }
 0x53c   : > { %1698 = vrot.lane.b32.xlu2 %v6422_v44, %s5984_s12 }
 0x53d   : > { %1906 = vrot.lane.b32.xlu1 %v6414_v41, %s5985_s30  ;;  %v1202_v41 = vld [vmem:[#allocation14 + $0x8] sm:$0xff] }
 0x53e   : > { %1684 = vmatpush.msra.mxu3 %v1202_v41 }
 0x540   : > { %1685 = vmatpush.msra.mxu3 %v1201_v43 }
 0x544   : > { %1908 = vrot.lane.b32.xlu2 %v6410_v38, %s5985_s30 }
 0x545   : > { %1904 = vrot.lane.b32.xlu1 %v1249_v46, %s5985_s30 }
 0x54c   : > { %1902 = vrot.lane.b32.xlu2 %v6422_v44, %s5985_s30 }
 0x56f   : > { %v1370_v15 = vpop.xlane.xlu0 %1369 }
 0x570   : > { %5230 = vrcp.f32 %v1370_v15  ;;  %v1388_v20 = vand.u32 2147483648, %v1370_v15  ;;  %v1386_v54 = vand.u32 2147483647, %v1370_v15  ;;  %vm1382_vm10 = vweird.f32 %v1370_v15 }
 0x572   : > { %v1389_v24 = vor.u32 1.1754944e-38, %v1388_v20  ;;  %vm1387_vm12 = vcmp.eq.f32.partialorder %v1386_v54, 8.507059e+37 }
 0x576   : > { %v5231_v16 = vpop.eup %5230 }
 0x577   : > { %v1378_v17 = vmul.f32 %v5231_v16, %v1370_v15  ;;  %v1373_v18 = vpop.xlane.xlu1 %1372  ;;  %vm1383_vm9 = vweird.f32 %v5231_v16 }
 0x578   : > { %5232 = vrcp.f32 %v1373_v18  ;;  %vm1384_vm11 = vmor %vm1382_vm10, %vm1383_vm9  ;;  %v1403_v34 = vand.u32 2147483648, %v1373_v18  ;;  %v1401_v39 = vand.u32 2147483647, %v1373_v18  ;;  %vm1397_vm14 = vweird.f32 %v1373_v18 }
 0x579   : > { %v1379_v19 = vsub.f32 1.0, %v1378_v17 }
 0x57a   : > { %v1404_v45 = vor.u32 1.1754944e-38, %v1403_v34  ;;  %vm1402_vm0 = vcmp.eq.f32.partialorder %v1401_v39, 8.507059e+37 }
 0x57b   : > { %v1380_v21 = vmul.f32 %v5231_v16, %v1379_v19 }
 0x57d   : > { %v1381_v22 = vadd.f32 %v5231_v16, %v1380_v21 }
 0x57e   : > { %v5233_v23 = vpop.eup %5232 }
 0x57f   : > { %v1393_v25 = vmul.f32 %v5233_v23, %v1373_v18  ;;  %v1376_v27 = vpop.xlane.xlu2 %1375  ;;  %v1385_v28 = vsel %vm1384_vm11, %v5231_v16, %v1381_v22  ;;  %vm1398_vm13 = vweird.f32 %v5233_v23 }
 0x580   : > { %5234 = vrcp.f32 %v1376_v27  ;;  %v1390_v29 = vsel %vm1387_vm12, %v1389_v24, %v1385_v28  ;;  %vm1399_vm15 = vmor %vm1397_vm14, %vm1398_vm13  ;;  %v1418_v56 = vand.u32 2147483648, %v1376_v27  ;;  %v1416_v59 = vand.u32 2147483647, %v1376_v27 }
 0x581   : > { %v1394_v31 = vsub.f32 1.0, %v1393_v25  ;;  %v1391_v33 = vmul.f32 %v5225_v6, %v1390_v29  ;;  %vm1412_vm2 = vweird.f32 %v1376_v27 }
 0x582   : > { %v1468_v36 = vpop.permute.xlu0 %1467  ;;  %v1419_v61 = vor.u32 1.1754944e-38, %v1418_v56  ;;  %vm1417_vm5 = vcmp.eq.f32.partialorder %v1416_v59, 8.507059e+37 }
 0x583   : > { %v1395_v38 = vmul.f32 %v5233_v23, %v1394_v31  ;;  %4849 = vmatmul.msk.f32.vlgmr.msrb.gmra.mxu3 %vm1349_vm8, %v1391_v33  ;;  %4852 = vmatpush.xpose.msk.msra.mxu2 %vm1304_vm4, %v1468_v36 }
 0x585   : > { %v1396_v42 = vadd.f32 %v5233_v23, %v1395_v38 }
 0x586   : > { %v5235_v44 = vpop.eup %5234 }
 0x587   : > { %v1408_v46 = vmul.f32 %v5235_v44, %v1376_v27  ;;  %v1464_v47 = vpop.permute.xlu2 %1463  ;;  %v1400_v48 = vsel %vm1399_vm15, %v5233_v23, %v1396_v42  ;;  %vm1413_vm1 = vweird.f32 %v5235_v44 }
 0x588   : > { %v1405_v50 = vsel %vm1402_vm0, %v1404_v45, %v1400_v48  ;;  %vm1414_vm3 = vmor %vm1412_vm2, %vm1413_vm1 }
 0x589   : > { %v1409_v52 = vsub.f32 1.0, %v1408_v46  ;;  %v1406_v55 = vmul.f32 %v6436_v11, %v1405_v50 }
 0x58a   : > { %v1458_v3 = vpop.permute.xlu0 %1457 }
 0x58b   : > { %v1410_v57 = vmul.f32 %v5235_v44, %v1409_v52  ;;  %4850 = vmatmul.msk.f32.gmra.mxu3 %vm1349_vm8, %v1406_v55 }
 0x58d   : > { %v1411_v60 = vadd.f32 %v5235_v44, %v1410_v57 }
 0x58f   : > { %v1460_v62 = vpop.permute.xlu2 %1459  ;;  %v1466_v63 = vpop.permute.xlu1 %1465  ;;  %v1415_v0 = vsel %vm1414_vm3, %v5235_v44, %v1411_v60 }
 0x590   : > { %4853 = vmatpush.xpose.msk.msra.mxu2 %vm1304_vm4, %v1466_v63  ;;  %v1420_v1 = vsel %vm1417_vm5, %v1419_v61, %v1415_v0 }
 0x591   : > { %v1421_v2 = vmul.f32 %v6440_v13, %v1420_v1 }
 0x592   : > { %v1462_v8 = vpop.permute.xlu0 %1461 }
 0x593   : > { %4851 = vmatmul.msk.f32.gmra.mxu3 %vm1349_vm8, %v1421_v2 }
 0x594   : > { %4854 = vmatpush.xpose.msk.msra.mxu2 %vm1304_vm4, %v1464_v47 }
 0x597   : > { %v1705_v4 = vpop.permute.xlu2 %1704  ;;  %v1707_v5 = vpop.permute.xlu1 %1706  ;;  %4855 = vmatmul.msk.f32.vlgmr.msra.gmra.mxu2 %vm1304_vm4, %v1458_v3 }
 0x598   : > { %4867 = vmatpush.xpose.msk.msrb.mxu2 %vm1304_vm4, %v1707_v5 }
 0x59a   : > { %v1697_v11 = vpop.permute.xlu0 %1696 }
 0x59c   : > { %4868 = vmatpush.xpose.msk.msrb.mxu2 %vm1304_vm4, %v1705_v4 }
 0x59f   : > { %v1703_v6 = vpop.permute.xlu1 %1702  ;;  %4856 = vmatmul.msk.f32.gmra.mxu2 %vm1304_vm4, %v1460_v62  ;;  %v1699_v7 = vpop.permute.xlu2 %1698 }
 0x5a0   : > { %4869 = vmatpush.xpose.msk.msrb.mxu2 %vm1304_vm4, %v1703_v6 }
 0x5a2   : > { %v1701_v49 = vpop.permute.xlu0 %1700 }
 0x5a7   : > { %v1911_v9 = vpop.permute.xlu1 %1910  ;;  %4857 = vmatmul.msk.f32.gmra.mxu2 %vm1304_vm4, %v1462_v8  ;;  %v1909_v10 = vpop.permute.xlu2 %1908 }
 0x5a8   : > { %4879 = vmatpush.xpose.msk.msrb.mxu3 %vm1304_vm4, %v1911_v9 }
 0x5aa   : > { %v1901_v19 = vpop.permute.xlu0 %1900 }
 0x5ac   : > { %4880 = vmatpush.xpose.msk.msrb.mxu3 %vm1304_vm4, %v1909_v10 }
 0x5af   : > { %v1907_v12 = vpop.permute.xlu1 %1906  ;;  %4870 = vmatmul.msk.f32.vlgmr.msrb.gmra.mxu2 %vm1304_vm4, %v1697_v11  ;;  %v1903_v22 = vpop.permute.xlu2 %1902 }
 0x5b0   : > { %4881 = vmatpush.xpose.msk.msrb.mxu3 %vm1304_vm4, %v1907_v12 }
 0x5b7   : > { %4871 = vmatmul.msk.f32.gmra.mxu2 %vm1304_vm4, %v1699_v7  ;;  %v1905_v27 = vpop.permute.xlu1 %1904 }
 0x5bf   : > { %4872 = vmatmul.msk.f32.gmra.mxu2 %vm1304_vm4, %v1701_v49 }
 0x606   : > { %v1448_v13 = vpop.f32.mrf.mxu3 }
 0x607   : > { %4864 = vmatmul.msk.f32.vlgmr.msra.gmra.mxu3 %vm1304_vm4, %v1448_v13 }
 0x60e   : > { %v1451_v14 = vpop.f32.mrf.mxu3 }
 0x60f   : > { %4865 = vmatmul.msk.f32.gmra.mxu3 %vm1304_vm4, %v1451_v14 }
 0x616   : > { %v1454_v15 = vpop.f32.mrf.mxu3 }
 0x617   : > { %4866 = vmatmul.msk.f32.gmra.mxu3 %vm1304_vm4, %v1454_v15 }
 0x61a   : > { %v1498_v16 = vpop.f32.mrf.mxu2 }
 0x61b   : > { %v1499_v17 = vadd.f32 %v1498_v16, %v6427_v53 }
 0x61d   : > { %v1507_v18 = vsel %vm1349_vm8, %v1499_v17, -inf }
 0x61e   : > { %1508 = vmax.xlane.f32.xlu0 %v1507_v18 }
 0x61f   : > { %4882 = vmatmul.msk.f32.vlgmr.msrb.gmra.mxu3 %vm1304_vm4, %v1901_v19 }
 0x622   : > { %v1501_v20 = vpop.f32.mrf.mxu2 }
 0x623   : > { %v1502_v21 = vadd.f32 %v1501_v20, %v6427_v53 }
 0x625   : > { %v1510_v54 = vsel %vm1349_vm8, %v1502_v21, -inf }
 0x626   : > { %1511 = vmax.xlane.f32.xlu2 %v1510_v54 }
 0x627   : > { %4883 = vmatmul.msk.f32.gmra.mxu3 %vm1304_vm4, %v1903_v22 }
 0x62a   : > { %v1504_v23 = vpop.f32.mrf.mxu2 }
 0x62b   : > { %v1505_v24 = vadd.f32 %v1504_v23, %v6427_v53 }
 0x62d   : > { %v1513_v25 = vsel %vm1349_vm8, %v1505_v24, -inf }
 0x62e   : > { %1514 = vmax.xlane.f32.xlu0 %v1513_v25 }
 0x62f   : > { %4884 = vmatmul.msk.f32.gmra.mxu3 %vm1304_vm4, %v1905_v27 }
 0x632   : > { %v1737_v28 = vpop.f32.mrf.mxu2 }
 0x633   : > { %v1738_v29 = vadd.f32 %v1737_v28, %v6427_v53 }
 0x635   : > { %v1746_v30 = vsel %vm1349_vm8, %v1738_v29, -inf }
 0x636   : > { %1747 = vmax.xlane.f32.xlu1 %v1746_v30 }
 0x63a   : > { %v1740_v31 = vpop.f32.mrf.mxu2 }
 0x63b   : > { %v6512_v33 = vadd.f32 %v1740_v31, %v6427_v53 }
 0x63d   : > { %v1749_v34 = vsel %vm1349_vm8, %v6512_v33, -inf }
 0x63e   : > { %1750 = vmax.xlane.f32.xlu2 %v1749_v34 }
 0x642   : > { %5167 = vrot.lane.b32.xlu0 %v6401_v32, %s5983_s10  ;;  %v1743_v36 = vpop.f32.mrf.mxu2 }
 0x643   : > { %v1744_v37 = vadd.f32 %v1743_v36, %v6427_v53 }
 0x645   : > { %v1752_v38 = vsel %vm1349_vm8, %v1744_v37, -inf }
 0x646   : > { %1753 = vmax.xlane.f32.xlu1 %v1752_v38 }
 0x68a   : > { %v6520_v39 = vpop.f32.mrf.mxu3 }
 0x691   : > { %v1509_v41 = vpop.xlane.xlu0 %1508 }
 0x692   : > { %v1516_v42 = vsub.f32 %v1499_v17, %v1509_v41  ;;  %v6522_v43 = vpop.f32.mrf.mxu3 }
 0x694   : > { %v1519_v44 = vmul.f32 1.442695, %v1516_v42 }
 0x696   : > { %5236 = vpow2.f32 %v1519_v44 }
 0x699   : > { %v1512_v45 = vpop.xlane.xlu2 %1511 }
 0x69a   : > { %v1517_v46 = vsub.f32 %v1502_v21, %v1512_v45  ;;  %v6524_v47 = vpop.f32.mrf.mxu3 }
 0x69c   : > { %v6526_v48 = vpop.eup %5236  ;;  %v1521_v50 = vmul.f32 1.442695, %v1517_v46 }
 0x69d   : > { %v1525_v52 = vsel %vm1349_vm8, %v6526_v48, 0.0 }
 0x69e   : > { %5238 = vpow2.f32 %v1521_v50  ;;  %1526 = vadd.xlane.f32.xlu0 %v1525_v52 }
 0x6a1   : > { %v1515_v55 = vpop.xlane.xlu0 %1514 }
 0x6a2   : > { %v1518_v56 = vsub.f32 %v1505_v24, %v1515_v55  ;;  %v1941_v57 = vpop.f32.mrf.mxu3 }
 0x6a3   : > { %v1942_v6 = vadd.f32 %v1941_v57, %v6427_v53 }
 0x6a4   : > { %v6530_v59 = vpop.eup %5238  ;;  %v1523_v60 = vmul.f32 1.442695, %v1518_v56 }
 0x6a5   : > { %v1528_v61 = vsel %vm1349_vm8, %v6530_v59, 0.0  ;;  %v1950_v9 = vsel %vm1349_vm8, %v1942_v6, -inf }
 0x6a6   : > { %5240 = vpow2.f32 %v1523_v60  ;;  %1529 = vadd.xlane.f32.xlu2 %v1528_v61 }
 0x6a9   : > { %v1748_v62 = vpop.xlane.xlu1 %1747 }
 0x6aa   : > { %v1944_v63 = vpop.f32.mrf.mxu3  ;;  %v1755_v2 = vsub.f32 %v1738_v29, %v1748_v62 }
 0x6ab   : > { %v1945_v0 = vadd.f32 %v1944_v63, %v6427_v53 }
 0x6ac   : > { %v6535_v1 = vpop.eup %5240  ;;  %v1758_v5 = vmul.f32 1.442695, %v1755_v2 }
 0x6ad   : > { %v1953_v3 = vsel %vm1349_vm8, %v1945_v0, -inf  ;;  %v1531_v4 = vsel %vm1349_vm8, %v6535_v1, 0.0 }
 0x6ae   : > { %1954 = vmax.xlane.f32.xlu0 %v1953_v3  ;;  %1532 = vadd.xlane.f32.xlu2 %v1531_v4  ;;  %5242 = vpow2.f32 %v1758_v5 }
 0x6b1   : > { %v1751_v20 = vpop.xlane.xlu2 %1750 }
 0x6b2   : > { %v1947_v17 = vpop.f32.mrf.mxu3  ;;  %v1756_v21 = vsub.f32 %v6512_v33, %v1751_v20 }
 0x6b3   : > { %v1948_v18 = vadd.f32 %v1947_v17, %v6427_v53 }
 0x6b4   : > { %v5168_v7 = vpop.permute.xlu0 %5167  ;;  %v6542_v12 = vpop.eup %5242  ;;  %v1760_v54 = vmul.f32 1.442695, %v1756_v21 }
 0x6b5   : > { %v5169_v8 = vunpack.i.l.bf16 %v5168_v7  ;;  %v5170_v10 = vunpack.i.h.bf16 %v5168_v7  ;;  %v1764_v14 = vsel %vm1349_vm8, %v6542_v12, 0.0  ;;  %v1956_v19 = vsel %vm1349_vm8, %v1948_v18, -inf }
 0x6b6   : > { %1951 = vmax.xlane.f32.xlu2 %v1950_v9 }
 0x6b7   : > { %1613 = vmatpush.msra.mxu1 %v5169_v8 }
 0x6b9   : > { %v1754_v11 = vpop.xlane.xlu1 %1753  ;;  %1614 = vmatpush.msra.mxu1 %v5170_v10 }
 0x6ba   : > { %v1757_v49 = vsub.f32 %v1744_v37, %v1754_v11 }
 0x6bc   : > { %v1762_v13 = vmul.f32 1.442695, %v1757_v49 }
 0x6be   : > { %5244 = vpow2.f32 %v1762_v13  ;;  %1765 = vadd.xlane.f32.xlu2 %v1764_v14 }
 0x6bf   : > { %5246 = vpow2.f32 %v1760_v54 }
 0x6c2   : > { %5172 = vrot.lane.b32.xlu0 %v6401_v32, %s5984_s12 }
 0x6c4   : > { %v6548_v15 = vpop.eup %5244 }
 0x6c5   : > { %v1770_v16 = vsel %vm1349_vm8, %v6548_v15, 0.0  ;;  %v6561_v22 = vpop.eup %5246 }
 0x6c6   : > { %1771 = vadd.xlane.f32.xlu1 %v1770_v16  ;;  %v1767_v23 = vsel %vm1349_vm8, %v6561_v22, 0.0 }
 0x6ca   : > { %1818 = vrot.lane.b32.xlu0 %v6403_v58, %s5984_s12 }
 0x6ce   : > { %1957 = vmax.xlane.f32.xlu1 %v1956_v19 }
 0x6d6   : > { %5177 = vrot.lane.b32.xlu2 %v6401_v32, %s5985_s30 }
 0x6e7   : > { %1582 = vrot.lane.b32.xlu1 %v6403_v58, %s5983_s10 }
 0x711   : > { %1768 = vadd.xlane.f32.xlu1 %v1767_v23  ;;  %v6567_v25 = vpop.xlane.xlu0 %1526 }
 0x712   : > { %v1545_v54 = vand.u32 2147483648, %v6567_v25  ;;  %vm1539_vm12 = vweird.f32 %v6567_v25  ;;  %v1543_v23 = vand.u32 2147483647, %v6567_v25 }
 0x714   : > { %vm1544_vm14 = vcmp.eq.f32.partialorder %v1543_v23, 8.507059e+37 }
 0x719   : > { %v6565_v24 = vpop.xlane.xlu2 %1529 }
 0x71a   : > { %vm1554_vm0 = vweird.f32 %v6565_v24 }
 0x721   : > { %v6569_v27 = vpop.xlane.xlu2 %1532  ;;  %v1955_v32 = vpop.xlane.xlu0 %1954 }
 0x722   : > { %v1960_v30 = vsub.f32 %v1945_v0, %v1955_v32  ;;  %vm1569_vm5 = vweird.f32 %v6569_v27 }
 0x724   : > { %v1964_v33 = vmul.f32 1.442695, %v1960_v30 }
 0x729   : > { %v1952_v28 = vpop.xlane.xlu2 %1951 }
 0x72a   : > { %v1959_v29 = vsub.f32 %v1942_v6, %v1952_v28 }
 0x72c   : > { %v1962_v31 = vmul.f32 1.442695, %v1959_v29  ;;  %v1546_v29 = vor.u32 1.1754944e-38, %v1545_v54 }
 0x72e   : > { %5248 = vpow2.f32 %v1962_v31 }
 0x72f   : > { %5250 = vpow2.f32 %v1964_v33 }
 0x730   : > { %5252 = vrcp.f32 %v6567_v25 }
 0x731   : > { %v6571_v34 = vpop.xlane.xlu2 %1765 }
 0x734   : > { %v6573_v36 = vpop.eup %5248  ;;  %v6575_v37 = vpop.permute.xlu0 %5172 }
 0x735   : > { %v5174_v38 = vunpack.i.l.bf16 %v6575_v37  ;;  %v1968_v41 = vsel %vm1349_vm8, %v6573_v36, 0.0  ;;  %v5175_v42 = vunpack.i.h.bf16 %v6575_v37  ;;  %v6586_v46 = vpop.eup %5250 }
 0x736   : > { %1969 = vadd.xlane.f32.xlu2 %v1968_v41  ;;  %v1971_v55 = vsel %vm1349_vm8, %v6586_v46, 0.0  ;;  %v5253_v57 = vpop.eup %5252 }
 0x737   : > { %4970 = vmatpush.msra.mxu2 %v5174_v38  ;;  %v1535_v0 = vmul.f32 %v5253_v57, %v6567_v25  ;;  %vm1540_vm11 = vweird.f32 %v5253_v57 }
 0x738   : > { %vm1541_vm13 = vmor %vm1539_vm12, %vm1540_vm11 }
 0x739   : > { %v1772_v44 = vpop.xlane.xlu1 %1771  ;;  %v5178_v45 = vpop.permute.xlu2 %5177  ;;  %4971 = vmatpush.msra.mxu2 %v5175_v42  ;;  %v1536_v7 = vsub.f32 1.0, %v1535_v0 }
 0x73a   : > { %5254 = vrcp.f32 %v1772_v44  ;;  %v5179_v50 = vunpack.i.l.bf16 %v5178_v45  ;;  %v5180_v56 = vunpack.i.h.bf16 %v5178_v45  ;;  %v1814_v3 = vand.u32 2147483648, %v1772_v44 }
 0x73b   : > { %5256 = vrcp.f32 %v6565_v24  ;;  %v1812_v6 = vand.u32 2147483647, %v1772_v44  ;;  %vm1808_vm7 = vweird.f32 %v1772_v44  ;;  %v1537_v13 = vmul.f32 %v5253_v57, %v1536_v7 }
 0x73c   : > { %v6588_v52 = vpop.permute.xlu0 %1818  ;;  %v1815_v10 = vor.u32 1.1754944e-38, %v1814_v3  ;;  %v1784_v3 = vand.u32 2147483648, %v6571_v34 }
 0x73d   : > { %4972 = vmatpush.msra.mxu2 %v6588_v52  ;;  %vm1813_vm10 = vcmp.eq.f32.partialorder %v1812_v6, 8.507059e+37  ;;  %v1538_v19 = vadd.f32 %v5253_v57, %v1537_v13 }
 0x73e   : > { %1972 = vadd.xlane.f32.xlu2 %v1971_v55 }
 0x73f   : > { %2053 = vmatpush.msrb.mxu2 %v5179_v50  ;;  %v1558_v50 = vand.u32 2147483647, %v6565_v24 }
 0x740   : > { %v5255_v60 = vpop.eup %5254 }
 0x741   : > { %2054 = vmatpush.msrb.mxu2 %v5180_v56  ;;  %v1804_v61 = vmul.f32 %v5255_v60, %v1772_v44  ;;  %v1958_v62 = vpop.xlane.xlu1 %1957  ;;  %vm1809_vm6 = vweird.f32 %v5255_v60  ;;  %v5257_v9 = vpop.eup %5256  ;;  %v1560_v44 = vand.u32 2147483648, %v6565_v24  ;;  %vm1559_vm2 = vcmp.eq.f32.partialorder %v1558_v50, 8.507059e+37 }
 0x742   : > { %v1961_v63 = vsub.f32 %v1948_v18, %v1958_v62  ;;  %vm1810_vm9 = vmor %vm1808_vm7, %vm1809_vm6  ;;  %v1550_v14 = vmul.f32 %v5257_v9, %v6565_v24  ;;  %vm1555_vm15 = vweird.f32 %v5257_v9  ;;  %v1575_v24 = vand.u32 2147483648, %v6569_v27 }
 0x743   : > { %v1805_v2 = vsub.f32 1.0, %v1804_v61  ;;  %vm1556_vm1 = vmor %vm1554_vm0, %vm1555_vm15 }
 0x744   : > { %v1966_v4 = vmul.f32 1.442695, %v1961_v63  ;;  %v1551_v20 = vsub.f32 1.0, %v1550_v14  ;;  %v1573_v63 = vand.u32 2147483647, %v6569_v27 }
 0x745   : > { %v1806_v5 = vmul.f32 %v5255_v60, %v1805_v2 }
 0x746   : > { %5258 = vpow2.f32 %v1966_v4  ;;  %v1552_v32 = vmul.f32 %v5257_v9, %v1551_v20  ;;  %vm1574_vm7 = vcmp.eq.f32.partialorder %v1573_v63, 8.507059e+37  ;;  %v1785_v4 = vor.u32 1.1754944e-38, %v1784_v3  ;;  %v1208_v20 = vld [vmem:[#allocation14 + $0x38] sm:$0xff]  ;;  %v1210_v3 = vld [vmem:[#allocation14 + $0x48] sm:$0xff] }
 0x747   : > { %v1807_v8 = vadd.f32 %v5255_v60, %v1806_v5  ;;  %5260 = vrcp.f32 %v6569_v27  ;;  %1647 = vmatpush.msra.mxu0 %v1208_v20 }
 0x748   : > { %5262 = vrcp.f32 %v6571_v34  ;;  %v1553_v33 = vadd.f32 %v5257_v9, %v1552_v32 }
 0x749   : > { %v1811_v11 = vsel %vm1810_vm9, %v5255_v60, %v1807_v8 }
 0x74a   : > { %v1816_v49 = vsel %vm1813_vm10, %v1815_v10, %v1811_v11  ;;  %vm1778_vm10 = vweird.f32 %v6571_v34 }
 0x74b   : > { %v1817_v16 = vmul.f32 %v6548_v15, %v1816_v49  ;;  %v1542_v15 = vsel %vm1541_vm13, %v5253_v57, %v1538_v19  ;;  %v1561_v57 = vor.u32 1.1754944e-38, %v1560_v44 }
 0x74c   : > { %v6598_v17 = vpop.eup %5258  ;;  %v1547_v30 = vsel %vm1544_vm14, %v1546_v29, %v1542_v15 }
 0x74d   : > { %4875 = vmatmul.msk.f32.vlgmr.msra.gmra.mxu2 %vm1349_vm8, %v1817_v16  ;;  %v1974_v18 = vsel %vm1349_vm8, %v6598_v17, 0.0  ;;  %v5261_v21 = vpop.eup %5260  ;;  %v1548_v45 = vmul.f32 %v6526_v48, %v1547_v30  ;;  %v1206_v30 = vld [vmem:[#allocation14 + $0x28] sm:$0xff] }
 0x74e   : > { %1975 = vadd.xlane.f32.xlu0 %v1974_v18  ;;  %v1565_v28 = vmul.f32 %v5261_v21, %v6569_v27  ;;  %v5263_v41 = vpop.eup %5262  ;;  %vm1570_vm3 = vweird.f32 %v5261_v21 }
 0x74f   : > { %v1774_v56 = vmul.f32 %v5263_v41, %v6571_v34  ;;  %vm1571_vm6 = vmor %vm1569_vm5, %vm1570_vm3  ;;  %vm1779_vm9 = vweird.f32 %v5263_v41 }
 0x750   : > { %v1566_v31 = vsub.f32 1.0, %v1565_v28  ;;  %vm1780_vm11 = vmor %vm1778_vm10, %vm1779_vm9 }
 0x751   : > { %v1775_v48 = vsub.f32 1.0, %v1774_v56 }
 0x752   : > { %v1567_v55 = vmul.f32 %v5261_v21, %v1566_v31 }
 0x754   : > { %v1568_v61 = vadd.f32 %v5261_v21, %v1567_v55 }
 0x756   : > { %2022 = vrot.lane.b32.xlu2 %v6403_v58, %s5985_s30  ;;  %v1557_v58 = vsel %vm1556_vm1, %v5257_v9, %v1553_v33  ;;  %v1572_v37 = vsel %vm1571_vm6, %v5261_v21, %v1568_v61  ;;  %v1207_v21 = vld [vmem:[#allocation14 + $0x30] sm:$0xff] }
 0x757   : > { %v1562_v60 = vsel %vm1559_vm2, %v1561_v57, %v1557_v58  ;;  %1648 = vmatpush.msra.mxu0 %v1207_v21 }
 0x758   : > { %v1563_v62 = vmul.f32 %v6530_v59, %v1562_v60 }
 0x759   : > { %v1583_v25 = vpop.permute.xlu1 %1582  ;;  %1649 = vmatpush.msra.mxu0 %v1206_v30  ;;  %v5200_v30 = vld [vmem:[#allocation15] ss:$0 sm:$0xff] }
 0x75a   : > { %1615 = vmatpush.msra.mxu1 %v1583_v25 }
 0x75b   : > { %4858 = vmatmul.msk.f32.vlgmr.msra.gmra.mxu1 %vm1349_vm8, %v1548_v45 }
 0x75c   : > { %1849 = vmatpush.msrb.mxu1 %v5174_v38  ;;  %v1776_v38 = vmul.f32 %v5263_v41, %v1775_v48 }
 0x75e   : > { %1850 = vmatpush.msrb.mxu1 %v5175_v42  ;;  %v1576_v42 = vor.u32 1.1754944e-38, %v1575_v24  ;;  %v1777_v2 = vadd.f32 %v5263_v41, %v1776_v38 }
 0x760   : > { %1851 = vmatpush.msrb.mxu1 %v6588_v52  ;;  %v1577_v0 = vsel %vm1574_vm7, %v1576_v42, %v1572_v37  ;;  %v1782_v52 = vand.u32 2147483647, %v6571_v34  ;;  %v1781_v27 = vsel %vm1780_vm11, %v5263_v41, %v1777_v2  ;;  %v1205_v41 = vld [vmem:[#allocation14 + $0x20] sm:$0xff]  ;;  %v1212_v42 = vld [vmem:[#allocation14 + $0x58] sm:$0xff] }
 0x761   : > { %v1578_v59 = vmul.f32 %v6535_v1, %v1577_v0  ;;  %1650 = vmatpush.msra.mxu0 %v1205_v41  ;;  %v1211_v0 = vld [vmem:[#allocation14 + $0x50] sm:$0xff] }
 0x762   : > { %vm1783_vm12 = vcmp.eq.f32.partialorder %v1782_v52, 8.507059e+37 }
 0x763   : > { %4859 = vmatmul.msk.f32.gmra.mxu1 %vm1349_vm8, %v1563_v62  ;;  %v1786_v5 = vsel %vm1783_vm12, %v1785_v4, %v1781_v27  ;;  %1883 = vmatpush.msrb.mxu0 %v1212_v42 }
 0x764   : > { %v1787_v6 = vmul.f32 %v6542_v12, %v1786_v5 }
 0x765   : > { %1884 = vmatpush.msrb.mxu0 %v1211_v0 }
 0x767   : > { %1885 = vmatpush.msrb.mxu0 %v1210_v3 }
 0x76b   : > { %4860 = vmatmul.msk.f32.gmra.mxu1 %vm1349_vm8, %v1578_v59 }
 0x773   : > { %4873 = vmatmul.msk.f32.vlgmr.msrb.gmra.mxu1 %vm1349_vm8, %v1787_v6 }
 0x784   : > { %v1769_v7 = vpop.xlane.xlu1 %1768 }
 0x785   : > { %5264 = vrcp.f32 %v1769_v7  ;;  %v1799_v11 = vand.u32 2147483648, %v1769_v7  ;;  %v1797_v1 = vand.u32 2147483647, %v1769_v7  ;;  %vm1793_vm14 = vweird.f32 %v1769_v7 }
 0x787   : > { %v1800_v13 = vor.u32 1.1754944e-38, %v1799_v11  ;;  %vm1798_vm0 = vcmp.eq.f32.partialorder %v1797_v1, 8.507059e+37  ;;  %v1216_v1 = vld [vmem:[#allocation14 + $0x78] sm:$0xff] }
 0x788   : > { %2087 = vmatpush.msra.mxu1 %v1216_v1  ;;  %v2232_v1 = vld [vmem:[#allocation20 + $0x160] sm:$0xff] }
 0x78b   : > { %v5265_v8 = vpop.eup %5264 }
 0x78c   : > { %v1789_v9 = vmul.f32 %v5265_v8, %v1769_v7  ;;  %vm1794_vm13 = vweird.f32 %v5265_v8 }
 0x78d   : > { %vm1795_vm15 = vmor %vm1793_vm14, %vm1794_vm13 }
 0x78e   : > { %v1790_v10 = vsub.f32 1.0, %v1789_v9 }
 0x790   : > { %v1791_v34 = vmul.f32 %v5265_v8, %v1790_v10 }
 0x792   : > { %v1792_v49 = vadd.f32 %v5265_v8, %v1791_v34 }
 0x794   : > { %v1796_v14 = vsel %vm1795_vm15, %v5265_v8, %v1792_v49  ;;  %v1215_v49 = vld [vmem:[#allocation14 + $0x70] sm:$0xff] }
 0x795   : > { %v1801_v16 = vsel %vm1798_vm0, %v1800_v13, %v1796_v14  ;;  %v1214_v13 = vld [vmem:[#allocation14 + $0x68] sm:$0xff]  ;;  %2088 = vmatpush.msra.mxu1 %v1215_v49 }
 0x796   : > { %v1802_v12 = vmul.f32 %v6561_v22, %v1801_v16  ;;  %v1213_v16 = vld [vmem:[#allocation14 + $0x60] sm:$0xff]  ;;  %v2233_v49 = vld [vmem:[#allocation20 + $0x168] sm:$0xff] }
 0x797   : > { %2089 = vmatpush.msra.mxu1 %v1214_v13  ;;  %v2234_v13 = vld [vmem:[#allocation20 + $0x170] sm:$0xff] }
 0x798   : > { %4874 = vmatmul.msk.f32.gmra.mxu1 %vm1349_vm8, %v1802_v12 }
 0x799   : > { %2090 = vmatpush.msra.mxu1 %v1213_v16  ;;  %v2229_v16 = vld [vmem:[#allocation20 + $0x148] sm:$0xff] }
 0x7a9   : > { %v1970_v18 = vpop.xlane.xlu2 %1969 }
 0x7aa   : > { %5266 = vrcp.f32 %v1970_v18  ;;  %v1988_v32 = vand.u32 2147483648, %v1970_v18  ;;  %v1986_v29 = vand.u32 2147483647, %v1970_v18  ;;  %vm1982_vm2 = vweird.f32 %v1970_v18 }
 0x7ac   : > { %v1989_v33 = vor.u32 1.1754944e-38, %v1988_v32  ;;  %vm1987_vm5 = vcmp.eq.f32.partialorder %v1986_v29, 8.507059e+37 }
 0x7b0   : > { %v5267_v19 = vpop.eup %5266 }
 0x7b1   : > { %v1978_v54 = vmul.f32 %v5267_v19, %v1970_v18  ;;  %v1973_v23 = vpop.xlane.xlu2 %1972  ;;  %vm1983_vm1 = vweird.f32 %v5267_v19 }
 0x7b2   : > { %5268 = vrcp.f32 %v1973_v23  ;;  %vm1984_vm3 = vmor %vm1982_vm2, %vm1983_vm1  ;;  %v2003_v58 = vand.u32 2147483648, %v1973_v23  ;;  %v2001_v60 = vand.u32 2147483647, %v1973_v23  ;;  %vm1997_vm7 = vweird.f32 %v1973_v23 }
 0x7b3   : > { %v1979_v15 = vsub.f32 1.0, %v1978_v54 }
 0x7b4   : > { %v2004_v61 = vor.u32 1.1754944e-38, %v2003_v58  ;;  %vm2002_vm10 = vcmp.eq.f32.partialorder %v2001_v60, 8.507059e+37 }
 0x7b5   : > { %v1980_v28 = vmul.f32 %v5267_v19, %v1979_v15 }
 0x7b7   : > { %v1981_v22 = vadd.f32 %v5267_v19, %v1980_v28 }
 0x7b8   : > { %v5269_v31 = vpop.eup %5268 }
 0x7b9   : > { %v1985_v44 = vsel %vm1984_vm3, %v5267_v19, %v1981_v22  ;;  %v1993_v25 = vmul.f32 %v5269_v31, %v1973_v23  ;;  %v2023_v45 = vpop.permute.xlu2 %2022  ;;  %vm1998_vm6 = vweird.f32 %v5269_v31 }
 0x7ba   : > { %v1990_v50 = vsel %vm1987_vm5, %v1989_v33, %v1985_v44  ;;  %2055 = vmatpush.msrb.mxu2 %v2023_v45  ;;  %vm1999_vm9 = vmor %vm1997_vm7, %vm1998_vm6 }
 0x7bb   : > { %v1994_v55 = vsub.f32 1.0, %v1993_v25  ;;  %v1991_v56 = vmul.f32 %v6573_v36, %v1990_v50 }
 0x7bd   : > { %v1995_v57 = vmul.f32 %v5269_v31, %v1994_v55  ;;  %4885 = vmatmul.msk.f32.vlgmr.msrb.gmra.mxu2 %vm1349_vm8, %v1991_v56 }
 0x7bf   : > { %v1996_v48 = vadd.f32 %v5269_v31, %v1995_v57 }
 0x7c1   : > { %v1976_v24 = vpop.xlane.xlu0 %1975  ;;  %v2000_v62 = vsel %vm1999_vm9, %v5269_v31, %v1996_v48  ;;  %v2248_v48 = vld [vmem:[#allocation20 + $0x1e0] sm:$0xff] }
 0x7c2   : > { %5270 = vrcp.f32 %v1976_v24  ;;  %v2005_v63 = vsel %vm2002_vm10, %v2004_v61, %v2000_v62  ;;  %v2018_v52 = vand.u32 2147483648, %v1976_v24  ;;  %v2016_v27 = vand.u32 2147483647, %v1976_v24  ;;  %v2249_v61 = vld [vmem:[#allocation20 + $0x1e8] sm:$0xff]  ;;  %v2251_v62 = vld [vmem:[#allocation20 + $0x1f8] sm:$0xff] }
 0x7c3   : > { %v2006_v38 = vmul.f32 %v6586_v46, %v2005_v63  ;;  %vm2012_vm12 = vweird.f32 %v1976_v24  ;;  %v1209_v46 = vld [vmem:[#allocation14 + $0x40] sm:$0xff]  ;;  %2288 = vmatpush.msra.mxu3 %v2249_v61  ;;  %2340 = vmatpush.msrb.mxu1 %v2251_v62 }
 0x7c4   : > { %v2019_v5 = vor.u32 1.1754944e-38, %v2018_v52  ;;  %vm2017_vm14 = vcmp.eq.f32.partialorder %v2016_v27, 8.507059e+37  ;;  %1886 = vmatpush.msrb.mxu0 %v1209_v46  ;;  %v2244_v63 = vld [vmem:[#allocation20 + $0x1c0] sm:$0xff]  ;;  %v2203_v62 = vld [vmem:[#allocation20 + $0x78] sm:$0xff] }
 0x7c5   : > { %4886 = vmatmul.msk.f32.gmra.mxu2 %vm1349_vm8, %v2006_v38  ;;  %v2245_v38 = vld [vmem:[#allocation20 + $0x1c8] sm:$0xff]  ;;  %v2240_v46 = vld [vmem:[#allocation20 + $0x1a0] sm:$0xff] }
 0x7c6   : > { %2289 = vmatpush.msra.mxu3 %v2245_v38  ;;  %v2200_v61 = vld [vmem:[#allocation20 + $0x60] sm:$0xff]  ;;  %v2197_v38 = vld [vmem:[#allocation20 + $0x48] sm:$0xff] }
 0x7c8   : > { %v5271_v36 = vpop.eup %5270 }
 0x7c9   : > { %v2008_v37 = vmul.f32 %v5271_v36, %v1976_v24  ;;  %vm2013_vm11 = vweird.f32 %v5271_v36  ;;  %v2250_v24 = vld [vmem:[#allocation20 + $0x1f0] sm:$0xff] }
 0x7ca   : > { %vm2014_vm13 = vmor %vm2012_vm12, %vm2013_vm11  ;;  %2314 = vmatpush.msra.mxu2 %v2250_v24  ;;  %v2201_v24 = vld [vmem:[#allocation20 + $0x68] sm:$0xff] }
 0x7cb   : > { %v2009_v2 = vsub.f32 1.0, %v2008_v37  ;;  %v2247_v37 = vld [vmem:[#allocation20 + $0x1d8] sm:$0xff] }
 0x7cc   : > { %2341 = vmatpush.msrb.mxu1 %v2247_v37  ;;  %v2192_v37 = vld [vmem:[#allocation20 + $0x20] sm:$0xff] }
 0x7cd   : > { %v2010_v59 = vmul.f32 %v5271_v36, %v2009_v2 }
 0x7cf   : > { %v2011_v4 = vadd.f32 %v5271_v36, %v2010_v59 }
 0x7d0   : > { %v1859_v14 = vpop.f32.mrf.mxu2 }
 0x7d1   : > { %v2015_v6 = vsel %vm2014_vm13, %v5271_v36, %v2011_v4  ;;  %v2246_v36 = vld [vmem:[#allocation20 + $0x1d0] sm:$0xff] }
 0x7d2   : > { %v2020_v7 = vsel %vm2017_vm14, %v2019_v5, %v2015_v6  ;;  %2315 = vmatpush.msra.mxu2 %v2246_v36  ;;  %v2241_v6 = vld [vmem:[#allocation20 + $0x1a8] sm:$0xff]  ;;  %v2199_v36 = vld [vmem:[#allocation20 + $0x58] sm:$0xff] }
 0x7d3   : > { %v2021_v8 = vmul.f32 %v6598_v17, %v2020_v7  ;;  %v2242_v7 = vld [vmem:[#allocation20 + $0x1b0] sm:$0xff]  ;;  %2290 = vmatpush.msra.mxu3 %v2241_v6 }
 0x7d4   : > { %2316 = vmatpush.msra.mxu2 %v2242_v7 }
 0x7d5   : > { %4887 = vmatmul.msk.f32.gmra.mxu2 %vm1349_vm8, %v2021_v8  ;;  %v2243_v8 = vld [vmem:[#allocation20 + $0x1b8] sm:$0xff] }
 0x7d6   : > { %2342 = vmatpush.msrb.mxu1 %v2243_v8 }
 0x7d8   : > { %v1617_v9 = vpop.f32.mrf.mxu1 }
 0x7d9   : > { %4861 = vmatmul.msk.f32.vlgmr.msra.gmra.mxu0 %vm1304_vm4, %v1617_v9  ;;  %v2236_v9 = vld [vmem:[#allocation20 + $0x180] sm:$0xff] }
 0x7da   : > { %2262 = vmatpush.msra.mxu0 %v2248_v48  ;;  %v2207_v48 = vld [vmem:[#allocation20 + $0x98] sm:$0xff] }
 0x7dc   : > { %2263 = vmatpush.msra.mxu0 %v2244_v63  ;;  %v2196_v63 = vld [vmem:[#allocation20 + $0x40] sm:$0xff] }
 0x7de   : > { %2264 = vmatpush.msra.mxu0 %v2240_v46 }
 0x7e0   : > { %v1620_v10 = vpop.f32.mrf.mxu1  ;;  %2265 = vmatpush.msra.mxu0 %v2236_v9 }
 0x7e1   : > { %4862 = vmatmul.msk.f32.gmra.mxu0 %vm1304_vm4, %v1620_v10  ;;  %v2237_v10 = vld [vmem:[#allocation20 + $0x188] sm:$0xff] }
 0x7e2   : > { %2291 = vmatpush.msra.mxu3 %v2237_v10  ;;  %2266 = vmatpush.msra.mxu0 %v2232_v1 }
 0x7e4   : > { %2292 = vmatpush.msra.mxu3 %v2233_v49 }
 0x7e6   : > { %2293 = vmatpush.msra.mxu3 %v2229_v16 }
 0x7e8   : > { %v1623_v11 = vpop.f32.mrf.mxu1 }
 0x7e9   : > { %4863 = vmatmul.msk.f32.gmra.mxu0 %vm1304_vm4, %v1623_v11  ;;  %v2238_v11 = vld [vmem:[#allocation20 + $0x190] sm:$0xff] }
 0x7ea   : > { %2317 = vmatpush.msra.mxu2 %v2238_v11 }
 0x7ec   : > { %2318 = vmatpush.msra.mxu2 %v2234_v13 }
 0x7f0   : > { %v1853_v34 = vpop.f32.mrf.mxu1 }
 0x7f1   : > { %4876 = vmatmul.msk.f32.vlgmr.msrb.gmra.mxu0 %vm1304_vm4, %v1853_v34  ;;  %v2239_v34 = vld [vmem:[#allocation20 + $0x198] sm:$0xff] }
 0x7f2   : > { %2343 = vmatpush.msrb.mxu1 %v2239_v34 }
 0x815   : > { %v1856_v17 = vpop.f32.mrf.mxu1 }
 0x816   : > { %4877 = vmatmul.msk.f32.gmra.mxu0 %vm1304_vm4, %v1856_v17  ;;  %v2235_v17 = vld [vmem:[#allocation20 + $0x178] sm:$0xff] }
 0x817   : > { %2344 = vmatpush.msrb.mxu1 %v2235_v17 }
 0x81e   : > { %4878 = vmatmul.msk.f32.gmra.mxu0 %vm1304_vm4, %v1859_v14  ;;  %v2228_v14 = vld [vmem:[#allocation20 + $0x140] sm:$0xff] }
 0x81f   : > { %2267 = vmatpush.msra.mxu0 %v2228_v14 }
 0x840   : > { %v2057_v12 = vpop.f32.mrf.mxu2 }
 0x841   : > { %4888 = vmatmul.msk.f32.vlgmr.msra.gmra.mxu1 %vm1304_vm4, %v2057_v12  ;;  %v2230_v12 = vld [vmem:[#allocation20 + $0x150] sm:$0xff] }
 0x842   : > { %2319 = vmatpush.msra.mxu2 %v2230_v12  ;;  %v5201_v12 = vld [vmem:[#allocation17] ss:$0 sm:$0xff] }
 0x848   : > { %v2060_v18 = vpop.f32.mrf.mxu2 }
 0x849   : > { %4889 = vmatmul.msk.f32.gmra.mxu1 %vm1304_vm4, %v2060_v18  ;;  %v2231_v18 = vld [vmem:[#allocation20 + $0x158] sm:$0xff] }
 0x84a   : > { %2345 = vmatpush.msrb.mxu1 %v2231_v18 }
 0x856   : > { %v1652_v20 = vpop.f32.mrf.mxu0 }
 0x857   : > { %v1688_v15 = vadd.f32 %v6520_v39, %v1652_v20  ;;  %v2225_v20 = vld [vmem:[#allocation20 + $0x128] sm:$0xff] }
 0x858   : > { %v2063_v19 = vpop.f32.mrf.mxu2  ;;  %2294 = vmatpush.msra.mxu3 %v2225_v20 }
 0x859   : > { %4890 = vmatmul.msk.f32.gmra.mxu1 %vm1304_vm4, %v2063_v19  ;;  %v2224_v19 = vld [vmem:[#allocation20 + $0x120] sm:$0xff] }
 0x85a   : > { %2268 = vmatpush.msra.mxu0 %v2224_v19 }
 0x85e   : > { %v1655_v21 = vpop.f32.mrf.mxu0 }
 0x85f   : > { %v1691_v33 = vadd.f32 %v6522_v43, %v1655_v21  ;;  %v2226_v21 = vld [vmem:[#allocation20 + $0x130] sm:$0xff] }
 0x860   : > { %2320 = vmatpush.msra.mxu2 %v2226_v21  ;;  %v5202_v21 = vld [vmem:[#allocation18] ss:$0 sm:$0xff] }
 0x866   : > { %v1658_v54 = vpop.f32.mrf.mxu0 }
 0x867   : > { %v1694_v56 = vadd.f32 %v6524_v47, %v1658_v54  ;;  %v2227_v54 = vld [vmem:[#allocation20 + $0x138] sm:$0xff] }
 0x868   : > { %2346 = vmatpush.msrb.mxu1 %v2227_v54 }
 0x86e   : > { %v1888_v23 = vpop.f32.mrf.mxu0 }
 0x86f   : > { %v1897_v32 = vadd.f32 %v1888_v23, %v1688_v15  ;;  %v2220_v23 = vld [vmem:[#allocation20 + $0x100] sm:$0xff]  ;;  %v2221_v15 = vld [vmem:[#allocation20 + $0x108] sm:$0xff] }
 0x870   : > { %2269 = vmatpush.msra.mxu0 %v2220_v23  ;;  %2295 = vmatpush.msra.mxu3 %v2221_v15 }
 0x893   : > { %v1891_v31 = vpop.f32.mrf.mxu0 }
 0x894   : > { %v1898_v44 = vadd.f32 %v1891_v31, %v1691_v33  ;;  %v2219_v31 = vld [vmem:[#allocation20 + $0xf8] sm:$0xff]  ;;  %v2212_v33 = vld [vmem:[#allocation20 + $0xc0] sm:$0xff] }
 0x89b   : > { %v1894_v39 = vpop.f32.mrf.mxu0 }
 0x8be   : > { %v2092_v28 = vpop.f32.mrf.mxu1 }
 0x8bf   : > { %v2101_v29 = vadd.f32 %v2092_v28, %v1897_v32  ;;  %v2222_v32 = vld [vmem:[#allocation20 + $0x110] sm:$0xff]  ;;  %v2223_v28 = vld [vmem:[#allocation20 + $0x118] sm:$0xff] }
 0x8c0   : > { %2321 = vmatpush.msra.mxu2 %v2222_v32  ;;  %2347 = vmatpush.msrb.mxu1 %v2223_v28 }
 0x8c1   : > { %v2104_v22 = vadd.f32 %v2101_v29, %v6359_v26  ;;  %v1899_v26 = vadd.f32 %v1894_v39, %v1694_v56  ;;  %v2216_v29 = vld [vmem:[#allocation20 + $0xe0] sm:$0xff]  ;;  %v2209_v39 = vld [vmem:[#allocation20 + $0xa8] sm:$0xff]  ;;  %v2210_v56 = vld [vmem:[#allocation20 + $0xb0] sm:$0xff] }
 0x8c2   : > { %2270 = vmatpush.msra.mxu0 %v2216_v29  ;;  %2348 = vmatpush.msrb.mxu1 %v2219_v31 }
 0x8c3   : > { %v6653_v41 = vadd.f32 %v5200_v30, %v2104_v22  ;;  %v2218_v22 = vld [vmem:[#allocation20 + $0xf0] sm:$0xff] }
 0x8c4   : > { %2322 = vmatpush.msra.mxu2 %v2218_v22  ;;  %2271 = vmatpush.msra.mxu0 %v2212_v33 }
 0x8c5   : > { %2116 = vadd.xlane.f32.xlu2 %v6653_v41 }
 0x8c6   : > { %v2095_v25 = vpop.f32.mrf.mxu1 }
 0x8c7   : > { %v2102_v45 = vadd.f32 %v2095_v25, %v1898_v44  ;;  %v2213_v44 = vld [vmem:[#allocation20 + $0xc8] sm:$0xff]  ;;  %v2214_v25 = vld [vmem:[#allocation20 + $0xd0] sm:$0xff] }
 0x8c8   : > { %2323 = vmatpush.msra.mxu2 %v2214_v25 }
 0x8c9   : > { %v2105_v50 = vadd.f32 %v2102_v45, %v6362_v35  ;;  %v2215_v45 = vld [vmem:[#allocation20 + $0xd8] sm:$0xff] }
 0x8ca   : > { %2349 = vmatpush.msrb.mxu1 %v2215_v45  ;;  %2324 = vmatpush.msra.mxu2 %v2210_v56 }
 0x8cb   : > { %v6657_v55 = vadd.f32 %v5200_v30, %v2105_v50  ;;  %v2208_v50 = vld [vmem:[#allocation20 + $0xa0] sm:$0xff] }
 0x8cc   : > { %2272 = vmatpush.msra.mxu0 %v2208_v50 }
 0x8cd   : > { %2118 = vadd.xlane.f32.xlu1 %v6657_v55 }
 0x8d6   : > { %v2098_v58 = vpop.f32.mrf.mxu1 }
 0x8d7   : > { %v2103_v57 = vadd.f32 %v2098_v58, %v1899_v26  ;;  %v2211_v26 = vld [vmem:[#allocation20 + $0xb8] sm:$0xff]  ;;  %v2204_v58 = vld [vmem:[#allocation20 + $0x80] sm:$0xff] }
 0x8d8   : > { %2350 = vmatpush.msrb.mxu1 %v2211_v26  ;;  %2273 = vmatpush.msra.mxu0 %v2204_v58 }
 0x8d9   : > { %v2106_v43 = vadd.f32 %v2103_v57, %v6365_v40  ;;  %v2205_v57 = vld [vmem:[#allocation20 + $0x88] sm:$0xff] }
 0x8da   : > { %2351 = vmatpush.msrb.mxu1 %v2207_v48  ;;  %2274 = vmatpush.msra.mxu0 %v2200_v61  ;;  %v2633_v48 = vld [vmem:[#allocation21 + $0x78] sm:$0xff] }
 0x8db   : > { %v6662_v60 = vadd.f32 %v5200_v30, %v2106_v43  ;;  %v2217_v30 = vld [vmem:[#allocation20 + $0xe8] sm:$0xff]  ;;  %v2206_v43 = vld [vmem:[#allocation20 + $0x90] sm:$0xff]  ;;  %v2681_v61 = vld [vmem:[#allocation21 + $0x1f8] sm:$0xff] }
 0x8dc   : > { %2296 = vmatpush.msra.mxu3 %v2217_v30  ;;  %2325 = vmatpush.msra.mxu2 %v2206_v43 }
 0x8dd   : > { %2120 = vadd.xlane.f32.xlu0 %v6662_v60  ;;  %2352 = vmatpush.msrb.mxu1 %v2203_v62  ;;  %v2631_v62 = vld [vmem:[#allocation21 + $0x68] sm:$0xff] }
 0x8de   : > { %2297 = vmatpush.msra.mxu3 %v2213_v44  ;;  %2275 = vmatpush.msra.mxu0 %v2196_v63  ;;  %v2679_v63 = vld [vmem:[#allocation21 + $0x1e8] sm:$0xff] }
 0x8df   : > { %2353 = vmatpush.msrb.mxu1 %v2199_v36  ;;  %v2678_v36 = vld [vmem:[#allocation21 + $0x1e0] sm:$0xff] }
 0x8e0   : > { %2298 = vmatpush.msra.mxu3 %v2209_v39  ;;  %2276 = vmatpush.msra.mxu0 %v2192_v37  ;;  %v2629_v37 = vld [vmem:[#allocation21 + $0x58] sm:$0xff] }
 0x8e2   : > { %2299 = vmatpush.msra.mxu3 %v2205_v57 }
 0x8e4   : > { %2300 = vmatpush.msra.mxu3 %v2201_v24  ;;  %v2632_v24 = vld [vmem:[#allocation21 + $0x70] sm:$0xff] }
 0x8e6   : > { %2301 = vmatpush.msra.mxu3 %v2197_v38  ;;  %v2630_v38 = vld [vmem:[#allocation21 + $0x60] sm:$0xff] }
 0x938   : > { %v2117_v35 = vpop.xlane.xlu2 %2116 }
 0x939   : > { %v2122_v47 = vmul.f32 %v2117_v35, %v6351_v51  ;;  %v2202_v35 = vld [vmem:[#allocation20 + $0x70] sm:$0xff] }
 0x93a   : > { %2326 = vmatpush.msra.mxu2 %v2202_v35  ;;  %v2680_v35 = vld [vmem:[#allocation21 + $0x1f0] sm:$0xff] }
 0x93b   : > { %v6667_v40 = vsub.f32 %v6653_v41, %v2122_v47  ;;  %v2198_v47 = vld [vmem:[#allocation20 + $0x50] sm:$0xff] }
 0x93c   : > { %2327 = vmatpush.msra.mxu2 %v2198_v47  ;;  %v2665_v47 = vld [vmem:[#allocation21 + $0x178] sm:$0xff] }
 0x93d   : > { %v2128_v42 = vmul.f32 %v6667_v40, %v6667_v40 }
 0x93f   : > { %2131 = vadd.xlane.f32.xlu1 %v2128_v42  ;;  %v2193_v42 = vld [vmem:[#allocation20 + $0x28] sm:$0xff] }
 0x940   : > { %v2119_v0 = vpop.xlane.xlu1 %2118  ;;  %2302 = vmatpush.msra.mxu3 %v2193_v42  ;;  %v2648_v42 = vld [vmem:[#allocation21 + $0xf0] sm:$0xff] }
 0x941   : > { %v2123_v2 = vmul.f32 %v2119_v0, %v6351_v51  ;;  %v2194_v0 = vld [vmem:[#allocation20 + $0x30] sm:$0xff] }
 0x942   : > { %2328 = vmatpush.msra.mxu2 %v2194_v0  ;;  %v2664_v0 = vld [vmem:[#allocation21 + $0x170] sm:$0xff] }
 0x943   : > { %v6673_v3 = vsub.f32 %v6657_v55, %v2123_v2  ;;  %v2195_v2 = vld [vmem:[#allocation20 + $0x38] sm:$0xff] }
 0x944   : > { %2354 = vmatpush.msrb.mxu1 %v2195_v2  ;;  %v2677_v2 = vld [vmem:[#allocation21 + $0x1d8] sm:$0xff] }
 0x945   : > { %v2129_v52 = vmul.f32 %v6673_v3, %v6673_v3 }
 0x947   : > { %2133 = vadd.xlane.f32.xlu0 %v2129_v52  ;;  %v2188_v52 = vld [vmem:[#allocation20] sm:$0xff] }
 0x948   : > { %2277 = vmatpush.msra.mxu0 %v2188_v52  ;;  %v2628_v52 = vld [vmem:[#allocation21 + $0x50] sm:$0xff] }
 0x94a   : > { %2682 = vmatpush.msrb.mxu0 %v2633_v48  ;;  %v2639_v48 = vld [vmem:[#allocation21 + $0xa8] sm:$0xff] }
 0x94c   : > { %2683 = vmatpush.msrb.mxu0 %v2632_v24 }
 0x94e   : > { %2684 = vmatpush.msrb.mxu0 %v2631_v62  ;;  %v2668_v62 = vld [vmem:[#allocation21 + $0x190] sm:$0xff] }
 0x950   : > { %v2121_v59 = vpop.xlane.xlu0 %2120  ;;  %2685 = vmatpush.msrb.mxu0 %v2630_v38 }
 0x951   : > { %v2124_v27 = vmul.f32 %v2121_v59, %v6351_v51  ;;  %v2189_v59 = vld [vmem:[#allocation20 + $0x8] sm:$0xff] }
 0x952   : > { %2303 = vmatpush.msra.mxu3 %v2189_v59  ;;  %2686 = vmatpush.msrb.mxu0 %v2629_v37  ;;  %v2647_v59 = vld [vmem:[#allocation21 + $0xe8] sm:$0xff] }
 0x953   : > { %v6679_v4 = vsub.f32 %v6662_v60, %v2124_v27  ;;  %v2190_v27 = vld [vmem:[#allocation20 + $0x10] sm:$0xff] }
 0x954   : > { %2329 = vmatpush.msra.mxu2 %v2190_v27  ;;  %v2663_v27 = vld [vmem:[#allocation21 + $0x168] sm:$0xff]  ;;  %2687 = vmatpush.msrb.mxu0 %v2628_v52 }
 0x955   : > { %v2130_v5 = vmul.f32 %v6679_v4, %v6679_v4 }
 0x956   : > { %2734 = vmatpush.msrb.mxu2 %v2665_v47  ;;  %v2638_v47 = vld [vmem:[#allocation21 + $0xa0] sm:$0xff] }
 0x957   : > { %2135 = vadd.xlane.f32.xlu1 %v2130_v5  ;;  %v2191_v5 = vld [vmem:[#allocation20 + $0x18] sm:$0xff] }
 0x958   : > { %2355 = vmatpush.msrb.mxu1 %v2191_v5  ;;  %2735 = vmatpush.msrb.mxu2 %v2664_v0  ;;  %v2676_v5 = vld [vmem:[#allocation21 + $0x1d0] sm:$0xff]  ;;  %v2667_v0 = vld [vmem:[#allocation21 + $0x188] sm:$0xff] }
 0x95a   : > { %2760 = vmatpush.msra.mxu1 %v2681_v61  ;;  %2736 = vmatpush.msrb.mxu2 %v2663_v27  ;;  %v2655_v61 = vld [vmem:[#allocation21 + $0x128] sm:$0xff]  ;;  %v2618_v27 = vld [vmem:[#allocation21] sm:$0xff] }
 0x95c   : > { %2761 = vmatpush.msra.mxu1 %v2680_v35 }
 0x95e   : > { %2762 = vmatpush.msra.mxu1 %v2679_v63 }
 0x960   : > { %2763 = vmatpush.msra.mxu1 %v2678_v36  ;;  %v2654_v36 = vld [vmem:[#allocation21 + $0x120] sm:$0xff] }
 0x962   : > { %2764 = vmatpush.msra.mxu1 %v2677_v2 }
 0x964   : > { %2765 = vmatpush.msra.mxu1 %v2676_v5  ;;  %v2637_v5 = vld [vmem:[#allocation21 + $0x98] sm:$0xff] }
 0x9b2   : > { %v2132_v46 = vpop.xlane.xlu1 %2131 }
 0x9b3   : > { %v2137_v6 = vmul.f32 %v2132_v46, %v6351_v51  ;;  %v2627_v46 = vld [vmem:[#allocation21 + $0x48] sm:$0xff] }
 0x9b4   : > { %2688 = vmatpush.msrb.mxu0 %v2627_v46  ;;  %v2653_v46 = vld [vmem:[#allocation21 + $0x118] sm:$0xff] }
 0x9b5   : > { %v2140_v7 = vadd.f32 1e-05, %v2137_v6  ;;  %v2646_v6 = vld [vmem:[#allocation21 + $0xe0] sm:$0xff] }
 0x9b7   : > { %5272 = vrsqrt.f32 %v2140_v7  ;;  %vm2149_vm0 = vweird.f32 %v2140_v7 }
 0x9ba   : > { %v2134_v8 = vpop.xlane.xlu0 %2133 }
 0x9bb   : > { %v2138_v9 = vmul.f32 %v2134_v8, %v6351_v51  ;;  %v2675_v8 = vld [vmem:[#allocation21 + $0x1c8] sm:$0xff] }
 0x9bc   : > { %2766 = vmatpush.msra.mxu1 %v2675_v8  ;;  %v2666_v8 = vld [vmem:[#allocation21 + $0x180] sm:$0xff] }
 0x9bd   : > { %v5273_v10 = vpop.eup %5272  ;;  %v2141_v11 = vadd.f32 1e-05, %v2138_v9  ;;  %v2626_v9 = vld [vmem:[#allocation21 + $0x40] sm:$0xff] }
 0x9be   : > { %v2144_v34 = vmul.f32 %v5273_v10, %v2140_v7  ;;  %vm2150_vm15 = vweird.f32 %v5273_v10  ;;  %v2662_v7 = vld [vmem:[#allocation21 + $0x160] sm:$0xff]  ;;  %2689 = vmatpush.msrb.mxu0 %v2626_v9 }
 0x9bf   : > { %5274 = vrsqrt.f32 %v2141_v11  ;;  %vm2151_vm1 = vmor %vm2149_vm0, %vm2150_vm15  ;;  %vm2159_vm3 = vweird.f32 %v2141_v11  ;;  %2737 = vmatpush.msrb.mxu2 %v2662_v7 }
 0x9c0   : > { %v2145_v1 = vmul.f32 %v5273_v10, %v2144_v34  ;;  %v2252_v34 = vld [vmem:[%s7519_s19] sm:$0xf] }
 0x9c2   : > { %v2146_v49 = vmul.f32 0.5, %v2145_v1  ;;  %v2674_v1 = vld [vmem:[#allocation21 + $0x1c0] sm:$0xff] }
 0x9c3   : > { %2767 = vmatpush.msra.mxu1 %v2674_v1 }
 0x9c4   : > { %v2147_v13 = vsub.f32 1.5, %v2146_v49  ;;  %v2625_v49 = vld [vmem:[#allocation21 + $0x38] sm:$0xff] }
 0x9c5   : > { %v5275_v17 = vpop.eup %5274  ;;  %2690 = vmatpush.msrb.mxu0 %v2625_v49 }
 0x9c6   : > { %v2148_v14 = vmul.f32 %v5273_v10, %v2147_v13  ;;  %v2154_v16 = vmul.f32 %v5275_v17, %v2141_v11  ;;  %vm2160_vm2 = vweird.f32 %v5275_v17  ;;  %v2661_v11 = vld [vmem:[#allocation21 + $0x158] sm:$0xff]  ;;  %v2644_v13 = vld [vmem:[#allocation21 + $0xd0] sm:$0xff] }
 0x9c7   : > { %vm2161_vm5 = vmor %vm2159_vm3, %vm2160_vm2  ;;  %2738 = vmatpush.msrb.mxu2 %v2661_v11  ;;  %v2636_v11 = vld [vmem:[#allocation21 + $0x90] sm:$0xff] }
 0x9c8   : > { %v2152_v18 = vsel %vm2151_vm1, %v5273_v10, %v2148_v14  ;;  %v2155_v19 = vmul.f32 %v5275_v17, %v2154_v16  ;;  %v2645_v10 = vld [vmem:[#allocation21 + $0xd8] sm:$0xff]  ;;  %v6692_v16 = vperm.slane %v2252_v34, 0 }
 0x9c9   : > { %v2173_v20 = vmul.f32 %v2152_v18, %v6667_v40  ;;  %v2673_v14 = vld [vmem:[#allocation21 + $0x1b8] sm:$0xff]  ;;  %v2643_v18 = vld [vmem:[#allocation21 + $0xc8] sm:$0xff] }
 0x9ca   : > { %v2156_v54 = vmul.f32 0.5, %v2155_v19  ;;  %v2136_v23 = vpop.xlane.xlu1 %2135  ;;  %2768 = vmatpush.msra.mxu1 %v2673_v14  ;;  %v2659_v19 = vld [vmem:[#allocation21 + $0x148] sm:$0xff] }
 0x9cb   : > { %v2139_v15 = vmul.f32 %v2136_v23, %v6351_v51  ;;  %v2179_v32 = vmul.f32 %v5201_v12, %v2173_v20  ;;  %v6694_v20 = vperm.slane %v2252_v34, 3  ;;  %v2642_v23 = vld [vmem:[#allocation21 + $0xc0] sm:$0xff]  ;;  %v2635_v14 = vld [vmem:[#allocation21 + $0x88] sm:$0xff] }
 0x9cc   : > { %v2157_v28 = vsub.f32 1.5, %v2156_v54  ;;  %v2623_v54 = vld [vmem:[#allocation21 + $0x28] sm:$0xff] }
 0x9cd   : > { %v2142_v29 = vadd.f32 1e-05, %v2139_v15  ;;  %v2185_v30 = vadd.f32 %v5202_v21, %v2179_v32  ;;  %v2658_v15 = vld [vmem:[#allocation21 + $0x140] sm:$0xff] }
 0x9ce   : > { %v2158_v22 = vmul.f32 %v5275_v17, %v2157_v28  ;;  %v2671_v28 = vld [vmem:[#allocation21 + $0x1a8] sm:$0xff] }
 0x9cf   : > { %5276 = vrsqrt.f32 %v2142_v29  ;;  %2278 = vmatmul.f32.vlgmr.msra.gmra.mxu0 %v2185_v30  ;;  %2304 = vmatmul.f32.vlgmr.msra.gmra.mxu3 %v2185_v30  ;;  %vm2169_vm7 = vweird.f32 %v2142_v29 }
 0x9d0   : > { %v2162_v31 = vsel %vm2161_vm5, %v5275_v17, %v2158_v22  ;;  %2330 = vmatmul.f32.vlgmr.msra.gmra.mxu2 %v2185_v30  ;;  %2356 = vmatmul.f32.vlgmr.msrb.gmra.mxu1 %v2185_v30  ;;  %v2660_v17 = vld [vmem:[#allocation21 + $0x150] sm:$0xff]  ;;  %v2622_v22 = vld [vmem:[#allocation21 + $0x20] sm:$0xff] }
 0x9d1   : > { %v2174_v40 = vmul.f32 %v2162_v31, %v6673_v3  ;;  %2739 = vmatpush.msrb.mxu2 %v2660_v17  ;;  %v2641_v31 = vld [vmem:[#allocation21 + $0xb8] sm:$0xff] }
 0x9d3   : > { %v2180_v33 = vmul.f32 %v5201_v12, %v2174_v40  ;;  %2740 = vmatpush.msrb.mxu2 %v2659_v19  ;;  %v2657_v40 = vld [vmem:[#allocation21 + $0x138] sm:$0xff] }
 0x9d5   : > { %v5277_v44 = vpop.eup %5276  ;;  %v2186_v25 = vadd.f32 %v5202_v21, %v2180_v33  ;;  %2741 = vmatpush.msrb.mxu2 %v2658_v15 }
 0x9d6   : > { %v2164_v45 = vmul.f32 %v5277_v44, %v2142_v29  ;;  %vm2170_vm6 = vweird.f32 %v5277_v44 }
 0x9d7   : > { %2281 = vmatmul.f32.gmra.mxu0 %v2186_v25  ;;  %2307 = vmatmul.f32.gmra.mxu3 %v2186_v25  ;;  %vm2171_vm9 = vmor %vm2169_vm7, %vm2170_vm6 }
 0x9d8   : > { %v2165_v50 = vmul.f32 %v5277_v44, %v2164_v45  ;;  %2333 = vmatmul.f32.gmra.mxu2 %v2186_v25  ;;  %2359 = vmatmul.f32.gmra.mxu1 %v2186_v25  ;;  %v6703_v45 = vperm.slane %v2252_v34, 1 }
 0x9d9   : > { %2742 = vmatpush.msrb.mxu2 %v2657_v40 }
 0x9da   : > { %v2166_v39 = vmul.f32 0.5, %v2165_v50  ;;  %v2621_v50 = vld [vmem:[#allocation21 + $0x18] sm:$0xff] }
 0x9dc   : > { %v2167_v56 = vsub.f32 1.5, %v2166_v39  ;;  %v2640_v39 = vld [vmem:[#allocation21 + $0xb0] sm:$0xff] }
 0x9de   : > { %v2168_v26 = vmul.f32 %v5277_v44, %v2167_v56  ;;  %v2656_v56 = vld [vmem:[#allocation21 + $0x130] sm:$0xff] }
 0x9df   : > { %2743 = vmatpush.msrb.mxu2 %v2656_v56 }
 0x9e0   : > { %v2172_v58 = vsel %vm2171_vm9, %v5277_v44, %v2168_v26  ;;  %v2670_v44 = vld [vmem:[#allocation21 + $0x1a0] sm:$0xff] }
 0x9e1   : > { %v2175_v57 = vmul.f32 %v2172_v58, %v6679_v4  ;;  %v2649_v4 = vld [vmem:[#allocation21 + $0xf8] sm:$0xff]  ;;  %v6706_v58 = vperm.slane %v2252_v34, 2  ;;  %2744 = vmatpush.msrb.mxu2 %v2655_v61  ;;  %v2652_v34 = vld [vmem:[#allocation21 + $0x110] sm:$0xff] }
 0x9e2   : > { %2708 = vmatpush.msrb.mxu3 %v2649_v4  ;;  %v2619_v4 = vld [vmem:[#allocation21 + $0x8] sm:$0xff] }
 0x9e3   : > { %v2181_v43 = vmul.f32 %v5201_v12, %v2175_v57  ;;  %v2624_v12 = vld [vmem:[#allocation21 + $0x30] sm:$0xff]  ;;  %v2669_v57 = vld [vmem:[#allocation21 + $0x198] sm:$0xff]  ;;  %2745 = vmatpush.msrb.mxu2 %v2654_v36 }
 0x9e4   : > { %2709 = vmatpush.msrb.mxu3 %v2648_v42  ;;  %2691 = vmatpush.msrb.mxu0 %v2624_v12  ;;  %v2651_v12 = vld [vmem:[#allocation21 + $0x108] sm:$0xff] }
 0x9e5   : > { %v2187_v3 = vadd.f32 %v5202_v21, %v2181_v43  ;;  %v2672_v21 = vld [vmem:[#allocation21 + $0x1b0] sm:$0xff]  ;;  %2746 = vmatpush.msrb.mxu2 %v2653_v46 }
 0x9e6   : > { %2710 = vmatpush.msrb.mxu3 %v2647_v59  ;;  %2769 = vmatpush.msra.mxu1 %v2672_v21 }
 0x9e7   : > { %2284 = vmatmul.f32.gmra.mxu0 %v2187_v3  ;;  %2310 = vmatmul.f32.gmra.mxu3 %v2187_v3 }
 0x9e8   : > { %2336 = vmatmul.f32.gmra.mxu2 %v2187_v3  ;;  %2362 = vmatmul.f32.gmra.mxu1 %v2187_v3  ;;  %v2620_v3 = vld [vmem:[#allocation21 + $0x10] sm:$0xff] }
 0x9e9   : > { %2711 = vmatpush.msrb.mxu3 %v2646_v6  ;;  %2692 = vmatpush.msrb.mxu0 %v2623_v54 }
 0x9ea   : > { %2770 = vmatpush.msra.mxu1 %v2671_v28  ;;  %2747 = vmatpush.msrb.mxu2 %v2652_v34  ;;  %v2650_v28 = vld [vmem:[#allocation21 + $0x100] sm:$0xff] }
 0x9eb   : > { %2712 = vmatpush.msrb.mxu3 %v2645_v10  ;;  %2693 = vmatpush.msrb.mxu0 %v2622_v22 }
 0x9ec   : > { %2771 = vmatpush.msra.mxu1 %v2670_v44  ;;  %2748 = vmatpush.msrb.mxu2 %v2651_v12 }
 0x9ed   : > { %2713 = vmatpush.msrb.mxu3 %v2644_v13  ;;  %2694 = vmatpush.msrb.mxu0 %v2621_v50 }
 0x9ee   : > { %2772 = vmatpush.msra.mxu1 %v2669_v57  ;;  %2749 = vmatpush.msrb.mxu2 %v2650_v28 }
 0x9ef   : > { %2714 = vmatpush.msrb.mxu3 %v2643_v18  ;;  %2695 = vmatpush.msrb.mxu0 %v2620_v3 }
 0x9f0   : > { %2773 = vmatpush.msra.mxu1 %v2668_v62 }
 0x9f1   : > { %2715 = vmatpush.msrb.mxu3 %v2642_v23  ;;  %2696 = vmatpush.msrb.mxu0 %v2619_v4 }
 0x9f2   : > { %2774 = vmatpush.msra.mxu1 %v2667_v0 }
 0x9f3   : > { %2716 = vmatpush.msrb.mxu3 %v2641_v31  ;;  %2697 = vmatpush.msrb.mxu0 %v2618_v27 }
 0x9f4   : > { %2775 = vmatpush.msra.mxu1 %v2666_v8 }
 0x9f5   : > { %2717 = vmatpush.msrb.mxu3 %v2640_v39 }
 0x9f7   : > { %2718 = vmatpush.msrb.mxu3 %v2639_v48 }
 0x9f9   : > { %2719 = vmatpush.msrb.mxu3 %v2638_v47 }
 0x9fb   : > { %2720 = vmatpush.msrb.mxu3 %v2637_v5 }
 0x9fd   : > { %2721 = vmatpush.msrb.mxu3 %v2636_v11 }
 0x9ff   : > { %2722 = vmatpush.msrb.mxu3 %v2635_v14 }
 0xa4c   : > { %v2279_v32 = vpop.f32.mrf.mxu0 }
 0xa4d   : > { %v6697_v29 = vadd.f32 %v2279_v32, %v6692_v16  ;;  %v2357_v30 = vpop.f32.mrf.mxu1  ;;  %v2634_v32 = vld [vmem:[#allocation21 + $0x80] sm:$0xff] }
 0xa4e   : > { %v6700_v33 = vadd.f32 %v2357_v30, %v6694_v20  ;;  %2723 = vmatpush.msrb.mxu3 %v2634_v32 }
 0xa4f   : > { %v4891_v25 = vmul.f32 -1.702, %v6697_v29 }
 0xa50   : > { %v4894_v26 = vmul.f32 -1.702, %v6700_v33 }
 0xa51   : > { %v2390_v43 = vmul.f32 1.442695, %v4891_v25 }
 0xa52   : > { %v2396_v24 = vmul.f32 1.442695, %v4894_v26  ;;  %v2305_v35 = vpop.f32.mrf.mxu3 }
 0xa53   : > { %5278 = vpow2.f32 %v2390_v43  ;;  %v6709_v63 = vadd.f32 %v2305_v35, %v6703_v45  ;;  %v2331_v38 = vpop.f32.mrf.mxu2 }
 0xa54   : > { %5280 = vpow2.f32 %v2396_v24  ;;  %v6712_v37 = vadd.f32 %v2331_v38, %v6706_v58  ;;  %v2282_v42 = vpop.f32.mrf.mxu0 }
 0xa55   : > { %v4892_v2 = vmul.f32 -1.702, %v6709_v63  ;;  %v6716_v52 = vadd.f32 %v2282_v42, %v6692_v16  ;;  %v2360_v59 = vpop.f32.mrf.mxu1 }
 0xa56   : > { %v4893_v6 = vmul.f32 -1.702, %v6712_v37  ;;  %v6720_v7 = vadd.f32 %v2360_v59, %v6694_v20 }
 0xa57   : > { %v2392_v9 = vmul.f32 1.442695, %v4892_v2  ;;  %v4895_v10 = vmul.f32 -1.702, %v6716_v52 }
 0xa58   : > { %v2394_v1 = vmul.f32 1.442695, %v4893_v6  ;;  %v4898_v49 = vmul.f32 -1.702, %v6720_v7 }
 0xa59   : > { %v5279_v13 = vpop.eup %5278  ;;  %5282 = vpow2.f32 %v2392_v9  ;;  %v2398_v17 = vmul.f32 1.442695, %v4895_v10 }
 0xa5a   : > { %v5281_v18 = vpop.eup %5280  ;;  %v6724_v19 = vadd.f32 1.0, %v5279_v13  ;;  %5284 = vpow2.f32 %v2394_v1  ;;  %v2404_v21 = vmul.f32 1.442695, %v4898_v49  ;;  %v2308_v54 = vpop.f32.mrf.mxu3 }
 0xa5b   : > { %v6726_v23 = vadd.f32 1.0, %v5281_v18  ;;  %5286 = vpow2.f32 %v2398_v17  ;;  %v6729_v15 = vadd.f32 %v2308_v54, %v6703_v45  ;;  %v2334_v30 = vpop.f32.mrf.mxu2 }
 0xa5c   : > { %5288 = vrcp.f32 %v6724_v19  ;;  %v2435_v40 = vand.u32 2147483647, %v6724_v19  ;;  %v2437_v44 = vand.u32 2147483648, %v6724_v19  ;;  %v6737_v25 = vadd.f32 %v2334_v30, %v6706_v58 }
 0xa5d   : > { %5290 = vrcp.f32 %v6726_v23  ;;  %v4896_v22 = vmul.f32 -1.702, %v6729_v15  ;;  %v2480_v39 = vand.u32 2147483647, %v6726_v23  ;;  %v2482_v56 = vand.u32 2147483648, %v6726_v23 }
 0xa5e   : > { %5292 = vpow2.f32 %v2404_v21  ;;  %vm2431_vm10 = vweird.f32 %v6724_v19  ;;  %vm2476_vm11 = vweird.f32 %v6726_v23  ;;  %v4897_v61 = vmul.f32 -1.702, %v6737_v25 }
 0xa5f   : > { %v5283_v31 = vpop.eup %5282  ;;  %v2400_v48 = vmul.f32 1.442695, %v4896_v22  ;;  %vm6750_vm12 = vcmp.eq.f32.partialorder %v2435_v40, 8.507059e+37  ;;  %v2438_v38 = vor.u32 1.1754944e-38, %v2437_v44  ;;  %vm6757_vm14 = vcmp.eq.f32.partialorder %v2480_v39, 8.507059e+37 }
 0xa60   : > { %v5285_v50 = vpop.eup %5284  ;;  %v6741_v26 = vadd.f32 1.0, %v5283_v31  ;;  %v2483_v0 = vor.u32 1.1754944e-38, %v2482_v56  ;;  %v2402_v10 = vmul.f32 1.442695, %v4897_v61 }
 0xa61   : > { %v5287_v57 = vpop.eup %5286  ;;  %v6744_v43 = vadd.f32 1.0, %v5285_v50 }
 0xa62   : > { %v5289_v3 = vpop.eup %5288  ;;  %5294 = vrcp.f32 %v6741_v26  ;;  %v2452_v4 = vand.u32 2147483648, %v6741_v26  ;;  %v2450_v2 = vand.u32 2147483647, %v6741_v26  ;;  %v6763_v5 = vadd.f32 1.0, %v5287_v57 }
 0xa63   : > { %v5291_v24 = vpop.eup %5290  ;;  %v2427_v35 = vmul.f32 %v5289_v3, %v6724_v19  ;;  %5296 = vrcp.f32 %v6744_v43  ;;  %vm2432_vm13 = vweird.f32 %v5289_v3  ;;  %v2465_v27 = vand.u32 2147483647, %v6744_v43 }
 0xa64   : > { %v5293_v47 = vpop.eup %5292  ;;  %v2472_v36 = vmul.f32 %v5291_v24, %v6726_v23  ;;  %vm2477_vm15 = vweird.f32 %v5291_v24  ;;  %v2285_v46 = vpop.f32.mrf.mxu0  ;;  %5298 = vpow2.f32 %v2400_v48  ;;  %vm2446_vm0 = vweird.f32 %v6741_v26  ;;  %vm2433_vm5 = vmor %vm2431_vm10, %vm2432_vm13 }
 0xa65   : > { %v2428_v59 = vsub.f32 1.0, %v2427_v35  ;;  %v2363_v6 = vpop.f32.mrf.mxu1  ;;  %v6765_v9 = vadd.f32 1.0, %v5293_v47  ;;  %v2453_v34 = vor.u32 1.1754944e-38, %v2452_v4  ;;  %v2467_v1 = vand.u32 2147483648, %v6744_v43  ;;  %vm2478_vm9 = vmor %vm2476_vm11, %vm2477_vm15 }
 0xa66   : > { %v2473_v8 = vsub.f32 1.0, %v2472_v36  ;;  %5300 = vrcp.f32 %v6763_v5  ;;  %vm2461_vm1 = vweird.f32 %v6744_v43  ;;  %v6773_v17 = vadd.f32 %v2285_v46, %v6692_v16 }
 0xa67   : > { %v2429_v11 = vmul.f32 %v5289_v3, %v2428_v59  ;;  %5302 = vrcp.f32 %v6765_v9  ;;  %v6776_v14 = vadd.f32 %v2363_v6, %v6694_v20  ;;  %vm6779_vm3 = vcmp.eq.f32.partialorder %v2450_v2, 8.507059e+37 }
 0xa68   : > { %v5295_v49 = vpop.eup %5294  ;;  %v2474_v13 = vmul.f32 %v5291_v24, %v2473_v8  ;;  %5304 = vpow2.f32 %v2402_v10  ;;  %vm6787_vm7 = vcmp.eq.f32.partialorder %v2465_v27, 8.507059e+37  ;;  %v4899_v28 = vmul.f32 -1.702, %v6773_v17 }
 0xa69   : > { %v5297_v12 = vpop.eup %5296  ;;  %v2430_v18 = vadd.f32 %v5289_v3, %v2429_v11  ;;  %v2442_v21 = vmul.f32 %v5295_v49, %v6741_v26  ;;  %vm2447_vm2 = vweird.f32 %v5295_v49  ;;  %v4902_v19 = vmul.f32 -1.702, %v6776_v14 }
 0xa6a   : > { %v2475_v32 = vadd.f32 %v5291_v24, %v2474_v13  ;;  %v2457_v16 = vmul.f32 %v5297_v12, %v6744_v43  ;;  %vm2462_vm6 = vweird.f32 %v5297_v12  ;;  %v2311_v30 = vpop.f32.mrf.mxu3  ;;  %v5299_v44 = vpop.eup %5298  ;;  %v2406_v57 = vmul.f32 1.442695, %v4899_v28  ;;  %vm2448_vm10 = vmor %vm2446_vm0, %vm2447_vm2 }
 0xa6b   : > { %v2434_v22 = vsel %vm2433_vm5, %v5289_v3, %v2430_v18  ;;  %v2443_v31 = vsub.f32 1.0, %v2442_v21  ;;  %v6797_v40 = vadd.f32 %v2311_v30, %v6703_v45  ;;  %v2337_v48 = vpop.f32.mrf.mxu2  ;;  %v6806_v4 = vadd.f32 1.0, %v5299_v44  ;;  %vm2463_vm11 = vmor %vm2461_vm1, %vm2462_vm6 }
 0xa6c   : > { %v2439_v50 = vsel %vm6750_vm12, %v2438_v38, %v2434_v22  ;;  %v2479_v39 = vsel %vm2478_vm9, %v5291_v24, %v2475_v32  ;;  %v2458_v56 = vsub.f32 1.0, %v2457_v16  ;;  %v6801_v61 = vpop.eup %5300  ;;  %5306 = vpow2.f32 %v2406_v57 }
 0xa6d   : > { %v2606_v3 = vmul.f32 %v2439_v50, %v6697_v29  ;;  %v2484_v23 = vsel %vm6757_vm14, %v2483_v0, %v2479_v39  ;;  %v2444_v35 = vmul.f32 %v5295_v49, %v2443_v31  ;;  %v6808_v45 = vpop.eup %5302  ;;  %v2412_v24 = vmul.f32 1.442695, %v4902_v19 }
 0xa6e   : > { %v2609_v47 = vmul.f32 %v2484_v23, %v6700_v33  ;;  %v2459_v62 = vmul.f32 %v5297_v12, %v2458_v56  ;;  %v5305_v38 = vpop.eup %5304  ;;  %5308 = vrcp.f32 %v6806_v4  ;;  %v4900_v2 = vmul.f32 -1.702, %v6797_v40 }
 0xa6f   : > { %v2445_v36 = vadd.f32 %v5295_v49, %v2444_v35  ;;  %v6814_v29 = vadd.f32 %v2337_v48, %v6706_v58  ;;  %2698 = vmatmul.f32.vlgmr.msrb.gmra.mxu0 %v2606_v3  ;;  %v6819_v0 = vadd.f32 1.0, %v5305_v38  ;;  %5310 = vpow2.f32 %v2412_v24 }
 0xa70   : > { %v2460_v42 = vadd.f32 %v5297_v12, %v2459_v62  ;;  %2776 = vmatmul.f32.vlgmr.msra.gmra.mxu1 %v2609_v47  ;;  %v2487_v33 = vmul.f32 %v6801_v61, %v6763_v5  ;;  %v2468_v58 = vor.u32 1.1754944e-38, %v2467_v1  ;;  %v2408_v27 = vmul.f32 1.442695, %v4900_v2 }
 0xa71   : > { %v2449_v59 = vsel %vm2448_vm10, %v5295_v49, %v2445_v36  ;;  %v4901_v46 = vmul.f32 -1.702, %v6814_v29  ;;  %5312 = vrcp.f32 %v6819_v0  ;;  %vm2492_vm12 = vweird.f32 %v6801_v61 }
 0xa72   : > { %v2454_v26 = vsel %vm6779_vm3, %v2453_v34, %v2449_v59  ;;  %v2464_v6 = vsel %vm2463_vm11, %v5297_v12, %v2460_v42  ;;  %v2488_v8 = vsub.f32 1.0, %v2487_v33  ;;  %5314 = vpow2.f32 %v2408_v27  ;;  %v5307_v43 = vpop.eup %5306 }
 0xa73   : > { %v2607_v10 = vmul.f32 %v2454_v26, %v6709_v63  ;;  %v2469_v11 = vsel %vm6787_vm7, %v2468_v58, %v2464_v6  ;;  %v2410_v49 = vmul.f32 1.442695, %v4901_v46  ;;  %v2495_v34 = vand.u32 2147483647, %v6763_v5 }
 0xa74   : > { %v2608_v1 = vmul.f32 %v2469_v11, %v6712_v37  ;;  %v2489_v13 = vmul.f32 %v6801_v61, %v2488_v8  ;;  %v6837_v12 = vpop.eup %5308  ;;  %v6839_v18 = vadd.f32 1.0, %v5307_v43  ;;  %v2497_v63 = vand.u32 2147483648, %v6763_v5 }
 0xa75   : > { %5316 = vpow2.f32 %v2410_v49  ;;  %2724 = vmatmul.f32.vlgmr.msrb.gmra.mxu3 %v2607_v10  ;;  %v2532_v21 = vmul.f32 %v6808_v45, %v6765_v9  ;;  %v5311_v54 = vpop.eup %5310  ;;  %vm2491_vm13 = vweird.f32 %v6763_v5  ;;  %vm2496_vm14 = vcmp.eq.f32.partialorder %v2495_v34, 8.507059e+37 }
 0xa76   : > { %2750 = vmatmul.f32.vlgmr.msrb.gmra.mxu2 %v2608_v1  ;;  %v2490_v37 = vadd.f32 %v6801_v61, %v2489_v13  ;;  %5318 = vrcp.f32 %v6839_v18  ;;  %v6847_v32 = vadd.f32 1.0, %v5311_v54  ;;  %vm2493_vm15 = vmor %vm2491_vm13, %vm2492_vm12  ;;  %v2498_v16 = vor.u32 1.1754944e-38, %v2497_v63 }
 0xa77   : > { %v2533_v20 = vsub.f32 1.0, %v2532_v21  ;;  %v6851_v28 = vpop.eup %5312  ;;  %v2540_v22 = vand.u32 2147483647, %v6765_v9  ;;  %v2542_v31 = vand.u32 2147483648, %v6765_v9  ;;  %v2502_v5 = vmul.f32 %v6837_v12, %v6806_v4 }
 0xa78   : > { %v2494_v30 = vsel %vm2493_vm15, %v6801_v61, %v2490_v37  ;;  %v5315_v19 = vpop.eup %5314  ;;  %vm2537_vm0 = vweird.f32 %v6808_v45  ;;  %5320 = vrcp.f32 %v6847_v32  ;;  %vm2536_vm1 = vweird.f32 %v6765_v9 }
 0xa79   : > { %v2499_v44 = vsel %vm2496_vm14, %v2498_v16, %v2494_v30  ;;  %v2534_v50 = vmul.f32 %v6808_v45, %v2533_v20  ;;  %v6861_v39 = vadd.f32 1.0, %v5315_v19  ;;  %vm2541_vm2 = vcmp.eq.f32.partialorder %v2540_v22, 8.507059e+37  ;;  %vm2538_vm3 = vmor %vm2536_vm1, %vm2537_vm0 }
 0xa7a   : > { %v2610_v56 = vmul.f32 %v2499_v44, %v6716_v52  ;;  %v2543_v61 = vor.u32 1.1754944e-38, %v2542_v31  ;;  %v2503_v3 = vsub.f32 1.0, %v2502_v5  ;;  %vm2507_vm5 = vweird.f32 %v6837_v12 }
 0xa7b   : > { %v5317_v57 = vpop.eup %5316  ;;  %v2535_v48 = vadd.f32 %v6808_v45, %v2534_v50  ;;  %v2512_v35 = vand.u32 2147483648, %v6806_v4  ;;  %v2517_v47 = vmul.f32 %v6851_v28, %v6819_v0  ;;  %5322 = vrcp.f32 %v6861_v39 }
 0xa7c   : > { %v6866_v23 = vadd.f32 1.0, %v5317_v57  ;;  %2701 = vmatmul.f32.gmra.mxu0 %v2610_v56  ;;  %v5319_v52 = vpop.eup %5318  ;;  %v2504_v62 = vmul.f32 %v6837_v12, %v2503_v3  ;;  %v2510_v24 = vand.u32 2147483647, %v6806_v4  ;;  %vm2506_vm6 = vweird.f32 %v6806_v4 }
 0xa7d   : > { %v2539_v9 = vsel %vm2538_vm3, %v6808_v45, %v2535_v48  ;;  %v2518_v36 = vsub.f32 1.0, %v2517_v47  ;;  %v2513_v33 = vor.u32 1.1754944e-38, %v2512_v35  ;;  %vm2522_vm7 = vweird.f32 %v6851_v28  ;;  %vm2508_vm9 = vmor %vm2506_vm6, %vm2507_vm5 }
 0xa7e   : > { %5324 = vrcp.f32 %v6866_v23  ;;  %v2544_v38 = vsel %vm2541_vm2, %v2543_v61, %v2539_v9  ;;  %v2505_v42 = vadd.f32 %v6837_v12, %v2504_v62  ;;  %v5321_v59 = vpop.eup %5320  ;;  %v2525_v58 = vand.u32 2147483647, %v6819_v0 }
 0xa7f   : > { %v2613_v2 = vmul.f32 %v2544_v38, %v6720_v7  ;;  %v2519_v45 = vmul.f32 %v6851_v28, %v2518_v36  ;;  %v2527_v27 = vand.u32 2147483648, %v6819_v0  ;;  %v2547_v4 = vmul.f32 %v5319_v52, %v6839_v18 }
 0xa80   : > { %v2509_v7 = vsel %vm2508_vm9, %v6837_v12, %v2505_v42  ;;  %vm2511_vm10 = vcmp.eq.f32.partialorder %v2510_v24, 8.507059e+37  ;;  %v2555_v46 = vand.u32 2147483647, %v6839_v18  ;;  %vm2521_vm11 = vweird.f32 %v6819_v0 }
 0xa81   : > { %2779 = vmatmul.f32.gmra.mxu1 %v2613_v2  ;;  %v2514_v26 = vsel %vm2511_vm10, %v2513_v33, %v2509_v7  ;;  %v2520_v6 = vadd.f32 %v6851_v28, %v2519_v45  ;;  %v2548_v8 = vsub.f32 1.0, %v2547_v4  ;;  %v5323_v10 = vpop.eup %5322  ;;  %vm2523_vm12 = vmor %vm2521_vm11, %vm2522_vm7  ;;  %v2528_v49 = vor.u32 1.1754944e-38, %v2527_v27 }
 0xa82   : > { %v2611_v11 = vmul.f32 %v2514_v26, %v6729_v15  ;;  %v2557_v43 = vand.u32 2147483648, %v6839_v18  ;;  %v2592_v1 = vmul.f32 %v5321_v59, %v6847_v32  ;;  %vm2526_vm13 = vcmp.eq.f32.partialorder %v2525_v58, 8.507059e+37 }
 0xa83   : > { %v2524_v34 = vsel %vm2523_vm12, %v6851_v28, %v2520_v6  ;;  %v2549_v12 = vmul.f32 %v5319_v52, %v2548_v8  ;;  %vm2552_vm14 = vweird.f32 %v5319_v52  ;;  %vm2551_vm15 = vweird.f32 %v6839_v18 }
 0xa84   : > { %v5325_v13 = vpop.eup %5324  ;;  %2727 = vmatmul.f32.gmra.mxu3 %v2611_v11  ;;  %v2529_v0 = vsel %vm2526_vm13, %v2528_v49, %v2524_v34  ;;  %vm6898_vm0 = vcmp.eq.f32.partialorder %v2555_v46, 8.507059e+37  ;;  %v2593_v63 = vsub.f32 1.0, %v2592_v1  ;;  %v2602_v37 = vand.u32 2147483648, %v6847_v32  ;;  %vm2553_vm1 = vmor %vm2551_vm15, %vm2552_vm14 }
 0xa85   : > { %v2612_v21 = vmul.f32 %v2529_v0, %v6737_v25  ;;  %v2550_v54 = vadd.f32 %v5319_v52, %v2549_v12  ;;  %v2562_v16 = vmul.f32 %v5323_v10, %v6861_v39  ;;  %v2558_v20 = vor.u32 1.1754944e-38, %v2557_v43 }
 0xa86   : > { %v2594_v28 = vmul.f32 %v5321_v59, %v2593_v63  ;;  %vm2597_vm2 = vweird.f32 %v5321_v59  ;;  %v2600_v30 = vand.u32 2147483647, %v6847_v32  ;;  %vm2596_vm3 = vweird.f32 %v6847_v32 }
 0xa87   : > { %2753 = vmatmul.f32.gmra.mxu2 %v2612_v21  ;;  %v2554_v18 = vsel %vm2553_vm1, %v5319_v52, %v2550_v54  ;;  %v2563_v22 = vsub.f32 1.0, %v2562_v16  ;;  %vm2567_vm5 = vweird.f32 %v5323_v10  ;;  %v2572_v5 = vand.u32 2147483648, %v6861_v39  ;;  %vm2598_vm6 = vmor %vm2596_vm3, %vm2597_vm2 }
 0xa88   : > { %v2559_v25 = vsel %vm6898_vm0, %v2558_v20, %v2554_v18  ;;  %v2595_v31 = vadd.f32 %v5321_v59, %v2594_v28  ;;  %v2577_v19 = vmul.f32 %v5325_v13, %v6866_v23  ;;  %v2603_v50 = vor.u32 1.1754944e-38, %v2602_v37  ;;  %v2918_v28 = vld [vmem:[#allocation11 + $0x2e8] sm:$0xff]  ;;  %v2920_v18 = vld [vmem:[#allocation11 + $0x2f8] sm:$0xff] }
 0xa89   : > { %v2614_v44 = vmul.f32 %v2559_v25, %v6773_v17  ;;  %v2564_v56 = vmul.f32 %v5323_v10, %v2563_v22  ;;  %v2570_v57 = vand.u32 2147483647, %v6861_v39  ;;  %vm2601_vm7 = vcmp.eq.f32.partialorder %v2600_v30, 8.507059e+37  ;;  %v2919_v30 = vld [vmem:[#allocation11 + $0x2f0] sm:$0xff]  ;;  %2947 = vmatpush.msra.mxu0 %v2918_v28  ;;  %v2917_v25 = vld [vmem:[#allocation11 + $0x2e0] sm:$0xff]  ;;  %2999 = vmatpush.msra.mxu2 %v2920_v18  ;;  %v2878_v28 = vld [vmem:[#allocation11 + $0x1a8] sm:$0xff] }
 0xa8a   : > { %v2599_v48 = vsel %vm2598_vm6, %v5321_v59, %v2595_v31  ;;  %vm2566_vm9 = vweird.f32 %v6861_v39  ;;  %v2578_v32 = vsub.f32 1.0, %v2577_v19  ;;  %v2573_v35 = vor.u32 1.1754944e-38, %v2572_v5  ;;  %2973 = vmatpush.msra.mxu3 %v2919_v30  ;;  %v2915_v22 = vld [vmem:[#allocation11 + $0x2d0] sm:$0xff] }
 0xa8b   : > { %2704 = vmatmul.f32.gmra.mxu0 %v2614_v44  ;;  %v2604_v61 = vsel %vm2601_vm7, %v2603_v50, %v2599_v48  ;;  %v2565_v3 = vadd.f32 %v5323_v10, %v2564_v56  ;;  %v2587_v47 = vand.u32 2147483648, %v6866_v23  ;;  %vm2568_vm10 = vmor %vm2566_vm9, %vm2567_vm5  ;;  %vm2582_vm11 = vweird.f32 %v5325_v13  ;;  %3000 = vmatpush.msra.mxu2 %v2917_v25  ;;  %v2875_v25 = vld [vmem:[#allocation11 + $0x190] sm:$0xff] }
 0xa8c   : > { %v2617_v52 = vmul.f32 %v2604_v61, %v6776_v14  ;;  %v2579_v17 = vmul.f32 %v5325_v13, %v2578_v32  ;;  %v2585_v9 = vand.u32 2147483647, %v6866_v23  ;;  %vm2571_vm12 = vcmp.eq.f32.partialorder %v2570_v57, 8.507059e+37  ;;  %2948 = vmatpush.msra.mxu0 %v2915_v22  ;;  %v2912_v32 = vld [vmem:[#allocation11 + $0x2b8] sm:$0xff]  ;;  %v2913_v61 = vld [vmem:[#allocation11 + $0x2c0] sm:$0xff] }
 0xa8d   : > { %v2569_v62 = vsel %vm2568_vm10, %v5323_v10, %v2565_v3  ;;  %vm2581_vm13 = vweird.f32 %v6866_v23  ;;  %v2588_v36 = vor.u32 1.1754944e-38, %v2587_v47  ;;  %v2914_v3 = vld [vmem:[#allocation11 + $0x2c8] sm:$0xff]  ;;  %v2873_v22 = vld [vmem:[#allocation11 + $0x180] sm:$0xff] }
 0xa8e   : > { %2782 = vmatmul.f32.gmra.mxu1 %v2617_v52  ;;  %v2574_v24 = vsel %vm2571_vm12, %v2573_v35, %v2569_v62  ;;  %v2580_v39 = vadd.f32 %v5325_v13, %v2579_v17  ;;  %vm2583_vm14 = vmor %vm2581_vm13, %vm2582_vm11  ;;  %vm2586_vm15 = vcmp.eq.f32.partialorder %v2585_v9, 8.507059e+37  ;;  %2949 = vmatpush.msra.mxu0 %v2912_v32  ;;  %v2909_v35 = vld [vmem:[#allocation11 + $0x2a0] sm:$0xff]  ;;  %v2910_v47 = vld [vmem:[#allocation11 + $0x2a8] sm:$0xff] }
 0xa8f   : > { %v2615_v38 = vmul.f32 %v2574_v24, %v6797_v40  ;;  %v5203_v40 = vld [vmem:[%s7530_s13] ss:$0 sm:$0xff]  ;;  %v2911_v52 = vld [vmem:[#allocation11 + $0x2b0] sm:$0xff]  ;;  %3001 = vmatpush.msra.mxu2 %v2914_v3  ;;  %v2908_v62 = vld [vmem:[#allocation11 + $0x298] sm:$0xff] }
 0xa90   : > { %v2584_v2 = vsel %vm2583_vm14, %v5325_v13, %v2580_v39  ;;  %v2906_v17 = vld [vmem:[#allocation11 + $0x288] sm:$0xff]  ;;  %v2907_v9 = vld [vmem:[#allocation11 + $0x290] sm:$0xff]  ;;  %2950 = vmatpush.msra.mxu0 %v2909_v35  ;;  %v2904_v39 = vld [vmem:[#allocation11 + $0x278] sm:$0xff] }
 0xa91   : > { %2730 = vmatmul.f32.gmra.mxu3 %v2615_v38  ;;  %v2589_v14 = vsel %vm2586_vm15, %v2588_v36, %v2584_v2  ;;  %3002 = vmatpush.msra.mxu2 %v2911_v52  ;;  %v2903_v24 = vld [vmem:[#allocation11 + $0x270] sm:$0xff]  ;;  %v2905_v38 = vld [vmem:[#allocation11 + $0x280] sm:$0xff]  ;;  %v2900_v36 = vld [vmem:[#allocation11 + $0x258] sm:$0xff] }
 0xa92   : > { %v2616_v42 = vmul.f32 %v2589_v14, %v6814_v29  ;;  %2951 = vmatpush.msra.mxu0 %v2906_v17  ;;  %v2901_v2 = vld [vmem:[#allocation11 + $0x260] sm:$0xff]  ;;  %v2902_v14 = vld [vmem:[#allocation11 + $0x268] sm:$0xff] }
 0xa93   : > { %3003 = vmatpush.msra.mxu2 %v2908_v62 }
 0xa94   : > { %2756 = vmatmul.f32.gmra.mxu2 %v2616_v42  ;;  %2952 = vmatpush.msra.mxu0 %v2903_v24 }
 0xa95   : > { %3004 = vmatpush.msra.mxu2 %v2905_v38 }
 0xa96   : > { %2953 = vmatpush.msra.mxu0 %v2900_v36 }
 0xa97   : > { %3005 = vmatpush.msra.mxu2 %v2902_v14 }
 0xaec   : > { %v2699_v33 = vpop.f32.mrf.mxu0 }
 0xaed   : > { %v2777_v4 = vpop.f32.mrf.mxu1 }
 0xaf8   : > { %v2725_v59 = vpop.f32.mrf.mxu3 }
 0xaf9   : > { %v2726_v45 = vadd.f32 %v2725_v59, %v2699_v33  ;;  %v2751_v58 = vpop.f32.mrf.mxu2  ;;  %v2702_v26 = vpop.f32.mrf.mxu0  ;;  %v2897_v59 = vld [vmem:[#allocation11 + $0x240] sm:$0xff] }
 0xafa   : > { %2954 = vmatpush.msra.mxu0 %v2897_v59 }
 0xafb   : > { %v2752_v27 = vadd.f32 %v2751_v58, %v2726_v45  ;;  %v2898_v45 = vld [vmem:[#allocation11 + $0x248] sm:$0xff]  ;;  %v2899_v58 = vld [vmem:[#allocation11 + $0x250] sm:$0xff] }
 0xafc   : > { %3006 = vmatpush.msra.mxu2 %v2899_v58 }
 0xafd   : > { %v2778_v7 = vadd.f32 %v2777_v4, %v2752_v27  ;;  %v2894_v4 = vld [vmem:[#allocation11 + $0x228] sm:$0xff] }
 0xafe   : > { %v2780_v11 = vpop.f32.mrf.mxu1  ;;  %2955 = vmatpush.msra.mxu0 %v2894_v4 }
 0xaff   : > { %v2786_v23 = vadd.f32 %v2778_v7, %v6653_v41  ;;  %v2895_v7 = vld [vmem:[#allocation11 + $0x230] sm:$0xff] }
 0xb01   : > { %v6925_v46 = vadd.f32 %v5203_v40, %v2786_v23  ;;  %v2891_v23 = vld [vmem:[#allocation11 + $0x210] sm:$0xff] }
 0xb02   : > { %2956 = vmatpush.msra.mxu0 %v2891_v23 }
 0xb03   : > { %2800 = vadd.xlane.f32.xlu0 %v6925_v46 }
 0xb07   : > { %v2728_v29 = vpop.f32.mrf.mxu3 }
 0xb08   : > { %v2729_v6 = vadd.f32 %v2728_v29, %v2702_v26  ;;  %v2705_v13 = vpop.f32.mrf.mxu0  ;;  %v2892_v26 = vld [vmem:[#allocation11 + $0x218] sm:$0xff]  ;;  %v2893_v29 = vld [vmem:[#allocation11 + $0x220] sm:$0xff] }
 0xb0a   : > { %v2754_v8 = vpop.f32.mrf.mxu2 }
 0xb0b   : > { %v2755_v10 = vadd.f32 %v2754_v8, %v2729_v6  ;;  %v2783_v15 = vpop.f32.mrf.mxu1  ;;  %v2888_v6 = vld [vmem:[#allocation11 + $0x1f8] sm:$0xff]  ;;  %v2889_v8 = vld [vmem:[#allocation11 + $0x200] sm:$0xff] }
 0xb0c   : > { %2957 = vmatpush.msra.mxu0 %v2888_v6 }
 0xb0d   : > { %v2781_v49 = vadd.f32 %v2780_v11, %v2755_v10  ;;  %v2890_v10 = vld [vmem:[#allocation11 + $0x208] sm:$0xff]  ;;  %v2885_v11 = vld [vmem:[#allocation11 + $0x1e0] sm:$0xff] }
 0xb0e   : > { %2958 = vmatpush.msra.mxu0 %v2885_v11 }
 0xb0f   : > { %v2787_v43 = vadd.f32 %v2781_v49, %v6657_v55  ;;  %v2886_v49 = vld [vmem:[#allocation11 + $0x1e8] sm:$0xff] }
 0xb11   : > { %v6929_v1 = vadd.f32 %v5203_v40, %v2787_v43  ;;  %v2887_v43 = vld [vmem:[#allocation11 + $0x1f0] sm:$0xff] }
 0xb13   : > { %2802 = vadd.xlane.f32.xlu1 %v6929_v1 }
 0xb14   : > { %v2731_v34 = vpop.f32.mrf.mxu3 }
 0xb15   : > { %v2732_v41 = vadd.f32 %v2731_v34, %v2705_v13  ;;  %v2882_v13 = vld [vmem:[#allocation11 + $0x1c8] sm:$0xff]  ;;  %v2883_v34 = vld [vmem:[#allocation11 + $0x1d0] sm:$0xff] }
 0xb16   : > { %2959 = vmatpush.msra.mxu0 %v2882_v13 }
 0xb17   : > { %v2757_v12 = vpop.f32.mrf.mxu2 }
 0xb18   : > { %v2758_v0 = vadd.f32 %v2757_v12, %v2732_v41  ;;  %v2884_v41 = vld [vmem:[#allocation11 + $0x1d8] sm:$0xff] }
 0xb1a   : > { %v2784_v63 = vadd.f32 %v2783_v15, %v2758_v0  ;;  %v2879_v0 = vld [vmem:[#allocation11 + $0x1b0] sm:$0xff]  ;;  %v2880_v15 = vld [vmem:[#allocation11 + $0x1b8] sm:$0xff] }
 0xb1b   : > { %2960 = vmatpush.msra.mxu0 %v2879_v0 }
 0xb1c   : > { %v2788_v21 = vadd.f32 %v2784_v63, %v6662_v60  ;;  %v2916_v60 = vld [vmem:[#allocation11 + $0x2d8] sm:$0xff] }
 0xb1d   : > { %2974 = vmatpush.msra.mxu3 %v2916_v60  ;;  %v2874_v60 = vld [vmem:[#allocation11 + $0x188] sm:$0xff] }
 0xb1e   : > { %v6933_v54 = vadd.f32 %v5203_v40, %v2788_v21  ;;  %v2896_v40 = vld [vmem:[#allocation11 + $0x238] sm:$0xff]  ;;  %v2881_v21 = vld [vmem:[#allocation11 + $0x1c0] sm:$0xff] }
 0xb1f   : > { %2975 = vmatpush.msra.mxu3 %v2913_v61  ;;  %3007 = vmatpush.msra.mxu2 %v2896_v40  ;;  %v5205_v61 = vld [vmem:[%s7420_s6 + $0x1] ss:$0 sm:$0xff] }
 0xb20   : > { %2804 = vadd.xlane.f32.xlu0 %v6933_v54 }
 0xb21   : > { %2976 = vmatpush.msra.mxu3 %v2910_v47  ;;  %3008 = vmatpush.msra.mxu2 %v2893_v29 }
 0xb23   : > { %2977 = vmatpush.msra.mxu3 %v2907_v9  ;;  %3009 = vmatpush.msra.mxu2 %v2890_v10  ;;  %v2939_v10 = vld [vmem:[#allocation12 + $0x3] sm:$0x7] }
 0xb24   : > { %v2942_v11 = vperm.slane %v2939_v10, 1 }
 0xb25   : > { %2978 = vmatpush.msra.mxu3 %v2904_v39  ;;  %3010 = vmatpush.msra.mxu2 %v2887_v43 }
 0xb27   : > { %2979 = vmatpush.msra.mxu3 %v2901_v2  ;;  %3011 = vmatpush.msra.mxu2 %v2884_v41 }
 0xb29   : > { %2980 = vmatpush.msra.mxu3 %v2898_v45  ;;  %3012 = vmatpush.msra.mxu2 %v2881_v21  ;;  %v2941_v21 = vperm.slane %v2939_v10, 0 }
 0xb2b   : > { %2981 = vmatpush.msra.mxu3 %v2895_v7  ;;  %3013 = vmatpush.msra.mxu2 %v2878_v28 }
 0xb2d   : > { %2982 = vmatpush.msra.mxu3 %v2892_v26  ;;  %3014 = vmatpush.msra.mxu2 %v2875_v25 }
 0xb2f   : > { %2983 = vmatpush.msra.mxu3 %v2889_v8 }
 0xb31   : > { %2984 = vmatpush.msra.mxu3 %v2886_v49  ;;  %v2943_v49 = vperm.slane %v2939_v10, 2 }
 0xb33   : > { %2985 = vmatpush.msra.mxu3 %v2883_v34 }
 0xb35   : > { %2986 = vmatpush.msra.mxu3 %v2880_v15 }
 0xb76   : > { %v2801_v37 = vpop.xlane.xlu0 %2800 }
 0xb77   : > { %v2806_v55 = vmul.f32 %v2801_v37, %v6351_v51 }
 0xb79   : > { %v6938_v16 = vsub.f32 %v6925_v46, %v2806_v55  ;;  %v2876_v55 = vld [vmem:[#allocation11 + $0x198] sm:$0xff] }
 0xb7a   : > { %2961 = vmatpush.msra.mxu0 %v2876_v55 }
 0xb7b   : > { %v2812_v20 = vmul.f32 %v6938_v16, %v6938_v16 }
 0xb7c   : > { %2962 = vmatpush.msra.mxu0 %v2873_v22 }
 0xb7d   : > { %2815 = vadd.xlane.f32.xlu1 %v2812_v20  ;;  %v2877_v20 = vld [vmem:[#allocation11 + $0x1a0] sm:$0xff] }
 0xb7e   : > { %2987 = vmatpush.msra.mxu3 %v2877_v20 }
 0xb80   : > { %2988 = vmatpush.msra.mxu3 %v2874_v60 }
 0xb86   : > { %v2803_v31 = vpop.xlane.xlu1 %2802 }
 0xb87   : > { %v2807_v5 = vmul.f32 %v2803_v31, %v6351_v51 }
 0xb89   : > { %v6944_v19 = vsub.f32 %v6929_v1, %v2807_v5 }
 0xb8b   : > { %v2813_v44 = vmul.f32 %v6944_v19, %v6944_v19 }
 0xb8d   : > { %2817 = vadd.xlane.f32.xlu2 %v2813_v44 }
 0xb93   : > { %v2805_v50 = vpop.xlane.xlu0 %2804 }
 0xb94   : > { %v2808_v56 = vmul.f32 %v2805_v50, %v6351_v51 }
 0xb96   : > { %v6950_v57 = vsub.f32 %v6933_v54, %v2808_v56  ;;  %v5204_v56 = vld [vmem:[%s7419_s5 + $0x1] ss:$0 sm:$0xff] }
 0xb98   : > { %v2814_v48 = vmul.f32 %v6950_v57, %v6950_v57 }
 0xb9a   : > { %2819 = vadd.xlane.f32.xlu0 %v2814_v48 }
 0xbf0   : > { %v2816_v42 = vpop.xlane.xlu1 %2815 }
 0xbf1   : > { %v2821_v33 = vmul.f32 %v2816_v42, %v6351_v51 }
 0xbf3   : > { %v2824_v27 = vadd.f32 1e-05, %v2821_v33 }
 0xbf5   : > { %5326 = vrsqrt.f32 %v2824_v27  ;;  %vm2833_vm1 = vweird.f32 %v2824_v27 }
 0xbfb   : > { %v5327_v12 = vpop.eup %5326 }
 0xbfc   : > { %v2828_v63 = vmul.f32 %v5327_v12, %v2824_v27  ;;  %vm2834_vm0 = vweird.f32 %v5327_v12 }
 0xbfd   : > { %vm2835_vm2 = vmor %vm2833_vm1, %vm2834_vm0 }
 0xbfe   : > { %v2829_v37 = vmul.f32 %v5327_v12, %v2828_v63 }
 0xc00   : > { %v2830_v30 = vmul.f32 0.5, %v2829_v37  ;;  %v2818_v18 = vpop.xlane.xlu2 %2817 }
 0xc01   : > { %v2822_v5 = vmul.f32 %v2818_v18, %v6351_v51 }
 0xc02   : > { %v2831_v31 = vsub.f32 1.5, %v2830_v30 }
 0xc03   : > { %v2825_v50 = vadd.f32 1e-05, %v2822_v5 }
 0xc04   : > { %v2832_v44 = vmul.f32 %v5327_v12, %v2831_v31 }
 0xc05   : > { %5328 = vrsqrt.f32 %v2825_v50  ;;  %vm2843_vm5 = vweird.f32 %v2825_v50 }
 0xc06   : > { %v2836_v48 = vsel %vm2835_vm2, %v5327_v12, %v2832_v44 }
 0xc07   : > { %v2857_v32 = vmul.f32 %v2836_v48, %v6938_v16 }
 0xc09   : > { %v2863_v3 = vmul.f32 %v5204_v56, %v2857_v32 }
 0xc0b   : > { %v2869_v35 = vadd.f32 %v5205_v61, %v2863_v3  ;;  %v5329_v47 = vpop.eup %5328 }
 0xc0c   : > { %v2838_v52 = vmul.f32 %v5329_v47, %v2825_v50  ;;  %vm2844_vm3 = vweird.f32 %v5329_v47 }
 0xc0d   : > { %2963 = vmatmul.f32.vlgmr.msra.gmra.mxu0 %v2869_v35  ;;  %2989 = vmatmul.f32.vlgmr.msra.gmra.mxu3 %v2869_v35  ;;  %v2820_v17 = vpop.xlane.xlu0 %2819  ;;  %vm2845_vm6 = vmor %vm2843_vm5, %vm2844_vm3 }
 0xc0e   : > { %3015 = vmatmul.f32.vlgmr.msra.gmra.mxu2 %v2869_v35  ;;  %v2839_v9 = vmul.f32 %v5329_v47, %v2838_v52  ;;  %v2823_v62 = vmul.f32 %v2820_v17, %v6351_v51 }
 0xc10   : > { %v2840_v24 = vmul.f32 0.5, %v2839_v9  ;;  %v2826_v39 = vadd.f32 1e-05, %v2823_v62 }
 0xc12   : > { %v2841_v38 = vsub.f32 1.5, %v2840_v24  ;;  %5330 = vrsqrt.f32 %v2826_v39  ;;  %vm2853_vm9 = vweird.f32 %v2826_v39 }
 0xc14   : > { %v2842_v16 = vmul.f32 %v5329_v47, %v2841_v38 }
 0xc16   : > { %v2846_v36 = vsel %vm2845_vm6, %v5329_v47, %v2842_v16 }
 0xc17   : > { %v2858_v2 = vmul.f32 %v2846_v36, %v6944_v19 }
 0xc18   : > { %v5331_v14 = vpop.eup %5330 }
 0xc19   : > { %v2848_v42 = vmul.f32 %v5331_v14, %v2826_v39  ;;  %v2864_v33 = vmul.f32 %v5204_v56, %v2858_v2  ;;  %vm2854_vm7 = vweird.f32 %v5331_v14 }
 0xc1a   : > { %vm2855_vm10 = vmor %vm2853_vm9, %vm2854_vm7 }
 0xc1b   : > { %v2849_v59 = vmul.f32 %v5331_v14, %v2848_v42  ;;  %v2870_v45 = vadd.f32 %v5205_v61, %v2864_v33 }
 0xc1d   : > { %v2850_v58 = vmul.f32 0.5, %v2849_v59  ;;  %2966 = vmatmul.f32.gmra.mxu0 %v2870_v45  ;;  %2992 = vmatmul.f32.gmra.mxu3 %v2870_v45 }
 0xc1e   : > { %3018 = vmatmul.f32.gmra.mxu2 %v2870_v45  ;;  %v2925_v45 = vld [vmem:[#allocation14 + $0x98] sm:$0xff] }
 0xc1f   : > { %v2851_v27 = vsub.f32 1.5, %v2850_v58 }
 0xc21   : > { %v2852_v4 = vmul.f32 %v5331_v14, %v2851_v27 }
 0xc23   : > { %v2856_v7 = vsel %vm2855_vm10, %v5331_v14, %v2852_v4  ;;  %v2924_v4 = vld [vmem:[#allocation14 + $0x90] sm:$0xff] }
 0xc24   : > { %v2859_v40 = vmul.f32 %v2856_v7, %v6950_v57  ;;  %v2923_v7 = vld [vmem:[#allocation14 + $0x88] sm:$0xff] }
 0xc26   : > { %v2865_v23 = vmul.f32 %v5204_v56, %v2859_v40 }
 0xc28   : > { %v2871_v26 = vadd.f32 %v5205_v61, %v2865_v23 }
 0xc2a   : > { %2969 = vmatmul.f32.gmra.mxu0 %v2871_v26  ;;  %2995 = vmatmul.f32.gmra.mxu3 %v2871_v26 }
 0xc2b   : > { %3021 = vmatmul.f32.gmra.mxu2 %v2871_v26 }
 0xc8a   : > { %v2964_v63 = vpop.f32.mrf.mxu0 }
 0xc8b   : > { %v2965_v55 = vadd.f32 %v2964_v63, %v2941_v21 }
 0xc90   : > { %v2990_v19 = vpop.f32.mrf.mxu3 }
 0xc91   : > { %v3016_v29 = vpop.f32.mrf.mxu2  ;;  %v2991_v37 = vadd.f32 %v2990_v19, %v2942_v11 }
 0xc92   : > { %v6972_v15 = vadd.f32 %v3016_v29, %v2943_v49 }
 0xc9a   : > { %v2967_v20 = vpop.f32.mrf.mxu0 }
 0xc9b   : > { %v2968_v28 = vadd.f32 %v2967_v20, %v2941_v21 }
 0xca0   : > { %v2993_v6 = vpop.f32.mrf.mxu3 }
 0xca1   : > { %v3019_v8 = vpop.f32.mrf.mxu2  ;;  %v2994_v0 = vadd.f32 %v2993_v6, %v2942_v11  ;;  %v2922_v6 = vld [vmem:[#allocation14 + $0x80] sm:$0xff] }
 0xca2   : > { %v3020_v41 = vadd.f32 %v3019_v8, %v2943_v49 }
 0xca7   : > { %v2970_v30 = vpop.f32.mrf.mxu0 }
 0xca8   : > { %v2971_v18 = vadd.f32 %v2970_v30, %v2941_v21 }
 0xcad   : > { %v2996_v43 = vpop.f32.mrf.mxu3 }
 0xcae   : > { %v6966_v13 = vadd.f32 %v2996_v43, %v2942_v11  ;;  %v3022_v34 = vpop.f32.mrf.mxu2 }
 0xcaf   : > { %v3023_v12 = vadd.f32 %v3022_v34, %v2943_v49 }
 0xcb0   : > { %4905 = vmatpush.xpose.msk.msrb.mxu1 %vm1304_vm4, %v6966_v13 }
 0xcb1   : > { %3163 = vmatpush.msrb.mxu0 %v3023_v12  ;;  %v6970_v57 = vpack.i.bf16 %v3020_v41, %v3023_v12 }
 0xcb3   : > { %3164 = vmatpush.msrb.mxu0 %v3020_v41 }
 0xcb4   : > { %4906 = vmatpush.xpose.msk.msrb.mxu1 %vm1304_vm4, %v2994_v0 }
 0xcb5   : > { %3165 = vmatpush.msrb.mxu0 %v6972_v15 }
 0xcb7   : > { %3401 = vmatpush.msra.mxu0 %v2925_v45 }
 0xcb8   : > { %4907 = vmatpush.xpose.msk.msrb.mxu1 %vm1304_vm4, %v2991_v37 }
 0xcb9   : > { %3402 = vmatpush.msra.mxu0 %v2924_v4 }
 0xcbb   : > { %4908 = vmatmul.msk.f32.vlgmr.msrb.gmra.mxu1 %vm1304_vm4, %v2965_v55  ;;  %3403 = vmatpush.msra.mxu0 %v2923_v7 }
 0xcbd   : > { %3404 = vmatpush.msra.mxu0 %v2922_v6 }
 0xcc3   : > { %4909 = vmatmul.msk.f32.gmra.mxu1 %vm1304_vm4, %v2968_v28 }
 0xccb   : > { %4910 = vmatmul.msk.f32.gmra.mxu1 %vm1304_vm4, %v2971_v18 }
 0xd38   : > { %v3060_v22 = vpop.f32.mrf.mxu1 }
 0xd39   : > { %v3061_v60 = vadd.f32 %v3060_v22, %v6427_v53 }
 0xd3b   : > { %v3069_v25 = vsel %vm1349_vm8, %v3061_v60, -inf }
 0xd3c   : > { %3070 = vmax.xlane.f32.xlu1 %v3069_v25 }
 0xd40   : > { %v3063_v31 = vpop.f32.mrf.mxu1 }
 0xd41   : > { %v3064_v5 = vadd.f32 %v3063_v31, %v6427_v53 }
 0xd43   : > { %v3072_v44 = vsel %vm1349_vm8, %v3064_v5, -inf }
 0xd44   : > { %3073 = vmax.xlane.f32.xlu2 %v3072_v44 }
 0xd48   : > { %v3066_v50 = vpop.f32.mrf.mxu1 }
 0xd49   : > { %v3067_v56 = vadd.f32 %v3066_v50, %v6427_v53 }
 0xd4b   : > { %v3075_v48 = vsel %vm1349_vm8, %v3067_v56, -inf }
 0xd4c   : > { %3076 = vmax.xlane.f32.xlu0 %v3075_v48 }
 0xdaf   : > { %v3071_v32 = vpop.xlane.xlu1 %3070 }
 0xdb0   : > { %v3078_v61 = vsub.f32 %v3061_v60, %v3071_v32 }
 0xdb2   : > { %v3081_v3 = vmul.f32 1.442695, %v3078_v61 }
 0xdb4   : > { %5332 = vpow2.f32 %v3081_v3 }
 0xdb7   : > { %v3074_v35 = vpop.xlane.xlu2 %3073 }
 0xdb8   : > { %v3079_v47 = vsub.f32 %v3064_v5, %v3074_v35 }
 0xdba   : > { %v6986_v52 = vpop.eup %5332  ;;  %v3083_v17 = vmul.f32 1.442695, %v3079_v47 }
 0xdbb   : > { %v3087_v9 = vsel %vm1349_vm8, %v6986_v52, 0.0 }
 0xdbc   : > { %5334 = vpow2.f32 %v3083_v17  ;;  %3088 = vadd.xlane.f32.xlu1 %v3087_v9 }
 0xdbf   : > { %v3077_v62 = vpop.xlane.xlu0 %3076 }
 0xdc0   : > { %v3080_v24 = vsub.f32 %v3067_v56, %v3077_v62 }
 0xdc2   : > { %v6990_v39 = vpop.eup %5334  ;;  %v3085_v38 = vmul.f32 1.442695, %v3080_v24 }
 0xdc3   : > { %v3090_v16 = vsel %vm1349_vm8, %v6990_v39, 0.0 }
 0xdc4   : > { %5336 = vpow2.f32 %v3085_v38  ;;  %3091 = vadd.xlane.f32.xlu2 %v3090_v16 }
 0xdca   : > { %v6994_v36 = vpop.eup %5336 }
 0xdcb   : > { %v3093_v2 = vsel %vm1349_vm8, %v6994_v36, 0.0 }
 0xdcc   : > { %3094 = vadd.xlane.f32.xlu0 %v3093_v2 }
 0xdd5   : > { %3186 = vrot.lane.b32.xlu1 %v6966_v13, %s5983_s10 }
 0xddc   : > { %3184 = vrot.lane.b32.xlu2 %v2994_v0, %s5983_s10 }
 0xddd   : > { %3176 = vrot.lane.b32.xlu1 %v2965_v55, %s5983_s10 }
 0xde0   : > { %3182 = vrot.lane.b32.xlu0 %v2991_v37, %s5983_s10 }
 0xde4   : > { %3425 = vrot.lane.b32.xlu2 %v6966_v13, %s5984_s12 }
 0xde5   : > { %3180 = vrot.lane.b32.xlu1 %v2971_v18, %s5983_s10 }
 0xde8   : > { %3178 = vrot.lane.b32.xlu0 %v2968_v28, %s5983_s10 }
 0xdec   : > { %3421 = vrot.lane.b32.xlu2 %v2991_v37, %s5984_s12 }
 0xded   : > { %3629 = vrot.lane.b32.xlu1 %v6966_v13, %s5985_s30 }
 0xdf0   : > { %3423 = vrot.lane.b32.xlu0 %v2994_v0, %s5984_s12 }
 0xdf4   : > { %3627 = vrot.lane.b32.xlu2 %v2994_v0, %s5985_s30 }
 0xdf5   : > { %3625 = vrot.lane.b32.xlu1 %v2991_v37, %s5985_s30 }
 0xdf8   : > { %3415 = vrot.lane.b32.xlu0 %v2965_v55, %s5984_s12 }
 0xdfc   : > { %3417 = vrot.lane.b32.xlu2 %v2968_v28, %s5984_s12 }
 0xdfd   : > { %3419 = vrot.lane.b32.xlu1 %v2971_v18, %s5984_s12 }
 0xe00   : > { %3619 = vrot.lane.b32.xlu0 %v2965_v55, %s5985_s30 }
 0xe04   : > { %3623 = vrot.lane.b32.xlu2 %v2971_v18, %s5985_s30 }
 0xe08   : > { %3621 = vrot.lane.b32.xlu0 %v2968_v28, %s5985_s30 }
 0xe2f   : > { %v3089_v14 = vpop.xlane.xlu1 %3088 }
 0xe30   : > { %5338 = vrcp.f32 %v3089_v14  ;;  %v3107_v27 = vand.u32 2147483648, %v3089_v14  ;;  %v3105_v23 = vand.u32 2147483647, %v3089_v14  ;;  %vm3101_vm12 = vweird.f32 %v3089_v14 }
 0xe32   : > { %v3108_v29 = vor.u32 1.1754944e-38, %v3107_v27  ;;  %vm3106_vm14 = vcmp.eq.f32.partialorder %v3105_v23, 8.507059e+37 }
 0xe36   : > { %v5339_v42 = vpop.eup %5338 }
 0xe37   : > { %v3097_v33 = vmul.f32 %v5339_v42, %v3089_v14  ;;  %v3092_v59 = vpop.xlane.xlu2 %3091  ;;  %vm3102_vm11 = vweird.f32 %v5339_v42 }
 0xe38   : > { %5340 = vrcp.f32 %v3092_v59  ;;  %vm3103_vm13 = vmor %vm3101_vm12, %vm3102_vm11  ;;  %v3122_v34 = vand.u32 2147483648, %v3092_v59  ;;  %v3120_v12 = vand.u32 2147483647, %v3092_v59  ;;  %vm3116_vm0 = vweird.f32 %v3092_v59 }
 0xe39   : > { %v3098_v58 = vsub.f32 1.0, %v3097_v33 }
 0xe3a   : > { %v3123_v37 = vor.u32 1.1754944e-38, %v3122_v34  ;;  %vm3121_vm2 = vcmp.eq.f32.partialorder %v3120_v12, 8.507059e+37 }
 0xe3b   : > { %v3099_v40 = vmul.f32 %v5339_v42, %v3098_v58 }
 0xe3d   : > { %v3100_v26 = vadd.f32 %v5339_v42, %v3099_v40 }
 0xe3e   : > { %v5341_v19 = vpop.eup %5340 }
 0xe3f   : > { %v3104_v8 = vsel %vm3103_vm13, %v5339_v42, %v3100_v26  ;;  %v3112_v10 = vmul.f32 %v5341_v19, %v3092_v59  ;;  %v3095_v11 = vpop.xlane.xlu0 %3094  ;;  %vm3117_vm15 = vweird.f32 %v5341_v19  ;;  %v3185_v0 = vpop.permute.xlu2 %3184 }
 0xe40   : > { %v3109_v49 = vsel %vm3106_vm14, %v3108_v29, %v3104_v8  ;;  %5342 = vrcp.f32 %v3095_v11  ;;  %vm3118_vm1 = vmor %vm3116_vm0, %vm3117_vm15  ;;  %v3137_v60 = vand.u32 2147483648, %v3095_v11  ;;  %v3135_v31 = vand.u32 2147483647, %v3095_v11 }
 0xe41   : > { %v3113_v43 = vsub.f32 1.0, %v3112_v10  ;;  %v3110_v13 = vmul.f32 %v6986_v52, %v3109_v49  ;;  %vm3131_vm5 = vweird.f32 %v3095_v11 }
 0xe42   : > { %v3138_v44 = vor.u32 1.1754944e-38, %v3137_v60  ;;  %vm3136_vm7 = vcmp.eq.f32.partialorder %v3135_v31, 8.507059e+37 }
 0xe43   : > { %v3114_v41 = vmul.f32 %v5341_v19, %v3113_v43  ;;  %4911 = vmatmul.msk.f32.vlgmr.msrb.gmra.mxu0 %vm1349_vm8, %v3110_v13 }
 0xe45   : > { %v3115_v63 = vadd.f32 %v5341_v19, %v3114_v41 }
 0xe46   : > { %v5343_v21 = vpop.eup %5342 }
 0xe47   : > { %v3127_v55 = vmul.f32 %v5343_v21, %v3095_v11  ;;  %v3187_v20 = vpop.permute.xlu1 %3186  ;;  %v3119_v28 = vsel %vm3118_vm1, %v5341_v19, %v3115_v63  ;;  %vm3132_vm3 = vweird.f32 %v5343_v21  ;;  %v3426_v50 = vpop.permute.xlu2 %3425 }
 0xe48   : > { %4914 = vmatpush.xpose.msk.msrb.mxu3 %vm1304_vm4, %v3187_v20  ;;  %v3124_v30 = vsel %vm3121_vm2, %v3123_v37, %v3119_v28  ;;  %vm3133_vm6 = vmor %vm3131_vm5, %vm3132_vm3 }
 0xe49   : > { %v3128_v18 = vsub.f32 1.0, %v3127_v55  ;;  %v3125_v22 = vmul.f32 %v6990_v39, %v3124_v30 }
 0xe4b   : > { %v3129_v25 = vmul.f32 %v5343_v21, %v3128_v18  ;;  %4912 = vmatmul.msk.f32.gmra.mxu0 %vm1349_vm8, %v3125_v22 }
 0xe4c   : > { %4915 = vmatpush.xpose.msk.msrb.mxu3 %vm1304_vm4, %v3185_v0 }
 0xe4d   : > { %v3130_v5 = vadd.f32 %v5343_v21, %v3129_v25 }
 0xe4f   : > { %v3177_v56 = vpop.permute.xlu1 %3176  ;;  %v3134_v48 = vsel %vm3133_vm6, %v5343_v21, %v3130_v5  ;;  %v3422_v47 = vpop.permute.xlu2 %3421 }
 0xe50   : > { %v3139_v32 = vsel %vm3136_vm7, %v3138_v44, %v3134_v48 }
 0xe51   : > { %v3140_v61 = vmul.f32 %v6994_v36, %v3139_v32 }
 0xe52   : > { %v3183_v3 = vpop.permute.xlu0 %3182 }
 0xe53   : > { %4913 = vmatmul.msk.f32.gmra.mxu0 %vm1349_vm8, %v3140_v61  ;;  %4916 = vmatpush.xpose.msk.msrb.mxu3 %vm1304_vm4, %v3183_v3 }
 0xe56   : > { %4917 = vmatmul.msk.f32.vlgmr.msrb.gmra.mxu3 %vm1304_vm4, %v3177_v56 }
 0xe57   : > { %4929 = vmatpush.xpose.msk.msra.mxu3 %vm1304_vm4, %v3426_v50  ;;  %v3181_v35 = vpop.permute.xlu1 %3180  ;;  %v3628_v62 = vpop.permute.xlu2 %3627 }
 0xe5a   : > { %v3179_v52 = vpop.permute.xlu0 %3178 }
 0xe5e   : > { %4918 = vmatmul.msk.f32.gmra.mxu3 %vm1304_vm4, %v3179_v52 }
 0xe5f   : > { %v3630_v17 = vpop.permute.xlu1 %3629  ;;  %v3418_v38 = vpop.permute.xlu2 %3417 }
 0xe60   : > { %4941 = vmatpush.xpose.msk.msrb.mxu0 %vm1304_vm4, %v3630_v17 }
 0xe62   : > { %v3424_v9 = vpop.permute.xlu0 %3423 }
 0xe63   : > { %4930 = vmatpush.xpose.msk.msra.mxu3 %vm1304_vm4, %v3424_v9 }
 0xe64   : > { %4942 = vmatpush.xpose.msk.msrb.mxu0 %vm1304_vm4, %v3628_v62 }
 0xe66   : > { %4919 = vmatmul.msk.f32.gmra.mxu3 %vm1304_vm4, %v3181_v35 }
 0xe67   : > { %v3626_v24 = vpop.permute.xlu1 %3625  ;;  %4931 = vmatpush.xpose.msk.msra.mxu3 %vm1304_vm4, %v3422_v47  ;;  %v3624_v40 = vpop.permute.xlu2 %3623 }
 0xe68   : > { %4943 = vmatpush.xpose.msk.msrb.mxu0 %vm1304_vm4, %v3626_v24 }
 0xe6a   : > { %v3416_v39 = vpop.permute.xlu0 %3415 }
 0xe6e   : > { %4932 = vmatmul.msk.f32.vlgmr.msra.gmra.mxu3 %vm1304_vm4, %v3416_v39 }
 0xe6f   : > { %v3420_v16 = vpop.permute.xlu1 %3419 }
 0xe72   : > { %v3620_v42 = vpop.permute.xlu0 %3619 }
 0xe76   : > { %4933 = vmatmul.msk.f32.gmra.mxu3 %vm1304_vm4, %v3418_v38 }
 0xe7a   : > { %v3622_v58 = vpop.permute.xlu0 %3621 }
 0xe7e   : > { %4934 = vmatmul.msk.f32.gmra.mxu3 %vm1304_vm4, %v3420_v16 }
 0xec0   : > { %v3167_v36 = vpop.f32.mrf.mxu0 }
 0xec1   : > { %4926 = vmatmul.msk.f32.vlgmr.msra.gmra.mxu0 %vm1304_vm4, %v3167_v36 }
 0xec8   : > { %v3170_v2 = vpop.f32.mrf.mxu0 }
 0xec9   : > { %4927 = vmatmul.msk.f32.gmra.mxu0 %vm1304_vm4, %v3170_v2 }
 0xed0   : > { %v3173_v14 = vpop.f32.mrf.mxu0 }
 0xed1   : > { %4928 = vmatmul.msk.f32.gmra.mxu0 %vm1304_vm4, %v3173_v14 }
 0xed9   : > { %v3217_v33 = vpop.f32.mrf.mxu3  ;;  %4944 = vmatmul.msk.f32.vlgmr.msrb.gmra.mxu0 %vm1304_vm4, %v3620_v42 }
 0xeda   : > { %v3218_v59 = vadd.f32 %v3217_v33, %v6427_v53 }
 0xedc   : > { %v3226_v45 = vsel %vm1349_vm8, %v3218_v59, -inf }
 0xedd   : > { %3227 = vmax.xlane.f32.xlu1 %v3226_v45 }
 0xee1   : > { %v3220_v27 = vpop.f32.mrf.mxu3  ;;  %4945 = vmatmul.msk.f32.gmra.mxu0 %vm1304_vm4, %v3622_v58 }
 0xee2   : > { %v3221_v4 = vadd.f32 %v3220_v27, %v6427_v53 }
 0xee4   : > { %v3229_v7 = vsel %vm1349_vm8, %v3221_v4, -inf }
 0xee5   : > { %3230 = vmax.xlane.f32.xlu0 %v3229_v7 }
 0xee9   : > { %v3223_v23 = vpop.f32.mrf.mxu3  ;;  %4946 = vmatmul.msk.f32.gmra.mxu0 %vm1304_vm4, %v3624_v40 }
 0xeea   : > { %v3224_v26 = vadd.f32 %v3223_v23, %v6427_v53 }
 0xeec   : > { %v3232_v19 = vsel %vm1349_vm8, %v3224_v26, -inf }
 0xeed   : > { %3233 = vmax.xlane.f32.xlu2 %v3232_v19 }
 0xef1   : > { %v3456_v29 = vpop.f32.mrf.mxu3 }
 0xef2   : > { %v3457_v6 = vadd.f32 %v3456_v29, %v6427_v53 }
 0xef4   : > { %v3465_v8 = vsel %vm1349_vm8, %v3457_v6, -inf }
 0xef5   : > { %3466 = vmax.xlane.f32.xlu1 %v3465_v8 }
 0xef9   : > { %v3459_v61 = vpop.f32.mrf.mxu3 }
 0xefa   : > { %v7089_v3 = vadd.f32 %v3459_v61, %v6427_v53 }
 0xefc   : > { %v3468_v35 = vsel %vm1349_vm8, %v7089_v3, -inf }
 0xf3e   : > { %v7054_v10 = vpop.f32.mrf.mxu0 }
 0xf46   : > { %v7056_v11 = vpop.f32.mrf.mxu0 }
 0xf4e   : > { %v7058_v49 = vpop.f32.mrf.mxu0 }
 0xf50   : > { %v3228_v43 = vpop.xlane.xlu1 %3227 }
 0xf51   : > { %v3235_v13 = vsub.f32 %v3218_v59, %v3228_v43 }
 0xf53   : > { %v3238_v34 = vmul.f32 1.442695, %v3235_v13 }
 0xf55   : > { %5344 = vpow2.f32 %v3238_v34 }
 0xf56   : > { %v3660_v41 = vpop.f32.mrf.mxu0 }
 0xf57   : > { %v3661_v12 = vadd.f32 %v3660_v41, %v6427_v53 }
 0xf58   : > { %v3231_v0 = vpop.xlane.xlu0 %3230 }
 0xf59   : > { %v3236_v63 = vsub.f32 %v3221_v4, %v3231_v0  ;;  %v3669_v21 = vsel %vm1349_vm8, %v3661_v12, -inf }
 0xf5a   : > { %3670 = vmax.xlane.f32.xlu0 %v3669_v21 }
 0xf5b   : > { %v7062_v37 = vpop.eup %5344  ;;  %v3240_v55 = vmul.f32 1.442695, %v3236_v63 }
 0xf5c   : > { %v3244_v20 = vsel %vm1349_vm8, %v7062_v37, 0.0 }
 0xf5d   : > { %5346 = vpow2.f32 %v3240_v55  ;;  %3245 = vadd.xlane.f32.xlu2 %v3244_v20 }
 0xf5e   : > { %v3663_v32 = vpop.f32.mrf.mxu0 }
 0xf5f   : > { %v7094_v52 = vadd.f32 %v3663_v32, %v6427_v53 }
 0xf60   : > { %v3234_v28 = vpop.xlane.xlu2 %3233 }
 0xf61   : > { %v3237_v30 = vsub.f32 %v3224_v26, %v3234_v28 }
 0xf63   : > { %v7066_v18 = vpop.eup %5346  ;;  %v3242_v22 = vmul.f32 1.442695, %v3237_v30 }
 0xf64   : > { %v3247_v60 = vsel %vm1349_vm8, %v7066_v18, 0.0 }
 0xf65   : > { %5348 = vpow2.f32 %v3242_v22  ;;  %3248 = vadd.xlane.f32.xlu1 %v3247_v60 }
 0xf66   : > { %v3666_v47 = vpop.f32.mrf.mxu0 }
 0xf67   : > { %v7097_v17 = vadd.f32 %v3666_v47, %v6427_v53 }
 0xf68   : > { %v3467_v25 = vpop.xlane.xlu1 %3466 }
 0xf69   : > { %v3474_v31 = vsub.f32 %v3457_v6, %v3467_v25  ;;  %v3675_v9 = vsel %vm1349_vm8, %v7097_v17, -inf }
 0xf6b   : > { %v7070_v5 = vpop.eup %5348  ;;  %v3477_v44 = vmul.f32 1.442695, %v3474_v31 }
 0xf6c   : > { %v3250_v50 = vsel %vm1349_vm8, %v7070_v5, 0.0 }
 0xf6d   : > { %5350 = vpow2.f32 %v3477_v44  ;;  %3251 = vadd.xlane.f32.xlu2 %v3250_v50 }
 0xf6e   : > { %5182 = vrot.lane.b32.xlu0 %v6970_v57, %s5983_s10 }
 0xf73   : > { %v7076_v56 = vpop.eup %5350 }
 0xf74   : > { %v3483_v48 = vsel %vm1349_vm8, %v7076_v56, 0.0 }
 0xf75   : > { %3484 = vadd.xlane.f32.xlu2 %v3483_v48 }
 0xf76   : > { %5187 = vrot.lane.b32.xlu0 %v6970_v57, %s5984_s12 }
 0xf7e   : > { %3537 = vrot.lane.b32.xlu0 %v6972_v15, %s5984_s12  ;;  %3301 = vrot.lane.b32.xlu1 %v6972_v15, %s5983_s10  ;;  %s7536_s10 = sld [smem:[#allocation59_spill]] }
 0xf84   : > { %s4569_s12 = scalar_lea.hbm %s7536_s10, %s4979_s17  ;;  %s5846_s16 = scalar_lea.hbm %s7536_s10, 48 }
 0xf86   : > { %3741 = vrot.lane.b32.xlu1 %v6972_v15, %s5985_s30  ;;  %v3672_v15 = vsel %vm1349_vm8, %v7094_v52, -inf }
 0xfa8   : > { %3469 = vmax.xlane.f32.xlu0 %v3468_v35 }
 0xfb0   : > { %3676 = vmax.xlane.f32.xlu0 %v3675_v9  ;;  %3673 = vmax.xlane.f32.xlu1 %v3672_v15 }
 0xfcd   : > { %v3671_v62 = vpop.xlane.xlu0 %3670 }
 0xfce   : > { %v3678_v24 = vsub.f32 %v3661_v12, %v3671_v62 }
 0xfd0   : > { %v3681_v39 = vmul.f32 1.442695, %v3678_v24  ;;  %v3246_v38 = vpop.xlane.xlu2 %3245 }
 0xfd1   : > { %5352 = vrcp.f32 %v3246_v38  ;;  %v3264_v29 = vand.u32 2147483648, %v3246_v38  ;;  %vm3258_vm10 = vweird.f32 %v3246_v38  ;;  %v3262_v6 = vand.u32 2147483647, %v3246_v38 }
 0xfd2   : > { %5354 = vpow2.f32 %v3681_v39 }
 0xfd3   : > { %v3265_v41 = vor.u32 1.1754944e-38, %v3264_v29  ;;  %vm3263_vm12 = vcmp.eq.f32.partialorder %v3262_v6, 8.507059e+37 }
 0xfd7   : > { %v5353_v16 = vpop.eup %5352 }
 0xfd8   : > { %v7103_v36 = vpop.eup %5354  ;;  %v3249_v2 = vpop.xlane.xlu1 %3248  ;;  %v3254_v14 = vmul.f32 %v5353_v16, %v3246_v38  ;;  %vm3259_vm9 = vweird.f32 %v5353_v16 }
 0xfd9   : > { %5356 = vrcp.f32 %v3249_v2  ;;  %v3687_v42 = vsel %vm1349_vm8, %v7103_v36, 0.0  ;;  %vm3260_vm11 = vmor %vm3258_vm10, %vm3259_vm9  ;;  %v3279_v20 = vand.u32 2147483648, %v3249_v2  ;;  %vm3273_vm14 = vweird.f32 %v3249_v2 }
 0xfda   : > { %3688 = vadd.xlane.f32.xlu2 %v3687_v42  ;;  %v3255_v33 = vsub.f32 1.0, %v3254_v14  ;;  %v3277_v28 = vand.u32 2147483647, %v3249_v2 }
 0xfdb   : > { %v3280_v50 = vor.u32 1.1754944e-38, %v3279_v20 }
 0xfdc   : > { %v3256_v27 = vmul.f32 %v5353_v16, %v3255_v33  ;;  %vm3278_vm0 = vcmp.eq.f32.partialorder %v3277_v28, 8.507059e+37 }
 0xfde   : > { %v3257_v23 = vadd.f32 %v5353_v16, %v3256_v27 }
 0xfdf   : > { %v5357_v59 = vpop.eup %5356 }
 0xfe0   : > { %v7107_v45 = vpop.xlane.xlu2 %3251  ;;  %v5183_v58 = vpop.permute.xlu0 %5182  ;;  %v3269_v4 = vmul.f32 %v5357_v59, %v3249_v2  ;;  %v3261_v43 = vsel %vm3260_vm11, %v5353_v16, %v3257_v23  ;;  %vm3274_vm13 = vweird.f32 %v5357_v59 }
 0xfe1   : > { %5358 = vrcp.f32 %v7107_v45  ;;  %v5184_v7 = vunpack.i.l.bf16 %v5183_v58  ;;  %v5185_v40 = vunpack.i.h.bf16 %v5183_v58  ;;  %v3266_v0 = vsel %vm3263_vm12, %v3265_v41, %v3261_v43  ;;  %vm3275_vm15 = vmor %vm3273_vm14, %vm3274_vm13  ;;  %v2927_v41 = vld [vmem:[#allocation14 + $0xa8] sm:$0xff] }
 0xfe2   : > { %v3270_v26 = vsub.f32 1.0, %v3269_v4  ;;  %v3267_v22 = vmul.f32 %v7062_v37, %v3266_v0  ;;  %v3294_v47 = vand.u32 2147483648, %v7107_v45  ;;  %vm3288_vm2 = vweird.f32 %v7107_v45  ;;  %v2926_v0 = vld [vmem:[#allocation14 + $0xa0] sm:$0xff] }
 0xfe3   : > { %3332 = vmatpush.msra.mxu1 %v5184_v7  ;;  %v3292_v9 = vand.u32 2147483647, %v7107_v45 }
 0xfe4   : > { %v3271_v13 = vmul.f32 %v5357_v59, %v3270_v26  ;;  %v3295_v24 = vor.u32 1.1754944e-38, %v3294_v47  ;;  %v2930_v47 = vld [vmem:[#allocation14 + $0xc0] sm:$0xff] }
 0xfe5   : > { %3333 = vmatpush.msra.mxu1 %v5185_v40  ;;  %vm3293_vm5 = vcmp.eq.f32.partialorder %v3292_v9, 8.507059e+37 }
 0xfe6   : > { %v3272_v63 = vadd.f32 %v5357_v59, %v3271_v13 }
 0xfe7   : > { %v5359_v19 = vpop.eup %5358 }
 0xfe8   : > { %v3485_v8 = vpop.xlane.xlu2 %3484  ;;  %v3284_v34 = vmul.f32 %v5359_v19, %v7107_v45  ;;  %v5188_v12 = vpop.permute.xlu0 %5187  ;;  %v3276_v44 = vsel %vm3275_vm15, %v5357_v59, %v3272_v63  ;;  %vm3289_vm1 = vweird.f32 %v5359_v19 }
 0xfe9   : > { %5360 = vrcp.f32 %v3485_v8  ;;  %v5189_v60 = vunpack.i.l.bf16 %v5188_v12  ;;  %v5190_v48 = vunpack.i.h.bf16 %v5188_v12  ;;  %v3281_v32 = vsel %vm3278_vm0, %v3280_v50, %v3276_v44  ;;  %vm3290_vm3 = vmor %vm3288_vm2, %vm3289_vm1  ;;  %v3462_v45 = vpop.f32.mrf.mxu3 }
 0xfea   : > { %v3285_v21 = vsub.f32 1.0, %v3284_v34  ;;  %v3282_v15 = vmul.f32 %v7066_v18, %v3281_v32  ;;  %v3503_v16 = vand.u32 2147483648, %v3485_v8  ;;  %vm3497_vm7 = vweird.f32 %v3485_v8  ;;  %v2928_v34 = vld [vmem:[#allocation14 + $0xb0] sm:$0xff] }
 0xfeb   : > { %v3501_v2 = vand.u32 2147483647, %v3485_v8  ;;  %v7125_v58 = vadd.f32 %v3462_v45, %v6427_v53 }
 0xfec   : > { %v3286_v25 = vmul.f32 %v5359_v19, %v3285_v21  ;;  %v3504_v18 = vor.u32 1.1754944e-38, %v3503_v16 }
 0xfed   : > { %vm3502_vm10 = vcmp.eq.f32.partialorder %v3501_v2, 8.507059e+37  ;;  %v3471_v4 = vsel %vm1349_vm8, %v7125_v58, -inf }
 0xfee   : > { %v3287_v61 = vadd.f32 %v5359_v19, %v3286_v25 }
 0xfef   : > { %v5361_v55 = vpop.eup %5360 }
 0xff0   : > { %v3302_v30 = vpop.permute.xlu1 %3301  ;;  %v3493_v31 = vmul.f32 %v5361_v55, %v3485_v8  ;;  %v3538_v35 = vpop.permute.xlu0 %3537  ;;  %vm3498_vm6 = vweird.f32 %v5361_v55 }
 0xff1   : > { %3334 = vmatpush.msra.mxu1 %v3302_v30  ;;  %vm3499_vm9 = vmor %vm3497_vm7, %vm3498_vm6 }
 0xff2   : > { %4920 = vmatmul.msk.f32.vlgmr.msra.gmra.mxu1 %vm1349_vm8, %v3267_v22  ;;  %5192 = vrot.lane.b32.xlu2 %v6970_v57, %s5985_s30  ;;  %v3494_v37 = vsub.f32 1.0, %v3493_v31  ;;  %v3291_v57 = vsel %vm3290_vm3, %v5359_v19, %v3287_v61  ;;  %v2933_v61 = vld [vmem:[#allocation14 + $0xd8] sm:$0xff]  ;;  %s4572_s30 = sshll.u32 %s4569_s12, 4  ;;  %s4573_s30 = int_to_ptr.hbm [resolvable:$true] %s4572_s30 }
 0xff3   : > { %3568 = vmatpush.msrb.mxu1 %v5189_v60  ;;  %v3296_v39 = vsel %vm3293_vm5, %v3295_v24, %v3291_v57  ;;  %s5840_s7 = sshra.s32 %s4573_s30, 4  ;;  %s5841_s7 = int_to_ptr.hbm [resolvable:$true] %s5840_s7 }
 0xff4   : > { %v3495_v62 = vmul.f32 %v5361_v55, %v3494_v37  ;;  %v3297_v14 = vmul.f32 %v7070_v5, %v3296_v39  ;;  %v2932_v37 = vld [vmem:[#allocation14 + $0xd0] sm:$0xff]  ;;  %s5842_s9 = scalar_lea.hbm %s5841_s7, 24  ;;  %p5847_p7 = scmp.lt.s32.totalorder %s5841_s7, %s7536_s10 }
 0xff5   : > { %3569 = vmatpush.msrb.mxu1 %v5190_v48  ;;  %p5843_p9 = scmp.ne.s32.totalorder %s5841_s7, %s5842_s9  ;;  %p5848_p10 = scmp.lt.s32.totalorder %s5846_s16, %s5842_s9 }
 0xff6   : > { %v3496_v38 = vadd.f32 %v5361_v55, %v3495_v62 }
 0xff7   : > { %3570 = vmatpush.msrb.mxu1 %v3538_v35  ;;  %v2931_v35 = vld [vmem:[#allocation14 + $0xc8] sm:$0xff]  ;;  %p5844_p4 = pnand %p5843_p9, %p6188_p0  ;;  %p5849_p6 = por %p5848_p10, %p5847_p7 }
 0xff8   : > { %v3500_v42 = vsel %vm3499_vm9, %v5361_v55, %v3496_v38  ;;  %v3742_v27 = vpop.permute.xlu1 %3741 }
 0xff9   : > { %v3505_v33 = vsel %vm3502_vm10, %v3504_v18, %v3500_v42  ;;  %p5845_p1 = pneg %p5844_p4 }
 0xffa   : > { %4921 = vmatmul.msk.f32.gmra.mxu1 %vm1349_vm8, %v3282_v15  ;;  %v3506_v59 = vmul.f32 %v7076_v56, %v3505_v33 }
 0xffb   : > { %p5850_p13 = pnand %p5849_p6, %p5845_p1 }
0x1002   : > { %4922 = vmatmul.msk.f32.gmra.mxu1 %vm1349_vm8, %v3297_v14 }
0x100a   : > { %4935 = vmatmul.msk.f32.vlgmr.msrb.gmra.mxu1 %vm1349_vm8, %v3506_v59 }
0x101b   : > { %v3470_v5 = vpop.xlane.xlu0 %3469  ;;  %3472 = vmax.xlane.f32.xlu2 %v3471_v4 }
0x101c   : > { %v3475_v7 = vsub.f32 %v7089_v3, %v3470_v5 }
0x101e   : > { %v3479_v40 = vmul.f32 1.442695, %v3475_v7 }
0x1020   : > { %5362 = vpow2.f32 %v3479_v40 }
0x1023   : > { %v3674_v23 = vpop.xlane.xlu1 %3673  ;;  %v3677_v26 = vpop.xlane.xlu0 %3676 }
0x1024   : > { %v3679_v56 = vsub.f32 %v7094_v52, %v3674_v23  ;;  %v3680_v19 = vsub.f32 %v7097_v17, %v3677_v26  ;;  %v2929_v17 = vld [vmem:[#allocation14 + $0xb8] sm:$0xff] }
0x1025   : > { %3366 = vmatpush.msrb.mxu2 %v2929_v17 }
0x1026   : > { %v7132_v29 = vpop.eup %5362  ;;  %v3683_v53 = vmul.f32 1.442695, %v3679_v56  ;;  %v3685_v6 = vmul.f32 1.442695, %v3680_v19 }
0x1027   : > { %v3486_v8 = vsel %vm1349_vm8, %v7132_v29, 0.0  ;;  %3367 = vmatpush.msrb.mxu2 %v2928_v34 }
0x1028   : > { %5364 = vpow2.f32 %v3683_v53  ;;  %3487 = vadd.xlane.f32.xlu1 %v3486_v8 }
0x1029   : > { %5366 = vpow2.f32 %v3685_v6  ;;  %3368 = vmatpush.msrb.mxu2 %v2927_v41 }
0x102b   : > { %3369 = vmatpush.msrb.mxu2 %v2926_v0 }
0x102d   : > { %3602 = vmatpush.msra.mxu2 %v2933_v61 }
0x102e   : > { %v7136_v43 = vpop.eup %5364 }
0x102f   : > { %v7138_v3 = vpop.eup %5366  ;;  %v3690_v13 = vsel %vm1349_vm8, %v7136_v43, 0.0  ;;  %3603 = vmatpush.msra.mxu2 %v2932_v37 }
0x1030   : > { %3691 = vadd.xlane.f32.xlu0 %v3690_v13  ;;  %v3693_v52 = vsel %vm1349_vm8, %v7138_v3, 0.0 }
0x1031   : > { %3694 = vadd.xlane.f32.xlu2 %v3693_v52  ;;  %3604 = vmatpush.msra.mxu2 %v2931_v35 }
0x1033   : > { %3605 = vmatpush.msra.mxu2 %v2930_v47 }
0x104d   : > { %v3689_v12 = vpop.xlane.xlu2 %3688 }
0x104e   : > { %5368 = vrcp.f32 %v3689_v12  ;;  %v3707_v30 = vand.u32 2147483648, %v3689_v12  ;;  %v3705_v25 = vand.u32 2147483647, %v3689_v12  ;;  %vm3701_vm12 = vweird.f32 %v3689_v12 }
0x1050   : > { %v3708_v44 = vor.u32 1.1754944e-38, %v3707_v30  ;;  %vm3706_vm14 = vcmp.eq.f32.partialorder %v3705_v25, 8.507059e+37  ;;  %v2937_v25 = vld [vmem:[#allocation14 + $0xf8] sm:$0xff] }
0x1051   : > { %3806 = vmatpush.msra.mxu1 %v2937_v25  ;;  %v3963_v25 = vld [vmem:[#allocation20 + $0x3a0] sm:$0xff] }
0x1054   : > { %v5369_v63 = vpop.eup %5368 }
0x1055   : > { %v3697_v21 = vmul.f32 %v5369_v63, %v3689_v12  ;;  %v5193_v55 = vpop.permute.xlu2 %5192  ;;  %vm3702_vm11 = vweird.f32 %v5369_v63 }
0x1056   : > { %v5194_v20 = vunpack.i.l.bf16 %v5193_v55  ;;  %v5195_v22 = vunpack.i.h.bf16 %v5193_v55  ;;  %vm3703_vm13 = vmor %vm3701_vm12, %vm3702_vm11 }
0x1057   : > { %v3698_v28 = vsub.f32 1.0, %v3697_v21 }
0x1058   : > { %3772 = vmatpush.msrb.mxu3 %v5194_v20 }
0x1059   : > { %v3699_v60 = vmul.f32 %v5369_v63, %v3698_v28 }
0x105a   : > { %3773 = vmatpush.msrb.mxu3 %v5195_v22 }
0x105b   : > { %v3700_v31 = vadd.f32 %v5369_v63, %v3699_v60 }
0x105c   : > { %3774 = vmatpush.msrb.mxu3 %v3742_v27 }
0x105d   : > { %v3704_v50 = vsel %vm3703_vm13, %v5369_v63, %v3700_v31  ;;  %v2936_v31 = vld [vmem:[#allocation14 + $0xf0] sm:$0xff] }
0x105e   : > { %v3709_v48 = vsel %vm3706_vm14, %v3708_v44, %v3704_v50  ;;  %v2935_v44 = vld [vmem:[#allocation14 + $0xe8] sm:$0xff]  ;;  %3807 = vmatpush.msra.mxu1 %v2936_v31  ;;  %v2934_v50 = vld [vmem:[#allocation14 + $0xe0] sm:$0xff] }
0x105f   : > { %v3710_v32 = vmul.f32 %v7103_v36, %v3709_v48  ;;  %v3964_v31 = vld [vmem:[#allocation20 + $0x3a8] sm:$0xff] }
0x1060   : > { %3808 = vmatpush.msra.mxu1 %v2935_v44  ;;  %v3965_v44 = vld [vmem:[#allocation20 + $0x3b0] sm:$0xff] }
0x1061   : > { %4947 = vmatmul.msk.f32.vlgmr.msrb.gmra.mxu3 %vm1349_vm8, %v3710_v32 }
0x1062   : > { %3809 = vmatpush.msra.mxu1 %v2934_v50  ;;  %v3959_v50 = vld [vmem:[#allocation20 + $0x380] sm:$0xff] }
0x106f   : > { %v3336_v9 = vpop.f32.mrf.mxu1 }
0x1070   : > { %4923 = vmatmul.msk.f32.vlgmr.msrb.gmra.mxu2 %vm1304_vm4, %v3336_v9 }
0x1077   : > { %v3339_v15 = vpop.f32.mrf.mxu1 }
0x1078   : > { %4924 = vmatmul.msk.f32.gmra.mxu2 %vm1304_vm4, %v3339_v15 }
0x107f   : > { %v3342_v62 = vpop.f32.mrf.mxu1 }
0x1080   : > { %4925 = vmatmul.msk.f32.gmra.mxu2 %vm1304_vm4, %v3342_v62 }
0x1087   : > { %v3572_v36 = vpop.f32.mrf.mxu1 }
0x1088   : > { %4938 = vmatmul.msk.f32.vlgmr.msra.gmra.mxu2 %vm1304_vm4, %v3572_v36 }
0x108e   : > { %v3473_v57 = vpop.xlane.xlu2 %3472 }
0x108f   : > { %v3476_v24 = vsub.f32 %v7125_v58, %v3473_v57 }
0x1091   : > { %v3481_v39 = vmul.f32 1.442695, %v3476_v24 }
0x1093   : > { %5370 = vpow2.f32 %v3481_v39 }
0x1099   : > { %v7151_v38 = vpop.eup %5370 }
0x109a   : > { %v3489_v16 = vsel %vm1349_vm8, %v7151_v38, 0.0 }
0x109b   : > { %v3488_v2 = vpop.xlane.xlu1 %3487  ;;  %3490 = vadd.xlane.f32.xlu1 %v3489_v16 }
0x109c   : > { %5372 = vrcp.f32 %v3488_v2  ;;  %v3518_v45 = vand.u32 2147483648, %v3488_v2  ;;  %v3516_v58 = vand.u32 2147483647, %v3488_v2  ;;  %vm3512_vm0 = vweird.f32 %v3488_v2 }
0x109e   : > { %v3519_v7 = vor.u32 1.1754944e-38, %v3518_v45  ;;  %vm3517_vm2 = vcmp.eq.f32.partialorder %v3516_v58, 8.507059e+37  ;;  %v5206_v58 = vld [vmem:[#allocation15 + $0x1] ss:$0 sm:$0xff] }
0x10a2   : > { %v5373_v14 = vpop.eup %5372 }
0x10a3   : > { %v3508_v42 = vmul.f32 %v5373_v14, %v3488_v2  ;;  %v3692_v18 = vpop.xlane.xlu0 %3691  ;;  %vm3513_vm15 = vweird.f32 %v5373_v14 }
0x10a4   : > { %v3695_v33 = vpop.xlane.xlu2 %3694  ;;  %5374 = vrcp.f32 %v3692_v18  ;;  %vm3514_vm1 = vmor %vm3512_vm0, %vm3513_vm15  ;;  %v3722_v13 = vand.u32 2147483648, %v3692_v18  ;;  %v3720_v17 = vand.u32 2147483647, %v3692_v18  ;;  %vm3716_vm5 = vweird.f32 %v3692_v18 }
0x10a5   : > { %v3509_v59 = vsub.f32 1.0, %v3508_v42  ;;  %5376 = vrcp.f32 %v3695_v33  ;;  %v3737_v21 = vand.u32 2147483648, %v3695_v33  ;;  %vm3731_vm10 = vweird.f32 %v3695_v33 }
0x10a6   : > { %v3723_v12 = vor.u32 1.1754944e-38, %v3722_v13  ;;  %vm3721_vm9 = vcmp.eq.f32.partialorder %v3720_v17, 8.507059e+37  ;;  %v3967_v13 = vld [vmem:[#allocation20 + $0x3c0] sm:$0xff]  ;;  %v3970_v17 = vld [vmem:[#allocation20 + $0x3d8] sm:$0xff] }
0x10a7   : > { %v3510_v27 = vmul.f32 %v5373_v14, %v3509_v59  ;;  %v3738_v30 = vor.u32 1.1754944e-38, %v3737_v21 }
0x10a9   : > { %v3511_v4 = vadd.f32 %v5373_v14, %v3510_v27 }
0x10aa   : > { %v5375_v5 = vpop.eup %5374 }
0x10ab   : > { %v5377_v40 = vpop.eup %5376  ;;  %v3712_v23 = vmul.f32 %v5375_v5, %v3692_v18  ;;  %v3515_v26 = vsel %vm3514_vm1, %v5373_v14, %v3511_v4  ;;  %vm3717_vm3 = vweird.f32 %v5375_v5 }
0x10ac   : > { %v3727_v56 = vmul.f32 %v5377_v40, %v3695_v33  ;;  %v3520_v19 = vsel %vm3517_vm2, %v3519_v7, %v3515_v26  ;;  %vm3718_vm6 = vmor %vm3716_vm5, %vm3717_vm3  ;;  %vm3732_vm7 = vweird.f32 %v5377_v40 }
0x10ad   : > { %v3713_v53 = vsub.f32 1.0, %v3712_v23  ;;  %v3521_v6 = vmul.f32 %v7132_v29, %v3520_v19  ;;  %v3735_v29 = vand.u32 2147483647, %v3695_v33  ;;  %vm3733_vm11 = vmor %vm3731_vm10, %vm3732_vm7 }
0x10ae   : > { %v3728_v8 = vsub.f32 1.0, %v3727_v56 }
0x10af   : > { %v3714_v52 = vmul.f32 %v5375_v5, %v3713_v53  ;;  %4936 = vmatmul.msk.f32.gmra.mxu1 %vm1349_vm8, %v3521_v6  ;;  %vm3736_vm12 = vcmp.eq.f32.partialorder %v3735_v29, 8.507059e+37  ;;  %v3972_v6 = vld [vmem:[#allocation20 + $0x3e8] sm:$0xff] }
0x10b0   : > { %v3729_v34 = vmul.f32 %v5377_v40, %v3728_v8  ;;  %v3973_v8 = vld [vmem:[#allocation20 + $0x3f0] sm:$0xff]  ;;  %4012 = vmatpush.msra.mxu0 %v3972_v6  ;;  %v3928_v6 = vld [vmem:[#allocation20 + $0x288] sm:$0xff] }
0x10b1   : > { %v3715_v41 = vadd.f32 %v5375_v5, %v3714_v52  ;;  %v3968_v52 = vld [vmem:[#allocation20 + $0x3c8] sm:$0xff]  ;;  %4038 = vmatpush.msra.mxu3 %v3973_v8  ;;  %v3929_v8 = vld [vmem:[#allocation20 + $0x290] sm:$0xff] }
0x10b2   : > { %v3730_v0 = vadd.f32 %v5377_v40, %v3729_v34  ;;  %4013 = vmatpush.msra.mxu0 %v3968_v52 }
0x10b3   : > { %v3719_v63 = vsel %vm3718_vm6, %v5375_v5, %v3715_v41 }
0x10b4   : > { %v3724_v55 = vsel %vm3721_vm9, %v3723_v12, %v3719_v63  ;;  %v3734_v28 = vsel %vm3733_vm11, %v5377_v40, %v3730_v0  ;;  %4014 = vmatpush.msra.mxu0 %v3964_v31 }
0x10b5   : > { %v3725_v20 = vmul.f32 %v7136_v43, %v3724_v55  ;;  %v3739_v22 = vsel %vm3736_vm12, %v3738_v30, %v3734_v28 }
0x10b6   : > { %v3740_v60 = vmul.f32 %v7138_v3, %v3739_v22 }
0x10b7   : > { %4948 = vmatmul.msk.f32.gmra.mxu3 %vm1349_vm8, %v3725_v20 }
0x10bf   : > { %4949 = vmatmul.msk.f32.gmra.mxu3 %vm1349_vm8, %v3740_v60 }
0x10e4   : > { %v3776_v57 = vpop.f32.mrf.mxu3 }
0x10f3   : > { %v3371_v2 = vpop.f32.mrf.mxu2 }
0x10f4   : > { %v3407_v33 = vadd.f32 %v7054_v10, %v3371_v2  ;;  %v3971_v10 = vld [vmem:[#allocation20 + $0x3e0] sm:$0xff]  ;;  %v3944_v2 = vld [vmem:[#allocation20 + $0x308] sm:$0xff] }
0x10f5   : > { %3986 = vmatpush.msrb.mxu2 %v3971_v10  ;;  %v3927_v10 = vld [vmem:[#allocation20 + $0x280] sm:$0xff] }
0x10f7   : > { %3987 = vmatpush.msrb.mxu2 %v3967_v13  ;;  %v3930_v13 = vld [vmem:[#allocation20 + $0x298] sm:$0xff] }
0x10f9   : > { %3988 = vmatpush.msrb.mxu2 %v3963_v25  ;;  %v3911_v25 = vld [vmem:[#allocation20 + $0x200] sm:$0xff] }
0x10fb   : > { %v3374_v14 = vpop.f32.mrf.mxu2  ;;  %3989 = vmatpush.msrb.mxu2 %v3959_v50  ;;  %v3914_v50 = vld [vmem:[#allocation20 + $0x218] sm:$0xff] }
0x10fc   : > { %v3410_v40 = vadd.f32 %v7056_v11, %v3374_v14  ;;  %v3969_v11 = vld [vmem:[#allocation20 + $0x3d0] sm:$0xff] }
0x10fd   : > { %4039 = vmatpush.msra.mxu3 %v3969_v11  ;;  %v3945_v14 = vld [vmem:[#allocation20 + $0x310] sm:$0xff]  ;;  %v3923_v11 = vld [vmem:[#allocation20 + $0x260] sm:$0xff] }
0x10ff   : > { %4040 = vmatpush.msra.mxu3 %v3965_v44  ;;  %v3912_v44 = vld [vmem:[#allocation20 + $0x208] sm:$0xff] }
0x1103   : > { %v3377_v42 = vpop.f32.mrf.mxu2 }
0x1104   : > { %v3413_v34 = vadd.f32 %v7058_v49, %v3377_v42  ;;  %v3946_v42 = vld [vmem:[#allocation20 + $0x318] sm:$0xff] }
0x110e   : > { %v3491_v43 = vpop.xlane.xlu1 %3490 }
0x110f   : > { %5378 = vrcp.f32 %v3491_v43  ;;  %v3533_v37 = vand.u32 2147483648, %v3491_v43  ;;  %v3531_v47 = vand.u32 2147483647, %v3491_v43  ;;  %vm3527_vm14 = vweird.f32 %v3491_v43 }
0x1111   : > { %v3534_v9 = vor.u32 1.1754944e-38, %v3533_v37  ;;  %vm3532_vm0 = vcmp.eq.f32.partialorder %v3531_v47, 8.507059e+37  ;;  %v3956_v37 = vld [vmem:[#allocation20 + $0x368] sm:$0xff]  ;;  %v3958_v47 = vld [vmem:[#allocation20 + $0x378] sm:$0xff] }
0x1115   : > { %v5379_v48 = vpop.eup %5378 }
0x1116   : > { %v3523_v32 = vmul.f32 %v5379_v48, %v3491_v43  ;;  %vm3528_vm13 = vweird.f32 %v5379_v48  ;;  %v3960_v43 = vld [vmem:[#allocation20 + $0x388] sm:$0xff] }
0x1117   : > { %vm3529_vm15 = vmor %vm3527_vm14, %vm3528_vm13  ;;  %4015 = vmatpush.msra.mxu0 %v3960_v43 }
0x1118   : > { %v3524_v61 = vsub.f32 1.0, %v3523_v32  ;;  %v3962_v32 = vld [vmem:[#allocation20 + $0x398] sm:$0xff] }
0x1119   : > { %4016 = vmatpush.msra.mxu0 %v3956_v37 }
0x111a   : > { %v3525_v35 = vmul.f32 %v5379_v48, %v3524_v61  ;;  %v3955_v61 = vld [vmem:[#allocation20 + $0x360] sm:$0xff] }
0x111b   : > { %3990 = vmatpush.msrb.mxu2 %v3955_v61 }
0x111c   : > { %v3526_v3 = vadd.f32 %v5379_v48, %v3525_v35  ;;  %v3957_v35 = vld [vmem:[#allocation20 + $0x370] sm:$0xff] }
0x111e   : > { %v3530_v15 = vsel %vm3529_vm15, %v5379_v48, %v3526_v3  ;;  %v3961_v48 = vld [vmem:[#allocation20 + $0x390] sm:$0xff]  ;;  %v3951_v3 = vld [vmem:[#allocation20 + $0x340] sm:$0xff] }
0x111f   : > { %v3535_v62 = vsel %vm3532_vm0, %v3534_v9, %v3530_v15  ;;  %4041 = vmatpush.msra.mxu3 %v3961_v48  ;;  %v3952_v9 = vld [vmem:[#allocation20 + $0x348] sm:$0xff]  ;;  %v3953_v15 = vld [vmem:[#allocation20 + $0x350] sm:$0xff]  ;;  %3991 = vmatpush.msrb.mxu2 %v3951_v3 }
0x1120   : > { %v3536_v36 = vmul.f32 %v7151_v38, %v3535_v62  ;;  %v3607_v38 = vpop.f32.mrf.mxu2  ;;  %4017 = vmatpush.msra.mxu0 %v3952_v9  ;;  %v3954_v62 = vld [vmem:[#allocation20 + $0x358] sm:$0xff] }
0x1121   : > { %v3616_v59 = vadd.f32 %v3607_v38, %v3407_v33  ;;  %4042 = vmatpush.msra.mxu3 %v3957_v35  ;;  %v3940_v38 = vld [vmem:[#allocation20 + $0x2e8] sm:$0xff]  ;;  %v3941_v33 = vld [vmem:[#allocation20 + $0x2f0] sm:$0xff] }
0x1122   : > { %4937 = vmatmul.msk.f32.gmra.mxu1 %vm1349_vm8, %v3536_v36  ;;  %v3947_v36 = vld [vmem:[#allocation20 + $0x320] sm:$0xff] }
0x1123   : > { %4043 = vmatpush.msra.mxu3 %v3953_v15  ;;  %3992 = vmatpush.msrb.mxu2 %v3947_v36  ;;  %v7203_v15 = vld [vmem:[#allocation17 + $0x1] ss:$0 sm:$0xff] }
0x112a   : > { %4950 = vmatmul.msk.f32.vlgmr.msra.gmra.mxu1 %vm1304_vm4, %v3776_v57  ;;  %v3948_v57 = vld [vmem:[#allocation20 + $0x328] sm:$0xff] }
0x112b   : > { %4018 = vmatpush.msra.mxu0 %v3948_v57  ;;  %v7206_v57 = vld [vmem:[#allocation18 + $0x1] ss:$0 sm:$0xff] }
0x112c   : > { %v3575_v24 = vpop.f32.mrf.mxu1 }
0x112d   : > { %4939 = vmatmul.msk.f32.gmra.mxu2 %vm1304_vm4, %v3575_v24  ;;  %v3949_v24 = vld [vmem:[#allocation20 + $0x330] sm:$0xff]  ;;  %4019 = vmatpush.msra.mxu0 %v3944_v2 }
0x112e   : > { %4044 = vmatpush.msra.mxu3 %v3949_v24 }
0x112f   : > { %4020 = vmatpush.msra.mxu0 %v3940_v38 }
0x1130   : > { %4045 = vmatpush.msra.mxu3 %v3945_v14 }
0x1132   : > { %4046 = vmatpush.msra.mxu3 %v3941_v33 }
0x113a   : > { %v3779_v39 = vpop.f32.mrf.mxu3 }
0x113b   : > { %4951 = vmatmul.msk.f32.gmra.mxu1 %vm1304_vm4, %v3779_v39  ;;  %v3950_v39 = vld [vmem:[#allocation20 + $0x338] sm:$0xff] }
0x1142   : > { %v3782_v16 = vpop.f32.mrf.mxu3 }
0x1143   : > { %4952 = vmatmul.msk.f32.gmra.mxu1 %vm1304_vm4, %v3782_v16  ;;  %v3943_v16 = vld [vmem:[#allocation20 + $0x300] sm:$0xff] }
0x1144   : > { %3993 = vmatpush.msrb.mxu2 %v3943_v16 }
0x119f   : > { %v3578_v18 = vpop.f32.mrf.mxu1 }
0x11a0   : > { %4940 = vmatmul.msk.f32.gmra.mxu2 %vm1304_vm4, %v3578_v18  ;;  %v3939_v18 = vld [vmem:[#allocation20 + $0x2e0] sm:$0xff] }
0x11a1   : > { %3994 = vmatpush.msrb.mxu2 %v3939_v18 }
0x11a7   : > { %v3811_v45 = vpop.f32.mrf.mxu1 }
0x11a8   : > { %v3820_v27 = vadd.f32 %v3811_v45, %v3616_v59  ;;  %v3942_v59 = vld [vmem:[#allocation20 + $0x2f8] sm:$0xff]  ;;  %v3935_v45 = vld [vmem:[#allocation20 + $0x2c0] sm:$0xff] }
0x11a9   : > { %3995 = vmatpush.msrb.mxu2 %v3935_v45 }
0x11aa   : > { %v3823_v4 = vadd.f32 %v3820_v27, %v6925_v46  ;;  %v3974_v46 = vld [vmem:[#allocation20 + $0x3f8] sm:$0xff]  ;;  %v3936_v27 = vld [vmem:[#allocation20 + $0x2c8] sm:$0xff] }
0x11ab   : > { %4064 = vmatpush.msrb.mxu1 %v3974_v46  ;;  %4021 = vmatpush.msra.mxu0 %v3936_v27 }
0x11ac   : > { %v7170_v5 = vadd.f32 %v5206_v58, %v3823_v4  ;;  %v3938_v4 = vld [vmem:[#allocation20 + $0x2d8] sm:$0xff] }
0x11ad   : > { %4065 = vmatpush.msrb.mxu1 %v3970_v17  ;;  %v3924_v17 = vld [vmem:[#allocation20 + $0x268] sm:$0xff] }
0x11ae   : > { %3838 = vadd.xlane.f32.xlu0 %v7170_v5 }
0x11b0   : > { %v3610_v7 = vpop.f32.mrf.mxu2 }
0x11b1   : > { %v3617_v23 = vadd.f32 %v3610_v7, %v3410_v40  ;;  %v3931_v40 = vld [vmem:[#allocation20 + $0x2a0] sm:$0xff] }
0x11b2   : > { %3996 = vmatpush.msrb.mxu2 %v3931_v40 }
0x11b4   : > { %3997 = vmatpush.msrb.mxu2 %v3927_v10  ;;  %v4405_v10 = vld [vmem:[#allocation21 + $0x3f0] sm:$0xff] }
0x11b6   : > { %3998 = vmatpush.msrb.mxu2 %v3923_v11  ;;  %v4371_v11 = vld [vmem:[#allocation21 + $0x2e0] sm:$0xff] }
0x11b8   : > { %v3814_v26 = vpop.f32.mrf.mxu1 }
0x11b9   : > { %v3821_v56 = vadd.f32 %v3814_v26, %v3617_v23  ;;  %v3932_v23 = vld [vmem:[#allocation20 + $0x2a8] sm:$0xff]  ;;  %v3933_v26 = vld [vmem:[#allocation20 + $0x2b0] sm:$0xff] }
0x11ba   : > { %4022 = vmatpush.msra.mxu0 %v3932_v23 }
0x11bb   : > { %v3824_v19 = vadd.f32 %v3821_v56, %v6929_v1 }
0x11bc   : > { %4023 = vmatpush.msra.mxu0 %v3928_v6 }
0x11bd   : > { %v7175_v53 = vadd.f32 %v5206_v58, %v3824_v19  ;;  %v3934_v19 = vld [vmem:[#allocation20 + $0x2b8] sm:$0xff] }
0x11be   : > { %4024 = vmatpush.msra.mxu0 %v3924_v17  ;;  %v4390_v17 = vld [vmem:[#allocation21 + $0x378] sm:$0xff] }
0x11bf   : > { %3840 = vadd.xlane.f32.xlu2 %v7175_v53 }
0x11c0   : > { %v3817_v21 = vpop.f32.mrf.mxu1 }
0x1221   : > { %v3839_v1 = vpop.xlane.xlu0 %3838 }
0x1222   : > { %v3844_v41 = vmul.f32 %v3839_v1, %v6351_v51  ;;  %v3925_v1 = vld [vmem:[#allocation20 + $0x270] sm:$0xff] }
0x1223   : > { %v3613_v12 = vpop.f32.mrf.mxu2 }
0x1224   : > { %v7181_v0 = vsub.f32 %v7170_v5, %v3844_v41  ;;  %v3618_v63 = vadd.f32 %v3613_v12, %v3413_v34  ;;  %v3926_v41 = vld [vmem:[#allocation20 + $0x278] sm:$0xff]  ;;  %v3919_v12 = vld [vmem:[#allocation20 + $0x240] sm:$0xff] }
0x1225   : > { %3999 = vmatpush.msrb.mxu2 %v3919_v12  ;;  %v4357_v12 = vld [vmem:[#allocation21 + $0x270] sm:$0xff] }
0x1226   : > { %v3822_v55 = vadd.f32 %v3817_v21, %v3618_v63  ;;  %v3850_v29 = vmul.f32 %v7181_v0, %v7181_v0  ;;  %v3920_v63 = vld [vmem:[#allocation20 + $0x248] sm:$0xff]  ;;  %v3921_v21 = vld [vmem:[#allocation20 + $0x250] sm:$0xff] }
0x1227   : > { %4025 = vmatpush.msra.mxu0 %v3920_v63  ;;  %v4370_v63 = vld [vmem:[#allocation21 + $0x2d8] sm:$0xff] }
0x1228   : > { %v3825_v20 = vadd.f32 %v3822_v55, %v6933_v54  ;;  %3853 = vadd.xlane.f32.xlu1 %v3850_v29  ;;  %v3966_v54 = vld [vmem:[#allocation20 + $0x3b8] sm:$0xff] }
0x1229   : > { %4066 = vmatpush.msrb.mxu1 %v3966_v54  ;;  %v3922_v29 = vld [vmem:[#allocation20 + $0x258] sm:$0xff]  ;;  %v3913_v54 = vld [vmem:[#allocation20 + $0x210] sm:$0xff] }
0x122a   : > { %v7186_v28 = vadd.f32 %v5206_v58, %v3825_v20  ;;  %v3937_v58 = vld [vmem:[#allocation20 + $0x2d0] sm:$0xff]  ;;  %v3915_v20 = vld [vmem:[#allocation20 + $0x220] sm:$0xff] }
0x122b   : > { %4067 = vmatpush.msrb.mxu1 %v3962_v32  ;;  %4047 = vmatpush.msra.mxu3 %v3937_v58 }
0x122c   : > { %3842 = vadd.xlane.f32.xlu0 %v7186_v28  ;;  %4000 = vmatpush.msrb.mxu2 %v3915_v20  ;;  %v4402_v20 = vld [vmem:[#allocation21 + $0x3d8] sm:$0xff] }
0x122d   : > { %4068 = vmatpush.msrb.mxu1 %v3958_v47  ;;  %4048 = vmatpush.msra.mxu3 %v3933_v26  ;;  %v4374_v26 = vld [vmem:[#allocation21 + $0x2f8] sm:$0xff] }
0x122e   : > { %4001 = vmatpush.msrb.mxu2 %v3911_v25 }
0x122f   : > { %4069 = vmatpush.msrb.mxu1 %v3954_v62  ;;  %4049 = vmatpush.msra.mxu3 %v3929_v8  ;;  %v4372_v8 = vld [vmem:[#allocation21 + $0x2e8] sm:$0xff] }
0x1231   : > { %4070 = vmatpush.msrb.mxu1 %v3950_v39  ;;  %4050 = vmatpush.msra.mxu3 %v3925_v1  ;;  %v4953_v1 = vld [vmem:[%s7519_s19 + $0x4] sm:$0xf] }
0x1232   : > { %v3841_v49 = vpop.xlane.xlu2 %3840  ;;  %v7218_v25 = vperm.slane %v4953_v1, 1 }
0x1233   : > { %v3845_v30 = vmul.f32 %v3841_v49, %v6351_v51  ;;  %4071 = vmatpush.msrb.mxu1 %v3946_v42  ;;  %v3916_v49 = vld [vmem:[#allocation20 + $0x228] sm:$0xff]  ;;  %4051 = vmatpush.msra.mxu3 %v3921_v21  ;;  %v4389_v21 = vld [vmem:[#allocation21 + $0x370] sm:$0xff] }
0x1234   : > { %4026 = vmatpush.msra.mxu0 %v3916_v49  ;;  %v4356_v49 = vld [vmem:[#allocation21 + $0x268] sm:$0xff] }
0x1235   : > { %v7191_v22 = vsub.f32 %v7175_v53, %v3845_v30  ;;  %4072 = vmatpush.msrb.mxu1 %v3942_v59  ;;  %v3917_v30 = vld [vmem:[#allocation20 + $0x230] sm:$0xff] }
0x1236   : > { %4052 = vmatpush.msra.mxu3 %v3917_v30  ;;  %4027 = vmatpush.msra.mxu0 %v3912_v44  ;;  %v4369_v30 = vld [vmem:[#allocation21 + $0x2d0] sm:$0xff] }
0x1237   : > { %v3851_v60 = vmul.f32 %v7191_v22, %v7191_v22  ;;  %4073 = vmatpush.msrb.mxu1 %v3938_v4  ;;  %v4401_v44 = vld [vmem:[#allocation21 + $0x3d0] sm:$0xff] }
0x1238   : > { %4053 = vmatpush.msra.mxu3 %v3913_v54  ;;  %4433 = vmatpush.msrb.mxu0 %v4374_v26  ;;  %v7221_v54 = vperm.slane %v4953_v1, 3  ;;  %v4396_v26 = vld [vmem:[#allocation21 + $0x3a8] sm:$0xff] }
0x1239   : > { %3855 = vadd.xlane.f32.xlu1 %v3851_v60  ;;  %4074 = vmatpush.msrb.mxu1 %v3934_v19  ;;  %v3918_v60 = vld [vmem:[#allocation20 + $0x238] sm:$0xff]  ;;  %v4373_v19 = vld [vmem:[#allocation21 + $0x2f0] sm:$0xff] }
0x123a   : > { %4434 = vmatpush.msrb.mxu0 %v4373_v19  ;;  %4459 = vmatpush.msrb.mxu3 %v4390_v17  ;;  %v4363_v19 = vld [vmem:[#allocation21 + $0x2a0] sm:$0xff]  ;;  %v4381_v17 = vld [vmem:[#allocation21 + $0x330] sm:$0xff] }
0x123b   : > { %4075 = vmatpush.msrb.mxu1 %v3930_v13 }
0x123c   : > { %4435 = vmatpush.msrb.mxu0 %v4372_v8  ;;  %4460 = vmatpush.msrb.mxu3 %v4389_v21  ;;  %v4395_v8 = vld [vmem:[#allocation21 + $0x3a0] sm:$0xff]  ;;  %v4380_v21 = vld [vmem:[#allocation21 + $0x328] sm:$0xff] }
0x123d   : > { %4076 = vmatpush.msrb.mxu1 %v3926_v41 }
0x123e   : > { %4436 = vmatpush.msrb.mxu0 %v4371_v11 }
0x123f   : > { %4077 = vmatpush.msrb.mxu1 %v3922_v29 }
0x1240   : > { %4437 = vmatpush.msrb.mxu0 %v4370_v63 }
0x1241   : > { %4078 = vmatpush.msrb.mxu1 %v3918_v60  ;;  %v4388_v60 = vld [vmem:[#allocation21 + $0x368] sm:$0xff] }
0x1242   : > { %4438 = vmatpush.msrb.mxu0 %v4369_v30  ;;  %4461 = vmatpush.msrb.mxu3 %v4388_v60  ;;  %v4347_v30 = vld [vmem:[#allocation21 + $0x220] sm:$0xff]  ;;  %v4360_v60 = vld [vmem:[#allocation21 + $0x288] sm:$0xff] }
0x1243   : > { %4079 = vmatpush.msrb.mxu1 %v3914_v50  ;;  %v4368_v50 = vld [vmem:[#allocation21 + $0x2c8] sm:$0xff] }
0x1244   : > { %4439 = vmatpush.msrb.mxu0 %v4368_v50 }
0x129b   : > { %v3854_v7 = vpop.xlane.xlu1 %3853 }
0x129c   : > { %v3859_v56 = vmul.f32 %v3854_v7, %v6351_v51 }
0x129e   : > { %v3862_v46 = vadd.f32 1e-05, %v3859_v56  ;;  %v4406_v56 = vld [vmem:[#allocation21 + $0x3f8] sm:$0xff] }
0x129f   : > { %v3843_v52 = vpop.xlane.xlu0 %3842  ;;  %4485 = vmatpush.msra.mxu1 %v4406_v56 }
0x12a0   : > { %5380 = vrsqrt.f32 %v3862_v46  ;;  %v3846_v34 = vmul.f32 %v3843_v52, %v6351_v51  ;;  %vm3871_vm8 = vweird.f32 %v3862_v46  ;;  %v4358_v52 = vld [vmem:[#allocation21 + $0x278] sm:$0xff] }
0x12a1   : > { %4486 = vmatpush.msra.mxu1 %v4405_v10  ;;  %4407 = vmatpush.msra.mxu2 %v4358_v52  ;;  %v4362_v52 = vld [vmem:[#allocation21 + $0x298] sm:$0xff] }
0x12a2   : > { %v7198_v55 = vsub.f32 %v7186_v28, %v3846_v34  ;;  %v4403_v34 = vld [vmem:[#allocation21 + $0x3e0] sm:$0xff] }
0x12a3   : > { %4408 = vmatpush.msra.mxu2 %v4357_v12  ;;  %v4361_v12 = vld [vmem:[#allocation21 + $0x290] sm:$0xff] }
0x12a4   : > { %v3852_v31 = vmul.f32 %v7198_v55, %v7198_v55 }
0x12a5   : > { %4409 = vmatpush.msra.mxu2 %v4356_v49 }
0x12a6   : > { %v5381_v43 = vpop.eup %5380  ;;  %3857 = vadd.xlane.f32.xlu2 %v3852_v31 }
0x12a7   : > { %v3866_v48 = vmul.f32 %v5381_v43, %v3862_v46  ;;  %vm3872_vm4 = vweird.f32 %v5381_v43  ;;  %v4404_v46 = vld [vmem:[#allocation21 + $0x3e8] sm:$0xff] }
0x12a8   : > { %vm3873_vm1 = vmor %vm3871_vm8, %vm3872_vm4  ;;  %4487 = vmatpush.msra.mxu1 %v4404_v46 }
0x12a9   : > { %v3867_v32 = vmul.f32 %v5381_v43, %v3866_v48 }
0x12aa   : > { %4488 = vmatpush.msra.mxu1 %v4403_v34 }
0x12ab   : > { %v3868_v61 = vmul.f32 0.5, %v3867_v32  ;;  %v4400_v32 = vld [vmem:[#allocation21 + $0x3c8] sm:$0xff] }
0x12ac   : > { %v3856_v37 = vpop.xlane.xlu1 %3855  ;;  %4489 = vmatpush.msra.mxu1 %v4402_v20 }
0x12ad   : > { %v3860_v35 = vmul.f32 %v3856_v37, %v6351_v51  ;;  %v3869_v47 = vsub.f32 1.5, %v3868_v61  ;;  %v4354_v37 = vld [vmem:[#allocation21 + $0x258] sm:$0xff] }
0x12ae   : > { %4490 = vmatpush.msra.mxu1 %v4401_v44  ;;  %v4379_v44 = vld [vmem:[#allocation21 + $0x320] sm:$0xff] }
0x12af   : > { %v3863_v3 = vadd.f32 1e-05, %v3860_v35  ;;  %v3870_v9 = vmul.f32 %v5381_v43, %v3869_v47  ;;  %v4367_v35 = vld [vmem:[#allocation21 + $0x2c0] sm:$0xff] }
0x12b0   : > { %4491 = vmatpush.msra.mxu1 %v4400_v32  ;;  %4440 = vmatpush.msrb.mxu0 %v4367_v35 }
0x12b1   : > { %5382 = vrsqrt.f32 %v3863_v3  ;;  %v3874_v62 = vsel %vm3873_vm1, %v5381_v43, %v3870_v9  ;;  %vm3881_vm3 = vweird.f32 %v3863_v3  ;;  %v4387_v43 = vld [vmem:[#allocation21 + $0x360] sm:$0xff]  ;;  %v4386_v9 = vld [vmem:[#allocation21 + $0x358] sm:$0xff] }
0x12b2   : > { %v3895_v36 = vmul.f32 %v3874_v62, %v7181_v0  ;;  %4462 = vmatpush.msrb.mxu3 %v4387_v43  ;;  %v4346_v43 = vld [vmem:[#allocation21 + $0x218] sm:$0xff] }
0x12b4   : > { %v3901_v24 = vmul.f32 %v7203_v15, %v3895_v36  ;;  %v4353_v36 = vld [vmem:[#allocation21 + $0x250] sm:$0xff]  ;;  %4463 = vmatpush.msrb.mxu3 %v4386_v9 }
0x12b5   : > { %v4345_v9 = vld [vmem:[#allocation21 + $0x210] sm:$0xff] }
0x12b6   : > { %v3907_v16 = vadd.f32 %v7206_v57, %v3901_v24 }
0x12b7   : > { %v5383_v39 = vpop.eup %5382 }
0x12b8   : > { %v3876_v2 = vmul.f32 %v5383_v39, %v3863_v3  ;;  %4002 = vmatmul.f32.vlgmr.msrb.gmra.mxu2 %v3907_v16  ;;  %4028 = vmatmul.f32.vlgmr.msra.gmra.mxu0 %v3907_v16  ;;  %vm3882_vm2 = vweird.f32 %v5383_v39 }
0x12b9   : > { %4054 = vmatmul.f32.vlgmr.msra.gmra.mxu3 %v3907_v16  ;;  %4080 = vmatmul.f32.vlgmr.msrb.gmra.mxu1 %v3907_v16  ;;  %vm3883_vm5 = vmor %vm3881_vm3, %vm3882_vm2  ;;  %v4385_v16 = vld [vmem:[#allocation21 + $0x350] sm:$0xff] }
0x12ba   : > { %v3877_v14 = vmul.f32 %v5383_v39, %v3876_v2  ;;  %v4398_v2 = vld [vmem:[#allocation21 + $0x3b8] sm:$0xff]  ;;  %4464 = vmatpush.msrb.mxu3 %v4385_v16 }
0x12bc   : > { %v3878_v42 = vmul.f32 0.5, %v3877_v14 }
0x12be   : > { %v3879_v18 = vsub.f32 1.5, %v3878_v42  ;;  %v7234_v42 = vperm.slane %v4953_v1, 2 }
0x12c0   : > { %v3880_v38 = vmul.f32 %v5383_v39, %v3879_v18  ;;  %v4352_v18 = vld [vmem:[#allocation21 + $0x248] sm:$0xff] }
0x12c2   : > { %v3884_v0 = vsel %vm3883_vm5, %v5383_v39, %v3880_v38  ;;  %v7231_v39 = vperm.slane %v4953_v1, 0  ;;  %v4365_v38 = vld [vmem:[#allocation21 + $0x2b0] sm:$0xff]  ;;  %v4394_v1 = vld [vmem:[#allocation21 + $0x398] sm:$0xff] }
0x12c3   : > { %v3896_v33 = vmul.f32 %v3884_v0, %v7191_v22 }
0x12c5   : > { %v3902_v59 = vmul.f32 %v7203_v15, %v3896_v33  ;;  %v4384_v33 = vld [vmem:[#allocation21 + $0x348] sm:$0xff] }
0x12c6   : > { %4465 = vmatpush.msrb.mxu3 %v4384_v33 }
0x12c7   : > { %v3908_v45 = vadd.f32 %v7206_v57, %v3902_v59  ;;  %v4397_v59 = vld [vmem:[#allocation21 + $0x3b0] sm:$0xff] }
0x12c9   : > { %4005 = vmatmul.f32.gmra.mxu2 %v3908_v45  ;;  %4031 = vmatmul.f32.gmra.mxu0 %v3908_v45 }
0x12ca   : > { %4057 = vmatmul.f32.gmra.mxu3 %v3908_v45  ;;  %4083 = vmatmul.f32.gmra.mxu1 %v3908_v45 }
0x1319   : > { %v3858_v27 = vpop.xlane.xlu2 %3857 }
0x131a   : > { %v3861_v58 = vmul.f32 %v3858_v27, %v6351_v51 }
0x131c   : > { %v3864_v4 = vadd.f32 1e-05, %v3861_v58  ;;  %v4351_v58 = vld [vmem:[#allocation21 + $0x240] sm:$0xff] }
0x131e   : > { %5384 = vrsqrt.f32 %v3864_v4  ;;  %vm3891_vm7 = vweird.f32 %v3864_v4 }
0x1324   : > { %v5385_v7 = vpop.eup %5384 }
0x1325   : > { %v3886_v40 = vmul.f32 %v5385_v7, %v3864_v4  ;;  %vm3892_vm6 = vweird.f32 %v5385_v7  ;;  %v4364_v4 = vld [vmem:[#allocation21 + $0x2a8] sm:$0xff] }
0x1326   : > { %vm3893_vm9 = vmor %vm3891_vm7, %vm3892_vm6 }
0x1327   : > { %v3887_v23 = vmul.f32 %v5385_v7, %v3886_v40 }
0x1329   : > { %v3888_v22 = vmul.f32 0.5, %v3887_v23  ;;  %v4383_v23 = vld [vmem:[#allocation21 + $0x340] sm:$0xff] }
0x132a   : > { %4466 = vmatpush.msrb.mxu3 %v4383_v23 }
0x132b   : > { %v3889_v6 = vsub.f32 1.5, %v3888_v22  ;;  %v4350_v22 = vld [vmem:[#allocation21 + $0x238] sm:$0xff] }
0x132d   : > { %v3890_v13 = vmul.f32 %v5385_v7, %v3889_v6  ;;  %v4382_v6 = vld [vmem:[#allocation21 + $0x338] sm:$0xff] }
0x132e   : > { %4467 = vmatpush.msrb.mxu3 %v4382_v6 }
0x132f   : > { %v3894_v41 = vsel %vm3893_vm9, %v5385_v7, %v3890_v13  ;;  %v4349_v13 = vld [vmem:[#allocation21 + $0x230] sm:$0xff] }
0x1330   : > { %v3897_v29 = vmul.f32 %v3894_v41, %v7198_v55  ;;  %v4355_v55 = vld [vmem:[#allocation21 + $0x260] sm:$0xff]  ;;  %v4348_v41 = vld [vmem:[#allocation21 + $0x228] sm:$0xff]  ;;  %4468 = vmatpush.msrb.mxu3 %v4381_v17 }
0x1331   : > { %4410 = vmatpush.msra.mxu2 %v4355_v55  ;;  %v4392_v55 = vld [vmem:[#allocation21 + $0x388] sm:$0xff] }
0x1332   : > { %v3903_v31 = vmul.f32 %v7203_v15, %v3897_v29  ;;  %v4399_v15 = vld [vmem:[#allocation21 + $0x3c0] sm:$0xff]  ;;  %v4393_v29 = vld [vmem:[#allocation21 + $0x390] sm:$0xff]  ;;  %4469 = vmatpush.msrb.mxu3 %v4380_v21 }
0x1333   : > { %4411 = vmatpush.msra.mxu2 %v4354_v37  ;;  %4492 = vmatpush.msra.mxu1 %v4399_v15  ;;  %v4391_v37 = vld [vmem:[#allocation21 + $0x380] sm:$0xff] }
0x1334   : > { %v3909_v48 = vadd.f32 %v7206_v57, %v3903_v31  ;;  %v4366_v57 = vld [vmem:[#allocation21 + $0x2b8] sm:$0xff]  ;;  %4470 = vmatpush.msrb.mxu3 %v4379_v44 }
0x1335   : > { %v4029_v61 = vpop.f32.mrf.mxu0  ;;  %4412 = vmatpush.msra.mxu2 %v4353_v36  ;;  %4441 = vmatpush.msrb.mxu0 %v4366_v57  ;;  %v4377_v57 = vld [vmem:[#allocation21 + $0x310] sm:$0xff] }
0x1336   : > { %v7225_v47 = vadd.f32 %v4029_v61, %v7218_v25  ;;  %v4081_v3 = vpop.f32.mrf.mxu1  ;;  %4008 = vmatmul.f32.gmra.mxu2 %v3909_v48  ;;  %4034 = vmatmul.f32.gmra.mxu0 %v3909_v48  ;;  %v4378_v61 = vld [vmem:[#allocation21 + $0x318] sm:$0xff] }
0x1337   : > { %v7228_v62 = vadd.f32 %v4081_v3, %v7221_v54  ;;  %4060 = vmatmul.f32.gmra.mxu3 %v3909_v48  ;;  %4086 = vmatmul.f32.gmra.mxu1 %v3909_v48  ;;  %v4359_v48 = vld [vmem:[#allocation21 + $0x280] sm:$0xff] }
0x1338   : > { %v4955_v24 = vmul.f32 -1.702, %v7225_v47  ;;  %4493 = vmatpush.msra.mxu1 %v4398_v2  ;;  %4413 = vmatpush.msra.mxu2 %v4352_v18  ;;  %v4344_v18 = vld [vmem:[#allocation21 + $0x208] sm:$0xff] }
0x1339   : > { %v4957_v14 = vmul.f32 -1.702, %v7228_v62  ;;  %4442 = vmatpush.msrb.mxu0 %v4365_v38  ;;  %4471 = vmatpush.msrb.mxu3 %v4378_v61 }
0x133a   : > { %v4116_v0 = vmul.f32 1.442695, %v4955_v24  ;;  %4494 = vmatpush.msra.mxu1 %v4397_v59  ;;  %4414 = vmatpush.msra.mxu2 %v4351_v58  ;;  %v4376_v59 = vld [vmem:[#allocation21 + $0x308] sm:$0xff]  ;;  %v4343_v58 = vld [vmem:[#allocation21 + $0x200] sm:$0xff] }
0x133b   : > { %v4120_v45 = vmul.f32 1.442695, %v4957_v14  ;;  %v4003_v27 = vpop.f32.mrf.mxu2  ;;  %4443 = vmatpush.msrb.mxu0 %v4364_v4  ;;  %4472 = vmatpush.msrb.mxu3 %v4377_v57 }
0x133c   : > { %5386 = vpow2.f32 %v4116_v0  ;;  %v7237_v7 = vadd.f32 %v4003_v27, %v7231_v39  ;;  %v4055_v40 = vpop.f32.mrf.mxu3  ;;  %4495 = vmatpush.msra.mxu1 %v4396_v26  ;;  %4415 = vmatpush.msra.mxu2 %v4350_v22  ;;  %v4375_v22 = vld [vmem:[#allocation21 + $0x300] sm:$0xff] }
0x133d   : > { %5388 = vpow2.f32 %v4120_v45  ;;  %v7240_v56 = vadd.f32 %v4055_v40, %v7234_v42  ;;  %4444 = vmatpush.msrb.mxu0 %v4363_v19  ;;  %4473 = vmatpush.msrb.mxu3 %v4376_v59 }
0x133e   : > { %v4954_v10 = vmul.f32 -1.702, %v7237_v7  ;;  %4496 = vmatpush.msra.mxu1 %v4395_v8  ;;  %4416 = vmatpush.msra.mxu2 %v4349_v13 }
0x133f   : > { %v4956_v46 = vmul.f32 -1.702, %v7240_v56  ;;  %4445 = vmatpush.msrb.mxu0 %v4362_v52  ;;  %4474 = vmatpush.msrb.mxu3 %v4375_v22 }
0x1340   : > { %v4114_v11 = vmul.f32 1.442695, %v4954_v10  ;;  %4497 = vmatpush.msra.mxu1 %v4394_v1  ;;  %4417 = vmatpush.msra.mxu2 %v4348_v41 }
0x1341   : > { %v4118_v34 = vmul.f32 1.442695, %v4956_v46  ;;  %4446 = vmatpush.msrb.mxu0 %v4361_v12 }
0x1342   : > { %v5387_v63 = vpop.eup %5386  ;;  %5390 = vpow2.f32 %v4114_v11  ;;  %4498 = vmatpush.msra.mxu1 %v4393_v29  ;;  %4418 = vmatpush.msra.mxu2 %v4347_v30 }
0x1343   : > { %v5389_v20 = vpop.eup %5388  ;;  %v7244_v49 = vadd.f32 1.0, %v5387_v63  ;;  %5392 = vpow2.f32 %v4118_v34  ;;  %4447 = vmatpush.msrb.mxu0 %v4360_v60 }
0x1344   : > { %v7246_v31 = vadd.f32 1.0, %v5389_v20  ;;  %4499 = vmatpush.msra.mxu1 %v4392_v55  ;;  %4419 = vmatpush.msra.mxu2 %v4346_v43 }
0x1345   : > { %5394 = vrcp.f32 %v7244_v49  ;;  %v4174_v36 = vand.u32 2147483647, %v7244_v49  ;;  %4448 = vmatpush.msrb.mxu0 %v4359_v48  ;;  %v4176_v16 = vand.u32 2147483648, %v7244_v49  ;;  %vm4170_vm10 = vweird.f32 %v7244_v49 }
0x1346   : > { %v4032_v50 = vpop.f32.mrf.mxu0  ;;  %5396 = vrcp.f32 %v7246_v31  ;;  %v4204_v2 = vand.u32 2147483647, %v7246_v31  ;;  %4500 = vmatpush.msra.mxu1 %v4391_v37  ;;  %v4206_v38 = vand.u32 2147483648, %v7246_v31  ;;  %4420 = vmatpush.msra.mxu2 %v4345_v9  ;;  %vm4200_vm11 = vweird.f32 %v7246_v31 }
0x1347   : > { %v4084_v32 = vpop.f32.mrf.mxu1  ;;  %v7251_v35 = vadd.f32 %v4032_v50, %v7218_v25  ;;  %vm7271_vm12 = vcmp.eq.f32.partialorder %v4174_v36, 8.507059e+37  ;;  %v4177_v10 = vor.u32 1.1754944e-38, %v4176_v16 }
0x1348   : > { %v7254_v3 = vadd.f32 %v4084_v32, %v7221_v54  ;;  %v5391_v15 = vpop.eup %5390  ;;  %4421 = vmatpush.msra.mxu2 %v4344_v18  ;;  %vm7276_vm13 = vcmp.eq.f32.partialorder %v4204_v2, 8.507059e+37  ;;  %v4207_v13 = vor.u32 1.1754944e-38, %v4206_v38 }
0x1349   : > { %v5393_v24 = vpop.eup %5392  ;;  %v7259_v14 = vadd.f32 1.0, %v5391_v15  ;;  %v4959_v33 = vmul.f32 -1.702, %v7251_v35 }
0x134a   : > { %v7262_v0 = vadd.f32 1.0, %v5393_v24  ;;  %v4961_v27 = vmul.f32 -1.702, %v7254_v3  ;;  %4422 = vmatpush.msra.mxu2 %v4343_v58 }
0x134b   : > { %v5395_v45 = vpop.eup %5394  ;;  %5398 = vrcp.f32 %v7259_v14  ;;  %v4159_v52 = vand.u32 2147483647, %v7259_v14  ;;  %v4124_v11 = vmul.f32 1.442695, %v4959_v33  ;;  %v4161_v55 = vand.u32 2147483648, %v7259_v14 }
0x134c   : > { %v5397_v4 = vpop.eup %5396  ;;  %v4166_v40 = vmul.f32 %v5395_v45, %v7244_v49  ;;  %5400 = vrcp.f32 %v7262_v0  ;;  %v4006_v23 = vpop.f32.mrf.mxu2  ;;  %v4128_v1 = vmul.f32 1.442695, %v4961_v27  ;;  %vm4171_vm14 = vweird.f32 %v5395_v45 }
0x134d   : > { %v4058_v26 = vpop.f32.mrf.mxu3  ;;  %v4196_v6 = vmul.f32 %v5397_v4, %v7246_v31  ;;  %v7282_v34 = vadd.f32 %v4006_v23, %v7231_v39  ;;  %vm4201_vm15 = vweird.f32 %v5397_v4  ;;  %5402 = vpow2.f32 %v4124_v11  ;;  %vm4172_vm0 = vmor %vm4170_vm10, %vm4171_vm14 }
0x134e   : > { %v4167_v46 = vsub.f32 1.0, %v4166_v40  ;;  %v7285_v41 = vadd.f32 %v4058_v26, %v7234_v42  ;;  %5404 = vpow2.f32 %v4128_v1  ;;  %v4189_v50 = vand.u32 2147483647, %v7262_v0  ;;  %vm4202_vm4 = vmor %vm4200_vm11, %vm4201_vm15 }
0x134f   : > { %v4197_v17 = vsub.f32 1.0, %v4196_v6  ;;  %v4958_v29 = vmul.f32 -1.702, %v7282_v34  ;;  %v4191_v32 = vand.u32 2147483648, %v7262_v0  ;;  %vm4155_vm2 = vweird.f32 %v7259_v14 }
0x1350   : > { %v4168_v12 = vmul.f32 %v5395_v45, %v4167_v46  ;;  %v4960_v20 = vmul.f32 -1.702, %v7285_v41  ;;  %v4162_v58 = vor.u32 1.1754944e-38, %v4161_v55  ;;  %vm4185_vm5 = vweird.f32 %v7262_v0 }
0x1351   : > { %v5399_v63 = vpop.eup %5398  ;;  %v4198_v21 = vmul.f32 %v5397_v4, %v4197_v17  ;;  %v4122_v61 = vmul.f32 1.442695, %v4958_v29  ;;  %vm4160_vm6 = vcmp.eq.f32.partialorder %v4159_v52, 8.507059e+37  ;;  %vm4190_vm9 = vcmp.eq.f32.partialorder %v4189_v50, 8.507059e+37 }
0x1352   : > { %v5401_v30 = vpop.eup %5400  ;;  %v4169_v60 = vadd.f32 %v5395_v45, %v4168_v12  ;;  %v4151_v44 = vmul.f32 %v5399_v63, %v7259_v14  ;;  %vm4156_vm8 = vweird.f32 %v5399_v63  ;;  %v4126_v15 = vmul.f32 1.442695, %v4960_v20 }
0x1353   : > { %v4199_v43 = vadd.f32 %v5397_v4, %v4198_v21  ;;  %v4181_v48 = vmul.f32 %v5401_v30, %v7262_v0  ;;  %5406 = vpow2.f32 %v4122_v61  ;;  %v5403_v24 = vpop.eup %5402  ;;  %vm4186_vm1 = vweird.f32 %v5401_v30  ;;  %vm4157_vm3 = vmor %vm4155_vm2, %vm4156_vm8 }
0x1354   : > { %v4173_v37 = vsel %vm4172_vm0, %v5395_v45, %v4169_v60  ;;  %v4152_v9 = vsub.f32 1.0, %v4151_v44  ;;  %5408 = vpow2.f32 %v4126_v15  ;;  %v5405_v38 = vpop.eup %5404  ;;  %v4143_v59 = vadd.f32 1.0, %v5403_v24  ;;  %vm4187_vm7 = vmor %vm4185_vm5, %vm4186_vm1 }
0x1355   : > { %v4178_v36 = vsel %vm7271_vm12, %v4177_v10, %v4173_v37  ;;  %v4203_v57 = vsel %vm4202_vm4, %v5397_v4, %v4199_v43  ;;  %v4182_v49 = vsub.f32 1.0, %v4181_v48  ;;  %v4145_v27 = vadd.f32 1.0, %v5405_v38 }
0x1356   : > { %v4331_v16 = vmul.f32 %v4178_v36, %v7225_v47  ;;  %v4208_v2 = vsel %vm7276_vm13, %v4207_v13, %v4203_v57  ;;  %v4153_v18 = vmul.f32 %v5399_v63, %v4152_v9  ;;  %5410 = vrcp.f32 %v4143_v59 }
0x1357   : > { %v4333_v31 = vmul.f32 %v4208_v2, %v7228_v62  ;;  %v4183_v33 = vmul.f32 %v5401_v30, %v4182_v49  ;;  %v4192_v62 = vor.u32 1.1754944e-38, %v4191_v32  ;;  %5412 = vrcp.f32 %v4145_v27 }
0x1358   : > { %v4154_v45 = vadd.f32 %v5399_v63, %v4153_v18  ;;  %4449 = vmatmul.f32.vlgmr.msrb.gmra.mxu0 %v4331_v16  ;;  %v4234_v17 = vand.u32 2147483647, %v4143_v59  ;;  %v4236_v1 = vand.u32 2147483648, %v4143_v59  ;;  %vm4230_vm11 = vweird.f32 %v4143_v59 }
0x1359   : > { %v4184_v47 = vadd.f32 %v5401_v30, %v4183_v33  ;;  %4501 = vmatmul.f32.vlgmr.msra.gmra.mxu1 %v4333_v31  ;;  %v5407_v40 = vpop.eup %5406  ;;  %vm4260_vm12 = vweird.f32 %v4145_v27 }
0x135a   : > { %v4158_v4 = vsel %vm4157_vm3, %v5399_v63, %v4154_v45  ;;  %v5409_v14 = vpop.eup %5408  ;;  %v4142_v6 = vadd.f32 1.0, %v5407_v40  ;;  %v4266_v63 = vand.u32 2147483648, %v4145_v27  ;;  %vm4235_vm14 = vcmp.eq.f32.partialorder %v4234_v17, 8.507059e+37 }
0x135b   : > { %v4163_v23 = vsel %vm4160_vm6, %v4162_v58, %v4158_v4  ;;  %v4188_v26 = vsel %vm4187_vm7, %v5401_v30, %v4184_v47  ;;  %v7310_v8 = vadd.f32 1.0, %v5409_v14  ;;  %v4237_v60 = vor.u32 1.1754944e-38, %v4236_v1 }
0x135c   : > { %v4330_v22 = vmul.f32 %v4163_v23, %v7237_v7  ;;  %v4193_v19 = vsel %vm4190_vm9, %v4192_v62, %v4188_v26  ;;  %v5411_v0 = vpop.eup %5410  ;;  %5414 = vrcp.f32 %v4142_v6  ;;  %v4264_v7 = vand.u32 2147483647, %v4145_v27 }
0x135d   : > { %v4332_v10 = vmul.f32 %v4193_v19, %v7240_v56  ;;  %v5413_v46 = vpop.eup %5412  ;;  %v4226_v13 = vmul.f32 %v5411_v0, %v4143_v59  ;;  %5416 = vrcp.f32 %v7310_v8  ;;  %vm4231_vm10 = vweird.f32 %v5411_v0 }
0x135e   : > { %4423 = vmatmul.f32.vlgmr.msra.gmra.mxu2 %v4330_v22  ;;  %v4256_v52 = vmul.f32 %v5413_v46, %v4145_v27  ;;  %vm4261_vm13 = vweird.f32 %v5413_v46  ;;  %vm4232_vm15 = vmor %vm4230_vm11, %vm4231_vm10  ;;  %vm4265_vm0 = vcmp.eq.f32.partialorder %v4264_v7, 8.507059e+37  ;;  %v4267_v50 = vor.u32 1.1754944e-38, %v4266_v63 }
0x135f   : > { %4475 = vmatmul.f32.vlgmr.msrb.gmra.mxu3 %v4332_v10  ;;  %v4227_v11 = vsub.f32 1.0, %v4226_v13  ;;  %vm4262_vm4 = vmor %vm4260_vm12, %vm4261_vm13  ;;  %v4219_v61 = vand.u32 2147483647, %v4142_v6  ;;  %v4221_v37 = vand.u32 2147483648, %v4142_v6  ;;  %v4251_v57 = vand.u32 2147483648, %v7310_v8 }
0x1360   : > { %v4257_v12 = vsub.f32 1.0, %v4256_v52  ;;  %v4249_v38 = vand.u32 2147483647, %v7310_v8  ;;  %vm4215_vm2 = vweird.f32 %v4142_v6  ;;  %vm4245_vm5 = vweird.f32 %v7310_v8 }
0x1361   : > { %v4228_v21 = vmul.f32 %v5411_v0, %v4227_v11  ;;  %v4222_v33 = vor.u32 1.1754944e-38, %v4221_v37  ;;  %vm4220_vm6 = vcmp.eq.f32.partialorder %v4219_v61, 8.507059e+37 }
0x1362   : > { %v5415_v56 = vpop.eup %5414  ;;  %v4258_v29 = vmul.f32 %v5413_v46, %v4257_v12  ;;  %vm4250_vm9 = vcmp.eq.f32.partialorder %v4249_v38, 8.507059e+37 }
0x1363   : > { %v5417_v20 = vpop.eup %5416  ;;  %v4229_v30 = vadd.f32 %v5411_v0, %v4228_v21  ;;  %v4211_v44 = vmul.f32 %v5415_v56, %v4142_v6  ;;  %vm4216_vm8 = vweird.f32 %v5415_v56 }
0x1364   : > { %v4259_v55 = vadd.f32 %v5413_v46, %v4258_v29  ;;  %v4241_v43 = vmul.f32 %v5417_v20, %v7310_v8  ;;  %vm4246_vm1 = vweird.f32 %v5417_v20  ;;  %vm4217_vm3 = vmor %vm4215_vm2, %vm4216_vm8 }
0x1365   : > { %v4233_v48 = vsel %vm4232_vm15, %v5411_v0, %v4229_v30  ;;  %v4212_v32 = vsub.f32 1.0, %v4211_v44  ;;  %vm4247_vm7 = vmor %vm4245_vm5, %vm4246_vm1 }
0x1366   : > { %v4238_v9 = vsel %vm4235_vm14, %v4237_v60, %v4233_v48  ;;  %v4263_v15 = vsel %vm4262_vm4, %v5413_v46, %v4259_v55  ;;  %v4242_v36 = vsub.f32 1.0, %v4241_v43 }
0x1367   : > { %v4335_v49 = vmul.f32 %v4238_v9, %v7251_v35  ;;  %v4268_v24 = vsel %vm4265_vm0, %v4267_v50, %v4263_v15  ;;  %v4213_v16 = vmul.f32 %v5415_v56, %v4212_v32  ;;  %v4252_v35 = vor.u32 1.1754944e-38, %v4251_v57 }
0x1368   : > { %v4337_v2 = vmul.f32 %v4268_v24, %v7254_v3  ;;  %v4243_v18 = vmul.f32 %v5417_v20, %v4242_v36 }
0x1369   : > { %v4214_v31 = vadd.f32 %v5415_v56, %v4213_v16  ;;  %4452 = vmatmul.f32.gmra.mxu0 %v4335_v49 }
0x136a   : > { %v4244_v59 = vadd.f32 %v5417_v20, %v4243_v18  ;;  %4504 = vmatmul.f32.gmra.mxu1 %v4337_v2 }
0x136b   : > { %v4218_v45 = vsel %vm4217_vm3, %v5415_v56, %v4214_v31 }
0x136c   : > { %v4223_v27 = vsel %vm4220_vm6, %v4222_v33, %v4218_v45  ;;  %v4248_v58 = vsel %vm4247_vm7, %v5417_v20, %v4244_v59 }
0x136d   : > { %v4334_v3 = vmul.f32 %v4223_v27, %v7282_v34  ;;  %v4253_v47 = vsel %vm4250_vm9, %v4252_v35, %v4248_v58 }
0x136e   : > { %v4336_v4 = vmul.f32 %v4253_v47, %v7285_v41 }
0x136f   : > { %4426 = vmatmul.f32.gmra.mxu2 %v4334_v3 }
0x1370   : > { %4478 = vmatmul.f32.gmra.mxu3 %v4336_v4 }
0x13b3   : > { %v4035_v62 = vpop.f32.mrf.mxu0 }
0x13b4   : > { %v7322_v40 = vadd.f32 %v4035_v62, %v7218_v25  ;;  %v4087_v23 = vpop.f32.mrf.mxu1 }
0x13b5   : > { %v7325_v26 = vadd.f32 %v4087_v23, %v7221_v54 }
0x13b6   : > { %v4963_v14 = vmul.f32 -1.702, %v7322_v40 }
0x13b7   : > { %v4965_v22 = vmul.f32 -1.702, %v7325_v26 }
0x13b8   : > { %v4132_v19 = vmul.f32 1.442695, %v4963_v14 }
0x13b9   : > { %v4136_v10 = vmul.f32 1.442695, %v4965_v22  ;;  %v4009_v34 = vpop.f32.mrf.mxu2 }
0x13ba   : > { %5418 = vpow2.f32 %v4132_v19  ;;  %v7330_v41 = vadd.f32 %v4009_v34, %v7231_v39  ;;  %v4061_v6 = vpop.f32.mrf.mxu3 }
0x13bb   : > { %5420 = vpow2.f32 %v4136_v10  ;;  %v7333_v25 = vadd.f32 %v4061_v6, %v7234_v42 }
0x13bc   : > { %v4962_v8 = vmul.f32 -1.702, %v7330_v41 }
0x13bd   : > { %v4964_v54 = vmul.f32 -1.702, %v7333_v25 }
0x13be   : > { %v4130_v0 = vmul.f32 1.442695, %v4962_v8 }
0x13bf   : > { %v4134_v46 = vmul.f32 1.442695, %v4964_v54 }
0x13c0   : > { %v5419_v13 = vpop.eup %5418  ;;  %5422 = vpow2.f32 %v4130_v0 }
0x13c1   : > { %v5421_v52 = vpop.eup %5420  ;;  %v4147_v11 = vadd.f32 1.0, %v5419_v13  ;;  %5424 = vpow2.f32 %v4134_v46 }
0x13c2   : > { %v4149_v17 = vadd.f32 1.0, %v5421_v52  ;;  %v5209_v52 = vld [vmem:[%s7530_s13 + $0x1] ss:$0 sm:$0xff] }
0x13c3   : > { %5426 = vrcp.f32 %v4147_v11  ;;  %v4294_v20 = vand.u32 2147483647, %v4147_v11  ;;  %v4296_v30 = vand.u32 2147483648, %v4147_v11  ;;  %vm4290_vm11 = vweird.f32 %v4147_v11 }
0x13c4   : > { %5428 = vrcp.f32 %v4149_v17  ;;  %v4324_v44 = vand.u32 2147483647, %v4149_v17  ;;  %v4326_v55 = vand.u32 2147483648, %v4149_v17  ;;  %vm4320_vm12 = vweird.f32 %v4149_v17 }
0x13c5   : > { %vm4295_vm14 = vcmp.eq.f32.partialorder %v4294_v20, 8.507059e+37  ;;  %v4297_v37 = vor.u32 1.1754944e-38, %v4296_v30 }
0x13c6   : > { %v5423_v39 = vpop.eup %5422  ;;  %vm4325_vm0 = vcmp.eq.f32.partialorder %v4324_v44, 8.507059e+37  ;;  %v4327_v36 = vor.u32 1.1754944e-38, %v4326_v55 }
0x13c7   : > { %v5425_v1 = vpop.eup %5424  ;;  %v4146_v12 = vadd.f32 1.0, %v5423_v39 }
0x13c8   : > { %v4148_v7 = vadd.f32 1.0, %v5425_v1 }
0x13c9   : > { %v5427_v42 = vpop.eup %5426  ;;  %5430 = vrcp.f32 %v4146_v12  ;;  %v4279_v16 = vand.u32 2147483647, %v4146_v12  ;;  %v4281_v2 = vand.u32 2147483648, %v4146_v12  ;;  %vm4275_vm2 = vweird.f32 %v4146_v12 }
0x13ca   : > { %v5429_v63 = vpop.eup %5428  ;;  %v4286_v21 = vmul.f32 %v5427_v42, %v4147_v11  ;;  %5432 = vrcp.f32 %v4148_v7  ;;  %vm4291_vm10 = vweird.f32 %v5427_v42  ;;  %v4311_v33 = vand.u32 2147483648, %v4148_v7 }
0x13cb   : > { %v4316_v56 = vmul.f32 %v5429_v63, %v4149_v17  ;;  %vm4321_vm13 = vweird.f32 %v5429_v63  ;;  %vm4292_vm15 = vmor %vm4290_vm11, %vm4291_vm10  ;;  %v4309_v3 = vand.u32 2147483647, %v4148_v7  ;;  %v4282_v4 = vor.u32 1.1754944e-38, %v4281_v2 }
0x13cc   : > { %v4287_v29 = vsub.f32 1.0, %v4286_v21  ;;  %vm4322_vm4 = vmor %vm4320_vm12, %vm4321_vm13  ;;  %vm4305_vm5 = vweird.f32 %v4148_v7  ;;  %vm4280_vm6 = vcmp.eq.f32.partialorder %v4279_v16, 8.507059e+37  ;;  %vm4527_vm10 = vcmask 1040384  }
0x13cd   : > { %v4317_v60 = vsub.f32 1.0, %v4316_v56  ;;  %vm4310_vm9 = vcmp.eq.f32.partialorder %v4309_v3, 8.507059e+37 }
0x13ce   : > { %v4288_v50 = vmul.f32 %v5427_v42, %v4287_v29 }
0x13cf   : > { %v5431_v43 = vpop.eup %5430  ;;  %v4318_v48 = vmul.f32 %v5429_v63, %v4317_v60 }
0x13d0   : > { %v5433_v32 = vpop.eup %5432  ;;  %v4289_v61 = vadd.f32 %v5427_v42, %v4288_v50  ;;  %v4271_v9 = vmul.f32 %v5431_v43, %v4146_v12  ;;  %vm4276_vm8 = vweird.f32 %v5431_v43 }
0x13d1   : > { %v4319_v15 = vadd.f32 %v5429_v63, %v4318_v48  ;;  %v4301_v57 = vmul.f32 %v5433_v32, %v4148_v7  ;;  %vm4306_vm1 = vweird.f32 %v5433_v32  ;;  %vm4277_vm3 = vmor %vm4275_vm2, %vm4276_vm8 }
0x13d2   : > { %v4293_v49 = vsel %vm4292_vm15, %v5427_v42, %v4289_v61  ;;  %v4272_v24 = vsub.f32 1.0, %v4271_v9  ;;  %vm4307_vm7 = vmor %vm4305_vm5, %vm4306_vm1 }
0x13d3   : > { %v4298_v18 = vsel %vm4295_vm14, %v4297_v37, %v4293_v49  ;;  %v4323_v38 = vsel %vm4322_vm4, %v5429_v63, %v4319_v15  ;;  %v4302_v31 = vsub.f32 1.0, %v4301_v57 }
0x13d4   : > { %v4339_v59 = vmul.f32 %v4298_v18, %v7322_v40  ;;  %v4328_v45 = vsel %vm4325_vm0, %v4327_v36, %v4323_v38  ;;  %v4273_v35 = vmul.f32 %v5431_v43, %v4272_v24  ;;  %v4312_v40 = vor.u32 1.1754944e-38, %v4311_v33 }
0x13d5   : > { %v4341_v27 = vmul.f32 %v4328_v45, %v7325_v26  ;;  %v4303_v58 = vmul.f32 %v5433_v32, %v4302_v31  ;;  %v4450_v34 = vpop.f32.mrf.mxu0 }
0x13d6   : > { %v4274_v47 = vadd.f32 %v5431_v43, %v4273_v35  ;;  %4455 = vmatmul.f32.gmra.mxu0 %v4339_v59  ;;  %v4502_v46 = vpop.f32.mrf.mxu1 }
0x13d7   : > { %v4304_v62 = vadd.f32 %v5433_v32, %v4303_v58  ;;  %4507 = vmatmul.f32.gmra.mxu1 %v4341_v27 }
0x13d8   : > { %v4278_v23 = vsel %vm4277_vm3, %v5431_v43, %v4274_v47 }
0x13d9   : > { %v4283_v14 = vsel %vm4280_vm6, %v4282_v4, %v4278_v23  ;;  %v4308_v22 = vsel %vm4307_vm7, %v5433_v32, %v4304_v62 }
0x13da   : > { %v4338_v26 = vmul.f32 %v4283_v14, %v7330_v41  ;;  %v4313_v19 = vsel %vm4310_vm9, %v4312_v40, %v4308_v22 }
0x13db   : > { %v4340_v10 = vmul.f32 %v4313_v19, %v7333_v25 }
0x13dc   : > { %4429 = vmatmul.f32.gmra.mxu2 %v4338_v26 }
0x13dd   : > { %4481 = vmatmul.f32.gmra.mxu3 %v4340_v10 }
0x13e1   : > { %v4424_v6 = vpop.f32.mrf.mxu2 }
0x13e2   : > { %v4451_v8 = vadd.f32 %v4450_v34, %v4424_v6  ;;  %v4476_v54 = vpop.f32.mrf.mxu3 }
0x13e4   : > { %v4477_v0 = vadd.f32 %v4476_v54, %v4451_v8 }
0x13e6   : > { %v4503_v13 = vadd.f32 %v4502_v46, %v4477_v0  ;;  %v4453_v25 = vpop.f32.mrf.mxu0 }
0x13e7   : > { %v4505_v42 = vpop.f32.mrf.mxu1 }
0x13e8   : > { %v4511_v11 = vadd.f32 %v4503_v13, %v7170_v5 }
0x13ea   : > { %v4519_v41 = vadd.f32 %v5209_v52, %v4511_v11 }
0x13ec   : > { %v4528_v17 = vsel %vm4527_vm10, %v4519_v41, 0.0  ;;  %4522 = vst [vmem:[%s7348_s28] sm:$0xff] %v4519_v41 }
0x13ed   : > { %4529 = vadd.xlane.f32.xlu0 %v4528_v17 }
0x13f2   : > { %v4427_v39 = vpop.f32.mrf.mxu2 }
0x13f3   : > { %v4454_v1 = vadd.f32 %v4453_v25, %v4427_v39  ;;  %v4479_v12 = vpop.f32.mrf.mxu3 }
0x13f5   : > { %v4480_v7 = vadd.f32 %v4479_v12, %v4454_v1 }
0x13f7   : > { %v4506_v63 = vadd.f32 %v4505_v42, %v4480_v7 }
0x13f9   : > { %v4512_v5 = vadd.f32 %v4506_v63, %v7175_v53 }
0x13fb   : > { %v4520_v21 = vadd.f32 %v5209_v52, %v4512_v5 }
0x13fd   : > { %4523 = vst [vmem:[%s7348_s28 + $0x8] sm:$0xff] %v4520_v21 }
0x1453   : > { %v4456_v56 = vpop.f32.mrf.mxu0 }
0x1454   : > { %v4508_v50 = vpop.f32.mrf.mxu1 }
0x145f   : > { %v4430_v29 = vpop.f32.mrf.mxu2 }
0x1460   : > { %v4457_v20 = vadd.f32 %v4456_v56, %v4430_v29  ;;  %v4530_v30 = vpop.xlane.xlu0 %4529  ;;  %v4482_v60 = vpop.f32.mrf.mxu3 }
0x1461   : > { %v4531_v44 = vmul.f32 %v4530_v30, %v6351_v51 }
0x1462   : > { %v4483_v55 = vadd.f32 %v4482_v60, %v4457_v20 }
0x1463   : > { %v4532_v43 = vsub.f32 %v4519_v41, %v4531_v44 }
0x1464   : > { %v4509_v48 = vadd.f32 %v4508_v50, %v4483_v55 }
0x1465   : > { %v4533_v32 = vmul.f32 %v4532_v43, %v4532_v43 }
0x1466   : > { %v4513_v53 = vadd.f32 %v4509_v48, %v7186_v28 }
0x1467   : > { %v4534_v61 = vsel %vm4527_vm10, %v4533_v32, 0.0 }
0x1468   : > { %v4521_v37 = vadd.f32 %v5209_v52, %v4513_v53  ;;  %4535 = vadd.xlane.f32.xlu1 %v4534_v61 }
0x146a   : > { %4524 = vst [vmem:[%s7348_s28 + $0x10] sm:$0xff] %v4521_v37 }
0x146b   : > { %5853 = shalt.err (!%p5850_p13)
}
0x146c   : > { %s5986_s11 = smov 128   ;;  %s5987_s26 = smov 8  }
0x146d   : > { %5028 = dma.vmem_to_hbm [thread:$0]  (%p6188_p0), %s4571_s2, 384, %s4573_s30, %s4554_s0, %s5986_s11, %s5986_s11, %s5987_s26  }
0x146e   : > { %s7537_s28 = sld [smem:[#allocation60_spill]]  ;;  %s876_s7 = scalar_lea.vmem [#allocation24], %s6293_s29 }
0x146f   : > { %s7538_s3 = sld [smem:[#allocation57_spill]]  ;;  %s4586_s9 = sshll.u32 %s876_s7, 4  ;;  %s4587_s9 = int_to_ptr.vmem [resolvable:$true] %s4586_s9 }
0x1470   : > { %s7539_s0 = sld [smem:[#allocation58_spill]] }
0x1474   : > { %s4584_s2 = scalar_lea.hbm %s7537_s28, %s6117_s27  ;;  %s4559_s27 = scalar_lea.sflag [#allocation25], %s6293_s29 }
0x1475   : > { %s4588_s4 = sshll.u32 %s4584_s2, 4  ;;  %s5874_s11 = scalar_lea.hbm %s7537_s28, 2  ;;  %s4589_s4 = int_to_ptr.hbm [resolvable:$true] %s4588_s4 }
0x1476   : > { %v4526_v31 = vld [vmem:[%s7539_s0] sm:$0x1]  ;;  %s5868_s25 = sshra.s32 %s4589_s4, 4  ;;  %s5869_s25 = int_to_ptr.hbm [resolvable:$true] %s5868_s25 }
0x1477   : > { %s5870_s16 = scalar_lea.hbm %s5869_s25, 1  ;;  %p5875_p8 = scmp.lt.s32.totalorder %s5869_s25, %s7537_s28 }
0x1478   : > { %p5871_p11 = scmp.ne.s32.totalorder %s5869_s25, %s5870_s16  ;;  %p5876_p3 = scmp.lt.s32.totalorder %s5874_s11, %s5870_s16 }
0x147a   : > { %p5872_p12 = pnand %p5871_p11, %p6188_p0  ;;  %p5877_p9 = por %p5876_p3, %p5875_p8 }
0x147c   : > { %p5873_p2 = pneg %p5872_p12 }
0x147e   : > { %p5878_p4 = pnand %p5877_p9, %p5873_p2 }
0x14db   : > { %v4536_v28 = vpop.xlane.xlu1 %4535 }
0x14dc   : > { %v4537_v9 = vmul.f32 %v4536_v28, %v6351_v51  ;;  %v4525_v51 = vld [vmem:[%s7538_s3] sm:$0x1] }
0x14de   : > { %v4538_v15 = vadd.f32 1e-05, %v4537_v9 }
0x14e0   : > { %5434 = vrsqrt.f32 %v4538_v15  ;;  %vm4545_vm12 = vweird.f32 %v4538_v15 }
0x14e6   : > { %v5435_v36 = vpop.eup %5434 }
0x14e7   : > { %v4540_v57 = vmul.f32 %v5435_v36, %v4538_v15  ;;  %vm4546_vm11 = vweird.f32 %v5435_v36 }
0x14e8   : > { %vm4547_vm13 = vmor %vm4545_vm12, %vm4546_vm11 }
0x14e9   : > { %v4541_v49 = vmul.f32 %v5435_v36, %v4540_v57 }
0x14eb   : > { %v4542_v24 = vmul.f32 0.5, %v4541_v49 }
0x14ed   : > { %v4543_v16 = vsub.f32 1.5, %v4542_v24 }
0x14ef   : > { %v4544_v2 = vmul.f32 %v5435_v36, %v4543_v16 }
0x14f1   : > { %v4548_v18 = vsel %vm4547_vm13, %v5435_v36, %v4544_v2 }
0x14f2   : > { %v4549_v38 = vmul.f32 %v4548_v18, %v4532_v43 }
0x14f4   : > { %v4550_v33 = vmul.f32 %v4549_v38, %v4525_v51 }
0x14f6   : > { %v4551_v59 = vadd.f32 %v4550_v33, %v4526_v31 }
0x14f8   : > { %4552 = vst [vmem:[%s876_s7] sm:$0x1] %v4551_v59 }
0x14f9   : > { %5881 = shalt.err (!%p5878_p4)
}
0x14fa   : > { %5029 = dma.vmem_to_hbm [thread:$0]  (%p6188_p0), %s4587_s9, 16, %s4589_s4, %s4559_s27  }
0x14fb PF: > { %s7540_s29 = sld [smem:[#allocation37_spill]]  ;;  %p7542_p1 = scmp.ge.s32.totalorder %s5956_s24, 2 }
0x14fd   : > { %p5074_p7 = pnand %p7542_p1, %p6194_p5 }
0x14ff   : > { %p5075_p10 = pneg %p5074_p7 }
0x1501   : > { %s4600_s2 = sand.u32 1, %s7540_s29  }
0x1502   : > { %s4601_s17 = scalar_lea.sflag [#allocation4], %s4600_s2 }
0x1503   : > { %5935 = dma.done.wait (%p5075_p10), %s4601_s17, 384  }
0x1504   : > { %5937 = vsyncadd (%p5075_p10), %s4601_s17, 4294966912  ;;  %s4611_s8 = scalar_lea.sflag [#allocation25], %s4600_s2 }
0x1505   : > { %5939 = dma.done.wait (%p5075_p10), %s4611_s8, 16  }
0x1506   : > { %5941 = vsyncadd (%p5075_p10), %s4611_s8, 4294967280  ;;  %s7543_s24 = sld [smem:[#allocation39_spill]]  ;;  %s7546_s1 = smov %s5948_s22 }
0x1507   : > { %s7544_s3 = sld [smem:[#allocation38_spill]] }
0x1508   : > { %s7545_s23 = sld [smem:[#allocation40_spill]] }
0x150c   : > { %p43_p0 = scmp.ge.s32.totalorder %s7543_s24, 4  }
0x150d   : > { %s7547_s22 = smov %s7544_s3 }
0x150e   :  { %45 = sbr.rel (!%p43_p0) target bundleno = 32 (0x20), region = 225 }
0x1513   :  { %4616 = vsyncpa [#allocation3], 1 }
0x1514   :  { %4618 = vsyncpa [#allocation3 + $0x1], 1 }
0x1515   :  { %4619 = vsyncpa [#allocation6], 1 }
0x1516   :  { %4620 = vsyncpa [#allocation10], 1 }
0x1517   :  { %4621 = vsyncpa [#allocation13], 1 }
0x1518   :  { %4622 = vsyncpa [#allocation16], 1 }
0x1519   :  { %4623 = vsyncpa [#allocation19], 1 }
0x151a   :  { %4624 = vsyncpa [#allocation22], 1 }
0x151b   :  { %4625 = vsyncpa [#allocation4], 1 }
0x151c   :  { %4627 = vsyncpa [#allocation4 + $0x1], 1 }
0x151d   :  { %4628 = vsyncpa [#allocation25], 1 }
0x151e   :  { %4630 = vsyncpa [#allocation25 + $0x1], 1 }

</bundles_post_ra>
